<compile_context>
chip_gen: v7x
topology: tpu7x:2x2x1
jax: 0.10.0
libtpu: 0.0.40
codegen_flags: <defaults>
</compile_context>

<pallas_src>
import jax
import jax.numpy as jnp
from jax import lax
from jax.experimental import pallas as pl
from jax.experimental.pallas import tpu as pltpu

_C_PAD = 128                    # lane-dense output width for the fc logits
MATMUL_DTYPE = jnp.float32      # set to jnp.bfloat16 for single-pass MXU matmuls


def _round_up(n, m):
    return (n + m - 1) // m * m


def lstm3_ln_fc_kernel(x_ref,     # [T*B, Ip]      time-major input (row t*B + b), Ip = pad8(I)
                       w_ref,     # [Ip + 5H, 4H]  weight slab, rows:
                                  #   [0:Ip]=Wih0 [Ip:+H]=Whh0 then Wih1 Whh1 Wih2 Whh2
                                  #   gate columns pre-permuted to [f | i | o | g]
                       b_ref,     # [6, 4H] rows: b0 | b1 | b2 | ln_g(pad) | ln_b(pad) | fc_b(pad)
                       fcw_ref,   # [H, C_PAD]     fc weight (transposed, zero-padded)
                       out_ref):  # [B, C_PAD]     logits (padded)
    TB, Ip = x_ref.shape
    B = out_ref.shape[0]
    T = TB // B
    G = w_ref.shape[1]
    H = G // 4
    f32 = jnp.float32
    mm_dt = w_ref.dtype

    # Row offsets inside the weight slab (all multiples of 8 -> sublane-aligned slices).
    r_whh0 = Ip
    r_wih1 = Ip + H
    r_whh1 = Ip + 2 * H
    r_wih2 = Ip + 3 * H
    r_whh2 = Ip + 4 * H

    def mxu(a, w):
        # Matmul operands optionally in bf16 (MATMUL_DTYPE); accumulation always f32.
        return jnp.dot(a.astype(mm_dt), w, preferred_element_type=f32)

    # Hoisted layer-0 input projection (+ bias) for all timesteps: one matmul, kept as an
    # SSA value and statically sliced under the unrolled recurrence (no VMEM scratch).
    xw = mxu(x_ref[...], w_ref[0:Ip, :]) + jnp.broadcast_to(b_ref[0:1, :], (TB, G))

    # Hoist bias broadcasts out of the unrolled loop (JAX does not CSE broadcast_in_dim).
    b1b = jnp.broadcast_to(b_ref[1:2, :], (B, G))
    b2b = jnp.broadcast_to(b_ref[2:3, :], (B, G))

    # Lane constants so a cell's four gates need a single full-width tanh:
    # gate order is [f | i | o | g]; sigmoid(x) = 0.5*tanh(0.5x)+0.5 on f/i/o, tanh on g.
    lane = lax.broadcasted_iota(jnp.int32, (B, G), 1)
    scale = jnp.where(lane >= 3 * H, 1.0, 0.5).astype(f32)
    shift = jnp.where(lane >= 3 * H, 0.0, 0.5).astype(f32)

    def cell(z, c):
        gates = jnp.tanh(z * scale) * scale + shift        # [B, 4H] = [f | i | o | g]
        left = gates[:, 0:2 * H]                           # [f | i]  (lane-aligned halves)
        right = gates[:, 2 * H:4 * H]                      # [o | g]
        ig = (left * right)[:, H:2 * H]                    # i*g: one lane-rotate per cell
        f_g = left[:, 0:H]                                 # aligned with c
        o_g = right[:, 0:H]                                # aligned with c
        c_new = f_g * c + ig
        h_new = o_g * jnp.tanh(c_new)
        return h_new, c_new

    zeros = jnp.zeros((B, H), f32)
    h1 = c1 = h2 = c2 = h3 = c3 = zeros

    # Wavefront (diagonal) schedule over the 3 stacked layers: diagonal step s runs
    #   layer0 @ t=s, layer1 @ t=s-1, layer2 @ t=s-2,
    # and every cell only consumes state produced at step s-1, so the per-step matmuls
    # and tanh's are mutually independent and pipeline through the MXU/EUP.
    for s in range(T + 2):                                 # statically unrolled
        h1p, h2p = h1, h2                                  # layer-0/1 outputs of step s-1
        if s < T:                                          # layer 0, time s
            z0 = xw[s * B:(s + 1) * B, :] + mxu(h1, w_ref[r_whh0:r_whh0 + H, :])
            h1, c1 = cell(z0, c1)
        if 1 <= s <= T:                                    # layer 1, time s-1
            z1 = (mxu(h1p, w_ref[r_wih1:r_wih1 + H, :])
                  + mxu(h2, w_ref[r_whh1:r_whh1 + H, :]) + b1b)
            h2, c2 = cell(z1, c2)
        if s >= 2:                                         # layer 2, time s-2
            z2 = (mxu(h2p, w_ref[r_wih2:r_wih2 + H, :])
                  + mxu(h3, w_ref[r_whh2:r_whh2 + H, :]) + b2b)
            h3, c3 = cell(z2, c3)

    # LayerNorm over the hidden dim (biased variance, eps=1e-5 — PyTorch), ReLU, fc.
    mu = jnp.mean(h3, axis=-1, keepdims=True)
    xc = h3 - mu
    var = jnp.mean(xc * xc, axis=-1, keepdims=True)
    y = xc * lax.rsqrt(var + 1e-5) * b_ref[3:4, 0:H] + b_ref[4:5, 0:H]
    y = jnp.maximum(y, 0.0)
    Cp = out_ref.shape[1]
    out_ref[...] = (jnp.dot(y.astype(fcw_ref.dtype), fcw_ref[...],
                            preferred_element_type=f32)
                    + b_ref[5:6, 0:Cp]).astype(out_ref.dtype)


def eye_state_triple_lstm_96(x, params):
    """x: [B, T, input_size] (batch_first, like PyTorch). Returns [B, num_classes]."""
    B, T, I = x.shape
    H = params["whh0"].shape[0]
    C = params["fcw"].shape[1]
    G = 4 * H
    Ip = _round_up(I, 8)

    # Gate-column permutation: PyTorch [i | f | g | o]  ->  kernel [f | i | o | g].
    perm = jnp.concatenate([jnp.arange(H, 2 * H), jnp.arange(0, H),
                            jnp.arange(3 * H, 4 * H), jnp.arange(2 * H, 3 * H)])

    def pg(w):
        return w[..., perm]

    # Time-major flattened input (row t*B + b == x[b, t, :]); features zero-padded to Ip.
    x_tm = jnp.transpose(x, (1, 0, 2)).reshape(T * B, I).astype(jnp.float32)
    x_flat = jnp.zeros((T * B, Ip), jnp.float32).at[:, :I].set(x_tm).astype(MATMUL_DTYPE)

    # Packed weight slab: one DMA instead of six, rows 8-aligned for sublane-aligned slices.
    wih0_p = jnp.zeros((Ip, G), jnp.float32).at[:I, :].set(pg(params["wih0"]))
    w_slab = jnp.concatenate(
        [wih0_p, pg(params["whh0"]), pg(params["wih1"]), pg(params["whh1"]),
         pg(params["wih2"]), pg(params["whh2"])], axis=0).astype(MATMUL_DTYPE)

    # Packed bias / LayerNorm / fc-bias slab (kept f32; elementwise math stays f32).
    b_slab = jnp.zeros((6, G), jnp.float32)
    b_slab = b_slab.at[0, :].set(pg(params["b0"])[0])
    b_slab = b_slab.at[1, :].set(pg(params["b1"])[0])
    b_slab = b_slab.at[2, :].set(pg(params["b2"])[0])
    b_slab = b_slab.at[3, :H].set(params["ln_g"][0])
    b_slab = b_slab.at[4, :H].set(params["ln_b"][0])
    b_slab = b_slab.at[5, :C].set(params["fcb"][0])

    # fc weight zero-padded to 128 output lanes -> lane-dense final store.
    fcw_pad = (jnp.zeros((H, _C_PAD), jnp.float32).at[:, :C].set(params["fcw"])
               .astype(MATMUL_DTYPE))

    out = pl.pallas_call(
        lstm3_ln_fc_kernel,
        out_shape=jax.ShapeDtypeStruct((B, _C_PAD), jnp.float32),
        # No grid: total footprint ~0.4 MB, everything VMEM-resident for one invocation.
        # Note: for large batches, add a batch grid axis with
        # dimension_semantics=("parallel",) so v7x's second TensorCore is also used.
        in_specs=[pl.BlockSpec(memory_space=pltpu.MemorySpace.VMEM)] * 4,
        out_specs=pl.BlockSpec(memory_space=pltpu.MemorySpace.VMEM),
    )(x_flat, w_slab, b_slab, fcw_pad)
    return out[:, :C]


def init_params(key, input_size, hidden_size, num_classes):
    """Deterministic synthetic parameters matching nn.LSTM(3 layers) + LayerNorm + Linear."""
    H = hidden_size - 32
    k = 1.0 / jnp.sqrt(H)
    keys = jax.random.split(key, 16)

    def u(kk, shape):
        return jax.random.uniform(kk, shape, jnp.float32, minval=-k, maxval=k)

    # PyTorch stores weight_ih_lN as [4H, in]; pre-transpose to [in, 4H] for x @ W.
    wih0 = u(keys[0], (4 * H, input_size)).T
    whh0 = u(keys[1], (4 * H, H)).T
    b0 = (u(keys[2], (4 * H,)) + u(keys[3], (4 * H,))).reshape(1, 4 * H)
    wih1 = u(keys[4], (4 * H, H)).T
    whh1 = u(keys[5], (4 * H, H)).T
    b1 = (u(keys[6], (4 * H,)) + u(keys[7], (4 * H,))).reshape(1, 4 * H)
    wih2 = u(keys[8], (4 * H, H)).T
    whh2 = u(keys[9], (4 * H, H)).T
    b2 = (u(keys[10], (4 * H,)) + u(keys[11], (4 * H,))).reshape(1, 4 * H)

    ln_g = jnp.ones((1, H), jnp.float32)
    ln_b = jnp.zeros((1, H), jnp.float32)

    kf = 1.0 / jnp.sqrt(H)
    fcw = jax.random.uniform(keys[12], (num_classes, H), jnp.float32, -kf, kf).T  # [H, C]
    fcb = jax.random.uniform(keys[13], (1, num_classes), jnp.float32, -kf, kf)

    return dict(wih0=wih0, whh0=whh0, b0=b0,
                wih1=wih1, whh1=whh1, b1=b1,
                wih2=wih2, whh2=whh2, b2=b2,
                ln_g=ln_g, ln_b=ln_b, fcw=fcw, fcb=fcb)


def reference_forward(x, params):
    """Plain-JAX f32 reference implementing the PyTorch semantics (for validation)."""
    B, T, I = x.shape
    H = params["whh0"].shape[0]

    def cell(x_t, h, c, wih, whh, b):
        z = x_t @ wih + h @ whh + b
        i = jax.nn.sigmoid(z[:, 0 * H:1 * H])
        f = jax.nn.sigmoid(z[:, 1 * H:2 * H])
        g = jnp.tanh(z[:, 2 * H:3 * H])
        o = jax.nn.sigmoid(z[:, 3 * H:4 * H])
        c = f * c + i * g
        h = o * jnp.tanh(c)
        return h, c

    h1 = c1 = h2 = c2 = h3 = c3 = jnp.zeros((B, H), jnp.float32)
    for t in range(T):
        h1, c1 = cell(x[:, t, :], h1, c1, params["wih0"], params["whh0"], params["b0"])
        h2, c2 = cell(h1, h2, c2, params["wih1"], params["whh1"], params["b1"])
        h3, c3 = cell(h2, h3, c3, params["wih2"], params["whh2"], params["b2"])
    mu = jnp.mean(h3, -1, keepdims=True)
    var = jnp.mean((h3 - mu) ** 2, -1, keepdims=True)
    y = (h3 - mu) / jnp.sqrt(var + 1e-5) * params["ln_g"] + params["ln_b"]
    y = jnp.maximum(y, 0.0)
    return y @ params["fcw"] + params["fcb"]


if __name__ == "__main__":
    # Small shapes consistent with the module: hidden_size=96 -> LSTM hidden H=64, 3 layers.
    B, T, INPUT_SIZE, HIDDEN_SIZE, NUM_CLASSES = 2, 8, 8, 96, 4

    key = jax.random.PRNGKey(0)
    kx, kp = jax.random.split(key)
    x = jax.random.normal(kx, (B, T, INPUT_SIZE), jnp.float32)
    params = init_params(kp, INPUT_SIZE, HIDDEN_SIZE, NUM_CLASSES)

    out = eye_state_triple_lstm_96(x, params)
    out = jax.block_until_ready(out)

    ref = reference_forward(x, params)
    assert out.shape == (B, NUM_CLASSES)
    # f32 matmul operands (default) reproduce the module numerics tightly; the optional
    # bf16 MXU path needs a looser tolerance (review's correctness caveat).
    tol = 2e-4 if MATMUL_DTYPE == jnp.float32 else 2e-2
    assert jnp.allclose(out, ref, atol=tol, rtol=tol), "Pallas kernel mismatch vs reference"

    print("KERNEL_OK")
</pallas_src>

<mosaic_0001>
module attributes {stable_mosaic.version = 11 : i64} {
  func.func @lstm3_ln_fc_kernel(%arg0: memref<16x8xf32, #tpu.memory_space<vmem>>, %arg1: memref<328x256xf32, #tpu.memory_space<vmem>>, %arg2: memref<6x256xf32, #tpu.memory_space<vmem>>, %arg3: memref<64x128xf32, #tpu.memory_space<vmem>>, %arg4: memref<2x128xf32, #tpu.memory_space<vmem>>) attributes {dimension_semantics = [], scalar_prefetch = 0 : i64, scratch_operands = 0 : i64, tpu.core_type = #tpu.core_type<tc>} {
    %c0 = arith.constant 0 : index
    %c0_0 = arith.constant 0 : index
    %0 = vector.load %arg0[%c0, %c0_0] : memref<16x8xf32, #tpu.memory_space<vmem>>, vector<16x8xf32>
    %c0_1 = arith.constant 0 : index
    %c0_2 = arith.constant 0 : index
    %1 = vector.load %arg1[%c0_1, %c0_2] : memref<328x256xf32, #tpu.memory_space<vmem>>, vector<8x256xf32>
    %cst = arith.constant dense<0.000000e+00> : vector<16x256xf32>
    %2 = tpu.matmul %0, %1, %cst {dimension_numbers = #tpu.dot_dimension_numbers<[1], [0], [0], [1], [0, 0, 1, 1], [], []>} : vector<16x8xf32>, vector<8x256xf32>, vector<16x256xf32> -> vector<16x256xf32>
    %c0_3 = arith.constant 0 : index
    %c0_4 = arith.constant 0 : index
    %3 = vector.load %arg2[%c0_3, %c0_4] : memref<6x256xf32, #tpu.memory_space<vmem>>, vector<1x256xf32>
    %4 = vector.shape_cast %3 : vector<1x256xf32> to vector<1x256xf32>
    %5 = vector.broadcast %4 : vector<1x256xf32> to vector<16x256xf32>
    %6 = arith.addf %2, %5 : vector<16x256xf32>
    %c1 = arith.constant 1 : index
    %c0_5 = arith.constant 0 : index
    %7 = vector.load %arg2[%c1, %c0_5] : memref<6x256xf32, #tpu.memory_space<vmem>>, vector<1x256xf32>
    %8 = vector.shape_cast %7 : vector<1x256xf32> to vector<1x256xf32>
    %9 = vector.broadcast %8 : vector<1x256xf32> to vector<2x256xf32>
    %c2 = arith.constant 2 : index
    %c0_6 = arith.constant 0 : index
    %10 = vector.load %arg2[%c2, %c0_6] : memref<6x256xf32, #tpu.memory_space<vmem>>, vector<1x256xf32>
    %11 = vector.shape_cast %10 : vector<1x256xf32> to vector<1x256xf32>
    %12 = vector.broadcast %11 : vector<1x256xf32> to vector<2x256xf32>
    %13 = tpu.iota {dimensions = array<i32: 1>} : vector<2x256xi32>
    %c192_i32 = arith.constant 192 : i32
    %14 = vector.broadcast %c192_i32 : i32 to vector<2x256xi32>
    %15 = arith.cmpi sge, %13, %14 : vector<2x256xi32>
    %cst_7 = arith.constant 1.000000e+00 : f32
    %cst_8 = arith.constant 5.000000e-01 : f32
    %16 = vector.broadcast %cst_7 : f32 to vector<2x256xf32>
    %17 = vector.broadcast %cst_8 : f32 to vector<2x256xf32>
    %18 = arith.select %15, %16, %17 : vector<2x256xi1>, vector<2x256xf32>
    %c192_i32_9 = arith.constant 192 : i32
    %19 = vector.broadcast %c192_i32_9 : i32 to vector<2x256xi32>
    %20 = arith.cmpi sge, %13, %19 : vector<2x256xi32>
    %cst_10 = arith.constant 0.000000e+00 : f32
    %cst_11 = arith.constant 5.000000e-01 : f32
    %21 = vector.broadcast %cst_10 : f32 to vector<2x256xf32>
    %22 = vector.broadcast %cst_11 : f32 to vector<2x256xf32>
    %23 = arith.select %20, %21, %22 : vector<2x256xi1>, vector<2x256xf32>
    %cst_12 = arith.constant 0.000000e+00 : f32
    %24 = vector.broadcast %cst_12 : f32 to vector<2x64xf32>
    %25 = vector.extract_strided_slice %6 {offsets = [0, 0], sizes = [2, 256], strides = [1, 1]} : vector<16x256xf32> to vector<2x256xf32>
    %c8 = arith.constant 8 : index
    %c0_13 = arith.constant 0 : index
    %26 = vector.load %arg1[%c8, %c0_13] : memref<328x256xf32, #tpu.memory_space<vmem>>, vector<64x256xf32>
    %cst_14 = arith.constant dense<0.000000e+00> : vector<2x256xf32>
    %27 = tpu.matmul %24, %26, %cst_14 {dimension_numbers = #tpu.dot_dimension_numbers<[1], [0], [0], [1], [0, 0, 1, 1], [], []>} : vector<2x64xf32>, vector<64x256xf32>, vector<2x256xf32> -> vector<2x256xf32>
    %28 = arith.addf %25, %27 : vector<2x256xf32>
    %29 = arith.mulf %28, %18 : vector<2x256xf32>
    %30 = math.tanh %29 : vector<2x256xf32>
    %31 = arith.mulf %30, %18 : vector<2x256xf32>
    %32 = arith.addf %31, %23 : vector<2x256xf32>
    %33 = vector.extract_strided_slice %32 {offsets = [0, 0], sizes = [2, 128], strides = [1, 1]} : vector<2x256xf32> to vector<2x128xf32>
    %34 = vector.extract_strided_slice %32 {offsets = [0, 128], sizes = [2, 128], strides = [1, 1]} : vector<2x256xf32> to vector<2x128xf32>
    %35 = arith.mulf %33, %34 : vector<2x128xf32>
    %36 = vector.extract_strided_slice %35 {offsets = [0, 64], sizes = [2, 64], strides = [1, 1]} : vector<2x128xf32> to vector<2x64xf32>
    %37 = vector.extract_strided_slice %33 {offsets = [0, 0], sizes = [2, 64], strides = [1, 1]} : vector<2x128xf32> to vector<2x64xf32>
    %38 = vector.extract_strided_slice %34 {offsets = [0, 0], sizes = [2, 64], strides = [1, 1]} : vector<2x128xf32> to vector<2x64xf32>
    %39 = arith.mulf %37, %24 : vector<2x64xf32>
    %40 = arith.addf %39, %36 : vector<2x64xf32>
    %41 = math.tanh %40 : vector<2x64xf32>
    %42 = arith.mulf %38, %41 : vector<2x64xf32>
    %43 = vector.extract_strided_slice %6 {offsets = [2, 0], sizes = [2, 256], strides = [1, 1]} : vector<16x256xf32> to vector<2x256xf32>
    %c8_15 = arith.constant 8 : index
    %c0_16 = arith.constant 0 : index
    %44 = vector.load %arg1[%c8_15, %c0_16] : memref<328x256xf32, #tpu.memory_space<vmem>>, vector<64x256xf32>
    %cst_17 = arith.constant dense<0.000000e+00> : vector<2x256xf32>
    %45 = tpu.matmul %42, %44, %cst_17 {dimension_numbers = #tpu.dot_dimension_numbers<[1], [0], [0], [1], [0, 0, 1, 1], [], []>} : vector<2x64xf32>, vector<64x256xf32>, vector<2x256xf32> -> vector<2x256xf32>
    %46 = arith.addf %43, %45 : vector<2x256xf32>
    %47 = arith.mulf %46, %18 : vector<2x256xf32>
    %48 = math.tanh %47 : vector<2x256xf32>
    %49 = arith.mulf %48, %18 : vector<2x256xf32>
    %50 = arith.addf %49, %23 : vector<2x256xf32>
    %51 = vector.extract_strided_slice %50 {offsets = [0, 0], sizes = [2, 128], strides = [1, 1]} : vector<2x256xf32> to vector<2x128xf32>
    %52 = vector.extract_strided_slice %50 {offsets = [0, 128], sizes = [2, 128], strides = [1, 1]} : vector<2x256xf32> to vector<2x128xf32>
    %53 = arith.mulf %51, %52 : vector<2x128xf32>
    %54 = vector.extract_strided_slice %53 {offsets = [0, 64], sizes = [2, 64], strides = [1, 1]} : vector<2x128xf32> to vector<2x64xf32>
    %55 = vector.extract_strided_slice %51 {offsets = [0, 0], sizes = [2, 64], strides = [1, 1]} : vector<2x128xf32> to vector<2x64xf32>
    %56 = vector.extract_strided_slice %52 {offsets = [0, 0], sizes = [2, 64], strides = [1, 1]} : vector<2x128xf32> to vector<2x64xf32>
    %57 = arith.mulf %55, %40 : vector<2x64xf32>
    %58 = arith.addf %57, %54 : vector<2x64xf32>
    %59 = math.tanh %58 : vector<2x64xf32>
    %60 = arith.mulf %56, %59 : vector<2x64xf32>
    %c72 = arith.constant 72 : index
    %c0_18 = arith.constant 0 : index
    %61 = vector.load %arg1[%c72, %c0_18] : memref<328x256xf32, #tpu.memory_space<vmem>>, vector<64x256xf32>
    %cst_19 = arith.constant dense<0.000000e+00> : vector<2x256xf32>
    %62 = tpu.matmul %42, %61, %cst_19 {dimension_numbers = #tpu.dot_dimension_numbers<[1], [0], [0], [1], [0, 0, 1, 1], [], []>} : vector<2x64xf32>, vector<64x256xf32>, vector<2x256xf32> -> vector<2x256xf32>
    %c136 = arith.constant 136 : index
    %c0_20 = arith.constant 0 : index
    %63 = vector.load %arg1[%c136, %c0_20] : memref<328x256xf32, #tpu.memory_space<vmem>>, vector<64x256xf32>
    %cst_21 = arith.constant dense<0.000000e+00> : vector<2x256xf32>
    %64 = tpu.matmul %24, %63, %cst_21 {dimension_numbers = #tpu.dot_dimension_numbers<[1], [0], [0], [1], [0, 0, 1, 1], [], []>} : vector<2x64xf32>, vector<64x256xf32>, vector<2x256xf32> -> vector<2x256xf32>
    %65 = arith.addf %62, %64 : vector<2x256xf32>
    %66 = arith.addf %65, %9 : vector<2x256xf32>
    %67 = arith.mulf %66, %18 : vector<2x256xf32>
    %68 = math.tanh %67 : vector<2x256xf32>
    %69 = arith.mulf %68, %18 : vector<2x256xf32>
    %70 = arith.addf %69, %23 : vector<2x256xf32>
    %71 = vector.extract_strided_slice %70 {offsets = [0, 0], sizes = [2, 128], strides = [1, 1]} : vector<2x256xf32> to vector<2x128xf32>
    %72 = vector.extract_strided_slice %70 {offsets = [0, 128], sizes = [2, 128], strides = [1, 1]} : vector<2x256xf32> to vector<2x128xf32>
    %73 = arith.mulf %71, %72 : vector<2x128xf32>
    %74 = vector.extract_strided_slice %73 {offsets = [0, 64], sizes = [2, 64], strides = [1, 1]} : vector<2x128xf32> to vector<2x64xf32>
    %75 = vector.extract_strided_slice %71 {offsets = [0, 0], sizes = [2, 64], strides = [1, 1]} : vector<2x128xf32> to vector<2x64xf32>
    %76 = vector.extract_strided_slice %72 {offsets = [0, 0], sizes = [2, 64], strides = [1, 1]} : vector<2x128xf32> to vector<2x64xf32>
    %77 = arith.mulf %75, %24 : vector<2x64xf32>
    %78 = arith.addf %77, %74 : vector<2x64xf32>
    %79 = math.tanh %78 : vector<2x64xf32>
    %80 = arith.mulf %76, %79 : vector<2x64xf32>
    %81 = vector.extract_strided_slice %6 {offsets = [4, 0], sizes = [2, 256], strides = [1, 1]} : vector<16x256xf32> to vector<2x256xf32>
    %c8_22 = arith.constant 8 : index
    %c0_23 = arith.constant 0 : index
    %82 = vector.load %arg1[%c8_22, %c0_23] : memref<328x256xf32, #tpu.memory_space<vmem>>, vector<64x256xf32>
    %cst_24 = arith.constant dense<0.000000e+00> : vector<2x256xf32>
    %83 = tpu.matmul %60, %82, %cst_24 {dimension_numbers = #tpu.dot_dimension_numbers<[1], [0], [0], [1], [0, 0, 1, 1], [], []>} : vector<2x64xf32>, vector<64x256xf32>, vector<2x256xf32> -> vector<2x256xf32>
    %84 = arith.addf %81, %83 : vector<2x256xf32>
    %85 = arith.mulf %84, %18 : vector<2x256xf32>
    %86 = math.tanh %85 : vector<2x256xf32>
    %87 = arith.mulf %86, %18 : vector<2x256xf32>
    %88 = arith.addf %87, %23 : vector<2x256xf32>
    %89 = vector.extract_strided_slice %88 {offsets = [0, 0], sizes = [2, 128], strides = [1, 1]} : vector<2x256xf32> to vector<2x128xf32>
    %90 = vector.extract_strided_slice %88 {offsets = [0, 128], sizes = [2, 128], strides = [1, 1]} : vector<2x256xf32> to vector<2x128xf32>
    %91 = arith.mulf %89, %90 : vector<2x128xf32>
    %92 = vector.extract_strided_slice %91 {offsets = [0, 64], sizes = [2, 64], strides = [1, 1]} : vector<2x128xf32> to vector<2x64xf32>
    %93 = vector.extract_strided_slice %89 {offsets = [0, 0], sizes = [2, 64], strides = [1, 1]} : vector<2x128xf32> to vector<2x64xf32>
    %94 = vector.extract_strided_slice %90 {offsets = [0, 0], sizes = [2, 64], strides = [1, 1]} : vector<2x128xf32> to vector<2x64xf32>
    %95 = arith.mulf %93, %58 : vector<2x64xf32>
    %96 = arith.addf %95, %92 : vector<2x64xf32>
    %97 = math.tanh %96 : vector<2x64xf32>
    %98 = arith.mulf %94, %97 : vector<2x64xf32>
    %c72_25 = arith.constant 72 : index
    %c0_26 = arith.constant 0 : index
    %99 = vector.load %arg1[%c72_25, %c0_26] : memref<328x256xf32, #tpu.memory_space<vmem>>, vector<64x256xf32>
    %cst_27 = arith.constant dense<0.000000e+00> : vector<2x256xf32>
    %100 = tpu.matmul %60, %99, %cst_27 {dimension_numbers = #tpu.dot_dimension_numbers<[1], [0], [0], [1], [0, 0, 1, 1], [], []>} : vector<2x64xf32>, vector<64x256xf32>, vector<2x256xf32> -> vector<2x256xf32>
    %c136_28 = arith.constant 136 : index
    %c0_29 = arith.constant 0 : index
    %101 = vector.load %arg1[%c136_28, %c0_29] : memref<328x256xf32, #tpu.memory_space<vmem>>, vector<64x256xf32>
    %cst_30 = arith.constant dense<0.000000e+00> : vector<2x256xf32>
    %102 = tpu.matmul %80, %101, %cst_30 {dimension_numbers = #tpu.dot_dimension_numbers<[1], [0], [0], [1], [0, 0, 1, 1], [], []>} : vector<2x64xf32>, vector<64x256xf32>, vector<2x256xf32> -> vector<2x256xf32>
    %103 = arith.addf %100, %102 : vector<2x256xf32>
    %104 = arith.addf %103, %9 : vector<2x256xf32>
    %105 = arith.mulf %104, %18 : vector<2x256xf32>
    %106 = math.tanh %105 : vector<2x256xf32>
    %107 = arith.mulf %106, %18 : vector<2x256xf32>
    %108 = arith.addf %107, %23 : vector<2x256xf32>
    %109 = vector.extract_strided_slice %108 {offsets = [0, 0], sizes = [2, 128], strides = [1, 1]} : vector<2x256xf32> to vector<2x128xf32>
    %110 = vector.extract_strided_slice %108 {offsets = [0, 128], sizes = [2, 128], strides = [1, 1]} : vector<2x256xf32> to vector<2x128xf32>
    %111 = arith.mulf %109, %110 : vector<2x128xf32>
    %112 = vector.extract_strided_slice %111 {offsets = [0, 64], sizes = [2, 64], strides = [1, 1]} : vector<2x128xf32> to vector<2x64xf32>
    %113 = vector.extract_strided_slice %109 {offsets = [0, 0], sizes = [2, 64], strides = [1, 1]} : vector<2x128xf32> to vector<2x64xf32>
    %114 = vector.extract_strided_slice %110 {offsets = [0, 0], sizes = [2, 64], strides = [1, 1]} : vector<2x128xf32> to vector<2x64xf32>
    %115 = arith.mulf %113, %78 : vector<2x64xf32>
    %116 = arith.addf %115, %112 : vector<2x64xf32>
    %117 = math.tanh %116 : vector<2x64xf32>
    %118 = arith.mulf %114, %117 : vector<2x64xf32>
    %c200 = arith.constant 200 : index
    %c0_31 = arith.constant 0 : index
    %119 = vector.load %arg1[%c200, %c0_31] : memref<328x256xf32, #tpu.memory_space<vmem>>, vector<64x256xf32>
    %cst_32 = arith.constant dense<0.000000e+00> : vector<2x256xf32>
    %120 = tpu.matmul %80, %119, %cst_32 {dimension_numbers = #tpu.dot_dimension_numbers<[1], [0], [0], [1], [0, 0, 1, 1], [], []>} : vector<2x64xf32>, vector<64x256xf32>, vector<2x256xf32> -> vector<2x256xf32>
    %c264 = arith.constant 264 : index
    %c0_33 = arith.constant 0 : index
    %121 = vector.load %arg1[%c264, %c0_33] : memref<328x256xf32, #tpu.memory_space<vmem>>, vector<64x256xf32>
    %cst_34 = arith.constant dense<0.000000e+00> : vector<2x256xf32>
    %122 = tpu.matmul %24, %121, %cst_34 {dimension_numbers = #tpu.dot_dimension_numbers<[1], [0], [0], [1], [0, 0, 1, 1], [], []>} : vector<2x64xf32>, vector<64x256xf32>, vector<2x256xf32> -> vector<2x256xf32>
    %123 = arith.addf %120, %122 : vector<2x256xf32>
    %124 = arith.addf %123, %12 : vector<2x256xf32>
    %125 = arith.mulf %124, %18 : vector<2x256xf32>
    %126 = math.tanh %125 : vector<2x256xf32>
    %127 = arith.mulf %126, %18 : vector<2x256xf32>
    %128 = arith.addf %127, %23 : vector<2x256xf32>
    %129 = vector.extract_strided_slice %128 {offsets = [0, 0], sizes = [2, 128], strides = [1, 1]} : vector<2x256xf32> to vector<2x128xf32>
    %130 = vector.extract_strided_slice %128 {offsets = [0, 128], sizes = [2, 128], strides = [1, 1]} : vector<2x256xf32> to vector<2x128xf32>
    %131 = arith.mulf %129, %130 : vector<2x128xf32>
    %132 = vector.extract_strided_slice %131 {offsets = [0, 64], sizes = [2, 64], strides = [1, 1]} : vector<2x128xf32> to vector<2x64xf32>
    %133 = vector.extract_strided_slice %129 {offsets = [0, 0], sizes = [2, 64], strides = [1, 1]} : vector<2x128xf32> to vector<2x64xf32>
    %134 = vector.extract_strided_slice %130 {offsets = [0, 0], sizes = [2, 64], strides = [1, 1]} : vector<2x128xf32> to vector<2x64xf32>
    %135 = arith.mulf %133, %24 : vector<2x64xf32>
    %136 = arith.addf %135, %132 : vector<2x64xf32>
    %137 = math.tanh %136 : vector<2x64xf32>
    %138 = arith.mulf %134, %137 : vector<2x64xf32>
    %139 = vector.extract_strided_slice %6 {offsets = [6, 0], sizes = [2, 256], strides = [1, 1]} : vector<16x256xf32> to vector<2x256xf32>
    %c8_35 = arith.constant 8 : index
    %c0_36 = arith.constant 0 : index
    %140 = vector.load %arg1[%c8_35, %c0_36] : memref<328x256xf32, #tpu.memory_space<vmem>>, vector<64x256xf32>
    %cst_37 = arith.constant dense<0.000000e+00> : vector<2x256xf32>
    %141 = tpu.matmul %98, %140, %cst_37 {dimension_numbers = #tpu.dot_dimension_numbers<[1], [0], [0], [1], [0, 0, 1, 1], [], []>} : vector<2x64xf32>, vector<64x256xf32>, vector<2x256xf32> -> vector<2x256xf32>
    %142 = arith.addf %139, %141 : vector<2x256xf32>
    %143 = arith.mulf %142, %18 : vector<2x256xf32>
    %144 = math.tanh %143 : vector<2x256xf32>
    %145 = arith.mulf %144, %18 : vector<2x256xf32>
    %146 = arith.addf %145, %23 : vector<2x256xf32>
    %147 = vector.extract_strided_slice %146 {offsets = [0, 0], sizes = [2, 128], strides = [1, 1]} : vector<2x256xf32> to vector<2x128xf32>
    %148 = vector.extract_strided_slice %146 {offsets = [0, 128], sizes = [2, 128], strides = [1, 1]} : vector<2x256xf32> to vector<2x128xf32>
    %149 = arith.mulf %147, %148 : vector<2x128xf32>
    %150 = vector.extract_strided_slice %149 {offsets = [0, 64], sizes = [2, 64], strides = [1, 1]} : vector<2x128xf32> to vector<2x64xf32>
    %151 = vector.extract_strided_slice %147 {offsets = [0, 0], sizes = [2, 64], strides = [1, 1]} : vector<2x128xf32> to vector<2x64xf32>
    %152 = vector.extract_strided_slice %148 {offsets = [0, 0], sizes = [2, 64], strides = [1, 1]} : vector<2x128xf32> to vector<2x64xf32>
    %153 = arith.mulf %151, %96 : vector<2x64xf32>
    %154 = arith.addf %153, %150 : vector<2x64xf32>
    %155 = math.tanh %154 : vector<2x64xf32>
    %156 = arith.mulf %152, %155 : vector<2x64xf32>
    %c72_38 = arith.constant 72 : index
    %c0_39 = arith.constant 0 : index
    %157 = vector.load %arg1[%c72_38, %c0_39] : memref<328x256xf32, #tpu.memory_space<vmem>>, vector<64x256xf32>
    %cst_40 = arith.constant dense<0.000000e+00> : vector<2x256xf32>
    %158 = tpu.matmul %98, %157, %cst_40 {dimension_numbers = #tpu.dot_dimension_numbers<[1], [0], [0], [1], [0, 0, 1, 1], [], []>} : vector<2x64xf32>, vector<64x256xf32>, vector<2x256xf32> -> vector<2x256xf32>
    %c136_41 = arith.constant 136 : index
    %c0_42 = arith.constant 0 : index
    %159 = vector.load %arg1[%c136_41, %c0_42] : memref<328x256xf32, #tpu.memory_space<vmem>>, vector<64x256xf32>
    %cst_43 = arith.constant dense<0.000000e+00> : vector<2x256xf32>
    %160 = tpu.matmul %118, %159, %cst_43 {dimension_numbers = #tpu.dot_dimension_numbers<[1], [0], [0], [1], [0, 0, 1, 1], [], []>} : vector<2x64xf32>, vector<64x256xf32>, vector<2x256xf32> -> vector<2x256xf32>
    %161 = arith.addf %158, %160 : vector<2x256xf32>
    %162 = arith.addf %161, %9 : vector<2x256xf32>
    %163 = arith.mulf %162, %18 : vector<2x256xf32>
    %164 = math.tanh %163 : vector<2x256xf32>
    %165 = arith.mulf %164, %18 : vector<2x256xf32>
    %166 = arith.addf %165, %23 : vector<2x256xf32>
    %167 = vector.extract_strided_slice %166 {offsets = [0, 0], sizes = [2, 128], strides = [1, 1]} : vector<2x256xf32> to vector<2x128xf32>
    %168 = vector.extract_strided_slice %166 {offsets = [0, 128], sizes = [2, 128], strides = [1, 1]} : vector<2x256xf32> to vector<2x128xf32>
    %169 = arith.mulf %167, %168 : vector<2x128xf32>
    %170 = vector.extract_strided_slice %169 {offsets = [0, 64], sizes = [2, 64], strides = [1, 1]} : vector<2x128xf32> to vector<2x64xf32>
    %171 = vector.extract_strided_slice %167 {offsets = [0, 0], sizes = [2, 64], strides = [1, 1]} : vector<2x128xf32> to vector<2x64xf32>
    %172 = vector.extract_strided_slice %168 {offsets = [0, 0], sizes = [2, 64], strides = [1, 1]} : vector<2x128xf32> to vector<2x64xf32>
    %173 = arith.mulf %171, %116 : vector<2x64xf32>
    %174 = arith.addf %173, %170 : vector<2x64xf32>
    %175 = math.tanh %174 : vector<2x64xf32>
    %176 = arith.mulf %172, %175 : vector<2x64xf32>
    %c200_44 = arith.constant 200 : index
    %c0_45 = arith.constant 0 : index
    %177 = vector.load %arg1[%c200_44, %c0_45] : memref<328x256xf32, #tpu.memory_space<vmem>>, vector<64x256xf32>
    %cst_46 = arith.constant dense<0.000000e+00> : vector<2x256xf32>
    %178 = tpu.matmul %118, %177, %cst_46 {dimension_numbers = #tpu.dot_dimension_numbers<[1], [0], [0], [1], [0, 0, 1, 1], [], []>} : vector<2x64xf32>, vector<64x256xf32>, vector<2x256xf32> -> vector<2x256xf32>
    %c264_47 = arith.constant 264 : index
    %c0_48 = arith.constant 0 : index
    %179 = vector.load %arg1[%c264_47, %c0_48] : memref<328x256xf32, #tpu.memory_space<vmem>>, vector<64x256xf32>
    %cst_49 = arith.constant dense<0.000000e+00> : vector<2x256xf32>
    %180 = tpu.matmul %138, %179, %cst_49 {dimension_numbers = #tpu.dot_dimension_numbers<[1], [0], [0], [1], [0, 0, 1, 1], [], []>} : vector<2x64xf32>, vector<64x256xf32>, vector<2x256xf32> -> vector<2x256xf32>
    %181 = arith.addf %178, %180 : vector<2x256xf32>
    %182 = arith.addf %181, %12 : vector<2x256xf32>
    %183 = arith.mulf %182, %18 : vector<2x256xf32>
    %184 = math.tanh %183 : vector<2x256xf32>
    %185 = arith.mulf %184, %18 : vector<2x256xf32>
    %186 = arith.addf %185, %23 : vector<2x256xf32>
    %187 = vector.extract_strided_slice %186 {offsets = [0, 0], sizes = [2, 128], strides = [1, 1]} : vector<2x256xf32> to vector<2x128xf32>
    %188 = vector.extract_strided_slice %186 {offsets = [0, 128], sizes = [2, 128], strides = [1, 1]} : vector<2x256xf32> to vector<2x128xf32>
    %189 = arith.mulf %187, %188 : vector<2x128xf32>
    %190 = vector.extract_strided_slice %189 {offsets = [0, 64], sizes = [2, 64], strides = [1, 1]} : vector<2x128xf32> to vector<2x64xf32>
    %191 = vector.extract_strided_slice %187 {offsets = [0, 0], sizes = [2, 64], strides = [1, 1]} : vector<2x128xf32> to vector<2x64xf32>
    %192 = vector.extract_strided_slice %188 {offsets = [0, 0], sizes = [2, 64], strides = [1, 1]} : vector<2x128xf32> to vector<2x64xf32>
    %193 = arith.mulf %191, %136 : vector<2x64xf32>
    %194 = arith.addf %193, %190 : vector<2x64xf32>
    %195 = math.tanh %194 : vector<2x64xf32>
    %196 = arith.mulf %192, %195 : vector<2x64xf32>
    %197 = vector.extract_strided_slice %6 {offsets = [8, 0], sizes = [2, 256], strides = [1, 1]} : vector<16x256xf32> to vector<2x256xf32>
    %c8_50 = arith.constant 8 : index
    %c0_51 = arith.constant 0 : index
    %198 = vector.load %arg1[%c8_50, %c0_51] : memref<328x256xf32, #tpu.memory_space<vmem>>, vector<64x256xf32>
    %cst_52 = arith.constant dense<0.000000e+00> : vector<2x256xf32>
    %199 = tpu.matmul %156, %198, %cst_52 {dimension_numbers = #tpu.dot_dimension_numbers<[1], [0], [0], [1], [0, 0, 1, 1], [], []>} : vector<2x64xf32>, vector<64x256xf32>, vector<2x256xf32> -> vector<2x256xf32>
    %200 = arith.addf %197, %199 : vector<2x256xf32>
    %201 = arith.mulf %200, %18 : vector<2x256xf32>
    %202 = math.tanh %201 : vector<2x256xf32>
    %203 = arith.mulf %202, %18 : vector<2x256xf32>
    %204 = arith.addf %203, %23 : vector<2x256xf32>
    %205 = vector.extract_strided_slice %204 {offsets = [0, 0], sizes = [2, 128], strides = [1, 1]} : vector<2x256xf32> to vector<2x128xf32>
    %206 = vector.extract_strided_slice %204 {offsets = [0, 128], sizes = [2, 128], strides = [1, 1]} : vector<2x256xf32> to vector<2x128xf32>
    %207 = arith.mulf %205, %206 : vector<2x128xf32>
    %208 = vector.extract_strided_slice %207 {offsets = [0, 64], sizes = [2, 64], strides = [1, 1]} : vector<2x128xf32> to vector<2x64xf32>
    %209 = vector.extract_strided_slice %205 {offsets = [0, 0], sizes = [2, 64], strides = [1, 1]} : vector<2x128xf32> to vector<2x64xf32>
    %210 = vector.extract_strided_slice %206 {offsets = [0, 0], sizes = [2, 64], strides = [1, 1]} : vector<2x128xf32> to vector<2x64xf32>
    %211 = arith.mulf %209, %154 : vector<2x64xf32>
    %212 = arith.addf %211, %208 : vector<2x64xf32>
    %213 = math.tanh %212 : vector<2x64xf32>
    %214 = arith.mulf %210, %213 : vector<2x64xf32>
    %c72_53 = arith.constant 72 : index
    %c0_54 = arith.constant 0 : index
    %215 = vector.load %arg1[%c72_53, %c0_54] : memref<328x256xf32, #tpu.memory_space<vmem>>, vector<64x256xf32>
    %cst_55 = arith.constant dense<0.000000e+00> : vector<2x256xf32>
    %216 = tpu.matmul %156, %215, %cst_55 {dimension_numbers = #tpu.dot_dimension_numbers<[1], [0], [0], [1], [0, 0, 1, 1], [], []>} : vector<2x64xf32>, vector<64x256xf32>, vector<2x256xf32> -> vector<2x256xf32>
    %c136_56 = arith.constant 136 : index
    %c0_57 = arith.constant 0 : index
    %217 = vector.load %arg1[%c136_56, %c0_57] : memref<328x256xf32, #tpu.memory_space<vmem>>, vector<64x256xf32>
    %cst_58 = arith.constant dense<0.000000e+00> : vector<2x256xf32>
    %218 = tpu.matmul %176, %217, %cst_58 {dimension_numbers = #tpu.dot_dimension_numbers<[1], [0], [0], [1], [0, 0, 1, 1], [], []>} : vector<2x64xf32>, vector<64x256xf32>, vector<2x256xf32> -> vector<2x256xf32>
    %219 = arith.addf %216, %218 : vector<2x256xf32>
    %220 = arith.addf %219, %9 : vector<2x256xf32>
    %221 = arith.mulf %220, %18 : vector<2x256xf32>
    %222 = math.tanh %221 : vector<2x256xf32>
    %223 = arith.mulf %222, %18 : vector<2x256xf32>
    %224 = arith.addf %223, %23 : vector<2x256xf32>
    %225 = vector.extract_strided_slice %224 {offsets = [0, 0], sizes = [2, 128], strides = [1, 1]} : vector<2x256xf32> to vector<2x128xf32>
    %226 = vector.extract_strided_slice %224 {offsets = [0, 128], sizes = [2, 128], strides = [1, 1]} : vector<2x256xf32> to vector<2x128xf32>
    %227 = arith.mulf %225, %226 : vector<2x128xf32>
    %228 = vector.extract_strided_slice %227 {offsets = [0, 64], sizes = [2, 64], strides = [1, 1]} : vector<2x128xf32> to vector<2x64xf32>
    %229 = vector.extract_strided_slice %225 {offsets = [0, 0], sizes = [2, 64], strides = [1, 1]} : vector<2x128xf32> to vector<2x64xf32>
    %230 = vector.extract_strided_slice %226 {offsets = [0, 0], sizes = [2, 64], strides = [1, 1]} : vector<2x128xf32> to vector<2x64xf32>
    %231 = arith.mulf %229, %174 : vector<2x64xf32>
    %232 = arith.addf %231, %228 : vector<2x64xf32>
    %233 = math.tanh %232 : vector<2x64xf32>
    %234 = arith.mulf %230, %233 : vector<2x64xf32>
    %c200_59 = arith.constant 200 : index
    %c0_60 = arith.constant 0 : index
    %235 = vector.load %arg1[%c200_59, %c0_60] : memref<328x256xf32, #tpu.memory_space<vmem>>, vector<64x256xf32>
    %cst_61 = arith.constant dense<0.000000e+00> : vector<2x256xf32>
    %236 = tpu.matmul %176, %235, %cst_61 {dimension_numbers = #tpu.dot_dimension_numbers<[1], [0], [0], [1], [0, 0, 1, 1], [], []>} : vector<2x64xf32>, vector<64x256xf32>, vector<2x256xf32> -> vector<2x256xf32>
    %c264_62 = arith.constant 264 : index
    %c0_63 = arith.constant 0 : index
    %237 = vector.load %arg1[%c264_62, %c0_63] : memref<328x256xf32, #tpu.memory_space<vmem>>, vector<64x256xf32>
    %cst_64 = arith.constant dense<0.000000e+00> : vector<2x256xf32>
    %238 = tpu.matmul %196, %237, %cst_64 {dimension_numbers = #tpu.dot_dimension_numbers<[1], [0], [0], [1], [0, 0, 1, 1], [], []>} : vector<2x64xf32>, vector<64x256xf32>, vector<2x256xf32> -> vector<2x256xf32>
    %239 = arith.addf %236, %238 : vector<2x256xf32>
    %240 = arith.addf %239, %12 : vector<2x256xf32>
    %241 = arith.mulf %240, %18 : vector<2x256xf32>
    %242 = math.tanh %241 : vector<2x256xf32>
    %243 = arith.mulf %242, %18 : vector<2x256xf32>
    %244 = arith.addf %243, %23 : vector<2x256xf32>
    %245 = vector.extract_strided_slice %244 {offsets = [0, 0], sizes = [2, 128], strides = [1, 1]} : vector<2x256xf32> to vector<2x128xf32>
    %246 = vector.extract_strided_slice %244 {offsets = [0, 128], sizes = [2, 128], strides = [1, 1]} : vector<2x256xf32> to vector<2x128xf32>
    %247 = arith.mulf %245, %246 : vector<2x128xf32>
    %248 = vector.extract_strided_slice %247 {offsets = [0, 64], sizes = [2, 64], strides = [1, 1]} : vector<2x128xf32> to vector<2x64xf32>
    %249 = vector.extract_strided_slice %245 {offsets = [0, 0], sizes = [2, 64], strides = [1, 1]} : vector<2x128xf32> to vector<2x64xf32>
    %250 = vector.extract_strided_slice %246 {offsets = [0, 0], sizes = [2, 64], strides = [1, 1]} : vector<2x128xf32> to vector<2x64xf32>
    %251 = arith.mulf %249, %194 : vector<2x64xf32>
    %252 = arith.addf %251, %248 : vector<2x64xf32>
    %253 = math.tanh %252 : vector<2x64xf32>
    %254 = arith.mulf %250, %253 : vector<2x64xf32>
    %255 = vector.extract_strided_slice %6 {offsets = [10, 0], sizes = [2, 256], strides = [1, 1]} : vector<16x256xf32> to vector<2x256xf32>
    %c8_65 = arith.constant 8 : index
    %c0_66 = arith.constant 0 : index
    %256 = vector.load %arg1[%c8_65, %c0_66] : memref<328x256xf32, #tpu.memory_space<vmem>>, vector<64x256xf32>
    %cst_67 = arith.constant dense<0.000000e+00> : vector<2x256xf32>
    %257 = tpu.matmul %214, %256, %cst_67 {dimension_numbers = #tpu.dot_dimension_numbers<[1], [0], [0], [1], [0, 0, 1, 1], [], []>} : vector<2x64xf32>, vector<64x256xf32>, vector<2x256xf32> -> vector<2x256xf32>
    %258 = arith.addf %255, %257 : vector<2x256xf32>
    %259 = arith.mulf %258, %18 : vector<2x256xf32>
    %260 = math.tanh %259 : vector<2x256xf32>
    %261 = arith.mulf %260, %18 : vector<2x256xf32>
    %262 = arith.addf %261, %23 : vector<2x256xf32>
    %263 = vector.extract_strided_slice %262 {offsets = [0, 0], sizes = [2, 128], strides = [1, 1]} : vector<2x256xf32> to vector<2x128xf32>
    %264 = vector.extract_strided_slice %262 {offsets = [0, 128], sizes = [2, 128], strides = [1, 1]} : vector<2x256xf32> to vector<2x128xf32>
    %265 = arith.mulf %263, %264 : vector<2x128xf32>
    %266 = vector.extract_strided_slice %265 {offsets = [0, 64], sizes = [2, 64], strides = [1, 1]} : vector<2x128xf32> to vector<2x64xf32>
    %267 = vector.extract_strided_slice %263 {offsets = [0, 0], sizes = [2, 64], strides = [1, 1]} : vector<2x128xf32> to vector<2x64xf32>
    %268 = vector.extract_strided_slice %264 {offsets = [0, 0], sizes = [2, 64], strides = [1, 1]} : vector<2x128xf32> to vector<2x64xf32>
    %269 = arith.mulf %267, %212 : vector<2x64xf32>
    %270 = arith.addf %269, %266 : vector<2x64xf32>
    %271 = math.tanh %270 : vector<2x64xf32>
    %272 = arith.mulf %268, %271 : vector<2x64xf32>
    %c72_68 = arith.constant 72 : index
    %c0_69 = arith.constant 0 : index
    %273 = vector.load %arg1[%c72_68, %c0_69] : memref<328x256xf32, #tpu.memory_space<vmem>>, vector<64x256xf32>
    %cst_70 = arith.constant dense<0.000000e+00> : vector<2x256xf32>
    %274 = tpu.matmul %214, %273, %cst_70 {dimension_numbers = #tpu.dot_dimension_numbers<[1], [0], [0], [1], [0, 0, 1, 1], [], []>} : vector<2x64xf32>, vector<64x256xf32>, vector<2x256xf32> -> vector<2x256xf32>
    %c136_71 = arith.constant 136 : index
    %c0_72 = arith.constant 0 : index
    %275 = vector.load %arg1[%c136_71, %c0_72] : memref<328x256xf32, #tpu.memory_space<vmem>>, vector<64x256xf32>
    %cst_73 = arith.constant dense<0.000000e+00> : vector<2x256xf32>
    %276 = tpu.matmul %234, %275, %cst_73 {dimension_numbers = #tpu.dot_dimension_numbers<[1], [0], [0], [1], [0, 0, 1, 1], [], []>} : vector<2x64xf32>, vector<64x256xf32>, vector<2x256xf32> -> vector<2x256xf32>
    %277 = arith.addf %274, %276 : vector<2x256xf32>
    %278 = arith.addf %277, %9 : vector<2x256xf32>
    %279 = arith.mulf %278, %18 : vector<2x256xf32>
    %280 = math.tanh %279 : vector<2x256xf32>
    %281 = arith.mulf %280, %18 : vector<2x256xf32>
    %282 = arith.addf %281, %23 : vector<2x256xf32>
    %283 = vector.extract_strided_slice %282 {offsets = [0, 0], sizes = [2, 128], strides = [1, 1]} : vector<2x256xf32> to vector<2x128xf32>
    %284 = vector.extract_strided_slice %282 {offsets = [0, 128], sizes = [2, 128], strides = [1, 1]} : vector<2x256xf32> to vector<2x128xf32>
    %285 = arith.mulf %283, %284 : vector<2x128xf32>
    %286 = vector.extract_strided_slice %285 {offsets = [0, 64], sizes = [2, 64], strides = [1, 1]} : vector<2x128xf32> to vector<2x64xf32>
    %287 = vector.extract_strided_slice %283 {offsets = [0, 0], sizes = [2, 64], strides = [1, 1]} : vector<2x128xf32> to vector<2x64xf32>
    %288 = vector.extract_strided_slice %284 {offsets = [0, 0], sizes = [2, 64], strides = [1, 1]} : vector<2x128xf32> to vector<2x64xf32>
    %289 = arith.mulf %287, %232 : vector<2x64xf32>
    %290 = arith.addf %289, %286 : vector<2x64xf32>
    %291 = math.tanh %290 : vector<2x64xf32>
    %292 = arith.mulf %288, %291 : vector<2x64xf32>
    %c200_74 = arith.constant 200 : index
    %c0_75 = arith.constant 0 : index
    %293 = vector.load %arg1[%c200_74, %c0_75] : memref<328x256xf32, #tpu.memory_space<vmem>>, vector<64x256xf32>
    %cst_76 = arith.constant dense<0.000000e+00> : vector<2x256xf32>
    %294 = tpu.matmul %234, %293, %cst_76 {dimension_numbers = #tpu.dot_dimension_numbers<[1], [0], [0], [1], [0, 0, 1, 1], [], []>} : vector<2x64xf32>, vector<64x256xf32>, vector<2x256xf32> -> vector<2x256xf32>
    %c264_77 = arith.constant 264 : index
    %c0_78 = arith.constant 0 : index
    %295 = vector.load %arg1[%c264_77, %c0_78] : memref<328x256xf32, #tpu.memory_space<vmem>>, vector<64x256xf32>
    %cst_79 = arith.constant dense<0.000000e+00> : vector<2x256xf32>
    %296 = tpu.matmul %254, %295, %cst_79 {dimension_numbers = #tpu.dot_dimension_numbers<[1], [0], [0], [1], [0, 0, 1, 1], [], []>} : vector<2x64xf32>, vector<64x256xf32>, vector<2x256xf32> -> vector<2x256xf32>
    %297 = arith.addf %294, %296 : vector<2x256xf32>
    %298 = arith.addf %297, %12 : vector<2x256xf32>
    %299 = arith.mulf %298, %18 : vector<2x256xf32>
    %300 = math.tanh %299 : vector<2x256xf32>
    %301 = arith.mulf %300, %18 : vector<2x256xf32>
    %302 = arith.addf %301, %23 : vector<2x256xf32>
    %303 = vector.extract_strided_slice %302 {offsets = [0, 0], sizes = [2, 128], strides = [1, 1]} : vector<2x256xf32> to vector<2x128xf32>
    %304 = vector.extract_strided_slice %302 {offsets = [0, 128], sizes = [2, 128], strides = [1, 1]} : vector<2x256xf32> to vector<2x128xf32>
    %305 = arith.mulf %303, %304 : vector<2x128xf32>
    %306 = vector.extract_strided_slice %305 {offsets = [0, 64], sizes = [2, 64], strides = [1, 1]} : vector<2x128xf32> to vector<2x64xf32>
    %307 = vector.extract_strided_slice %303 {offsets = [0, 0], sizes = [2, 64], strides = [1, 1]} : vector<2x128xf32> to vector<2x64xf32>
    %308 = vector.extract_strided_slice %304 {offsets = [0, 0], sizes = [2, 64], strides = [1, 1]} : vector<2x128xf32> to vector<2x64xf32>
    %309 = arith.mulf %307, %252 : vector<2x64xf32>
    %310 = arith.addf %309, %306 : vector<2x64xf32>
    %311 = math.tanh %310 : vector<2x64xf32>
    %312 = arith.mulf %308, %311 : vector<2x64xf32>
    %313 = vector.extract_strided_slice %6 {offsets = [12, 0], sizes = [2, 256], strides = [1, 1]} : vector<16x256xf32> to vector<2x256xf32>
    %c8_80 = arith.constant 8 : index
    %c0_81 = arith.constant 0 : index
    %314 = vector.load %arg1[%c8_80, %c0_81] : memref<328x256xf32, #tpu.memory_space<vmem>>, vector<64x256xf32>
    %cst_82 = arith.constant dense<0.000000e+00> : vector<2x256xf32>
    %315 = tpu.matmul %272, %314, %cst_82 {dimension_numbers = #tpu.dot_dimension_numbers<[1], [0], [0], [1], [0, 0, 1, 1], [], []>} : vector<2x64xf32>, vector<64x256xf32>, vector<2x256xf32> -> vector<2x256xf32>
    %316 = arith.addf %313, %315 : vector<2x256xf32>
    %317 = arith.mulf %316, %18 : vector<2x256xf32>
    %318 = math.tanh %317 : vector<2x256xf32>
    %319 = arith.mulf %318, %18 : vector<2x256xf32>
    %320 = arith.addf %319, %23 : vector<2x256xf32>
    %321 = vector.extract_strided_slice %320 {offsets = [0, 0], sizes = [2, 128], strides = [1, 1]} : vector<2x256xf32> to vector<2x128xf32>
    %322 = vector.extract_strided_slice %320 {offsets = [0, 128], sizes = [2, 128], strides = [1, 1]} : vector<2x256xf32> to vector<2x128xf32>
    %323 = arith.mulf %321, %322 : vector<2x128xf32>
    %324 = vector.extract_strided_slice %323 {offsets = [0, 64], sizes = [2, 64], strides = [1, 1]} : vector<2x128xf32> to vector<2x64xf32>
    %325 = vector.extract_strided_slice %321 {offsets = [0, 0], sizes = [2, 64], strides = [1, 1]} : vector<2x128xf32> to vector<2x64xf32>
    %326 = vector.extract_strided_slice %322 {offsets = [0, 0], sizes = [2, 64], strides = [1, 1]} : vector<2x128xf32> to vector<2x64xf32>
    %327 = arith.mulf %325, %270 : vector<2x64xf32>
    %328 = arith.addf %327, %324 : vector<2x64xf32>
    %329 = math.tanh %328 : vector<2x64xf32>
    %330 = arith.mulf %326, %329 : vector<2x64xf32>
    %c72_83 = arith.constant 72 : index
    %c0_84 = arith.constant 0 : index
    %331 = vector.load %arg1[%c72_83, %c0_84] : memref<328x256xf32, #tpu.memory_space<vmem>>, vector<64x256xf32>
    %cst_85 = arith.constant dense<0.000000e+00> : vector<2x256xf32>
    %332 = tpu.matmul %272, %331, %cst_85 {dimension_numbers = #tpu.dot_dimension_numbers<[1], [0], [0], [1], [0, 0, 1, 1], [], []>} : vector<2x64xf32>, vector<64x256xf32>, vector<2x256xf32> -> vector<2x256xf32>
    %c136_86 = arith.constant 136 : index
    %c0_87 = arith.constant 0 : index
    %333 = vector.load %arg1[%c136_86, %c0_87] : memref<328x256xf32, #tpu.memory_space<vmem>>, vector<64x256xf32>
    %cst_88 = arith.constant dense<0.000000e+00> : vector<2x256xf32>
    %334 = tpu.matmul %292, %333, %cst_88 {dimension_numbers = #tpu.dot_dimension_numbers<[1], [0], [0], [1], [0, 0, 1, 1], [], []>} : vector<2x64xf32>, vector<64x256xf32>, vector<2x256xf32> -> vector<2x256xf32>
    %335 = arith.addf %332, %334 : vector<2x256xf32>
    %336 = arith.addf %335, %9 : vector<2x256xf32>
    %337 = arith.mulf %336, %18 : vector<2x256xf32>
    %338 = math.tanh %337 : vector<2x256xf32>
    %339 = arith.mulf %338, %18 : vector<2x256xf32>
    %340 = arith.addf %339, %23 : vector<2x256xf32>
    %341 = vector.extract_strided_slice %340 {offsets = [0, 0], sizes = [2, 128], strides = [1, 1]} : vector<2x256xf32> to vector<2x128xf32>
    %342 = vector.extract_strided_slice %340 {offsets = [0, 128], sizes = [2, 128], strides = [1, 1]} : vector<2x256xf32> to vector<2x128xf32>
    %343 = arith.mulf %341, %342 : vector<2x128xf32>
    %344 = vector.extract_strided_slice %343 {offsets = [0, 64], sizes = [2, 64], strides = [1, 1]} : vector<2x128xf32> to vector<2x64xf32>
    %345 = vector.extract_strided_slice %341 {offsets = [0, 0], sizes = [2, 64], strides = [1, 1]} : vector<2x128xf32> to vector<2x64xf32>
    %346 = vector.extract_strided_slice %342 {offsets = [0, 0], sizes = [2, 64], strides = [1, 1]} : vector<2x128xf32> to vector<2x64xf32>
    %347 = arith.mulf %345, %290 : vector<2x64xf32>
    %348 = arith.addf %347, %344 : vector<2x64xf32>
    %349 = math.tanh %348 : vector<2x64xf32>
    %350 = arith.mulf %346, %349 : vector<2x64xf32>
    %c200_89 = arith.constant 200 : index
    %c0_90 = arith.constant 0 : index
    %351 = vector.load %arg1[%c200_89, %c0_90] : memref<328x256xf32, #tpu.memory_space<vmem>>, vector<64x256xf32>
    %cst_91 = arith.constant dense<0.000000e+00> : vector<2x256xf32>
    %352 = tpu.matmul %292, %351, %cst_91 {dimension_numbers = #tpu.dot_dimension_numbers<[1], [0], [0], [1], [0, 0, 1, 1], [], []>} : vector<2x64xf32>, vector<64x256xf32>, vector<2x256xf32> -> vector<2x256xf32>
    %c264_92 = arith.constant 264 : index
    %c0_93 = arith.constant 0 : index
    %353 = vector.load %arg1[%c264_92, %c0_93] : memref<328x256xf32, #tpu.memory_space<vmem>>, vector<64x256xf32>
    %cst_94 = arith.constant dense<0.000000e+00> : vector<2x256xf32>
    %354 = tpu.matmul %312, %353, %cst_94 {dimension_numbers = #tpu.dot_dimension_numbers<[1], [0], [0], [1], [0, 0, 1, 1], [], []>} : vector<2x64xf32>, vector<64x256xf32>, vector<2x256xf32> -> vector<2x256xf32>
    %355 = arith.addf %352, %354 : vector<2x256xf32>
    %356 = arith.addf %355, %12 : vector<2x256xf32>
    %357 = arith.mulf %356, %18 : vector<2x256xf32>
    %358 = math.tanh %357 : vector<2x256xf32>
    %359 = arith.mulf %358, %18 : vector<2x256xf32>
    %360 = arith.addf %359, %23 : vector<2x256xf32>
    %361 = vector.extract_strided_slice %360 {offsets = [0, 0], sizes = [2, 128], strides = [1, 1]} : vector<2x256xf32> to vector<2x128xf32>
    %362 = vector.extract_strided_slice %360 {offsets = [0, 128], sizes = [2, 128], strides = [1, 1]} : vector<2x256xf32> to vector<2x128xf32>
    %363 = arith.mulf %361, %362 : vector<2x128xf32>
    %364 = vector.extract_strided_slice %363 {offsets = [0, 64], sizes = [2, 64], strides = [1, 1]} : vector<2x128xf32> to vector<2x64xf32>
    %365 = vector.extract_strided_slice %361 {offsets = [0, 0], sizes = [2, 64], strides = [1, 1]} : vector<2x128xf32> to vector<2x64xf32>
    %366 = vector.extract_strided_slice %362 {offsets = [0, 0], sizes = [2, 64], strides = [1, 1]} : vector<2x128xf32> to vector<2x64xf32>
    %367 = arith.mulf %365, %310 : vector<2x64xf32>
    %368 = arith.addf %367, %364 : vector<2x64xf32>
    %369 = math.tanh %368 : vector<2x64xf32>
    %370 = arith.mulf %366, %369 : vector<2x64xf32>
    %371 = vector.extract_strided_slice %6 {offsets = [14, 0], sizes = [2, 256], strides = [1, 1]} : vector<16x256xf32> to vector<2x256xf32>
    %c8_95 = arith.constant 8 : index
    %c0_96 = arith.constant 0 : index
    %372 = vector.load %arg1[%c8_95, %c0_96] : memref<328x256xf32, #tpu.memory_space<vmem>>, vector<64x256xf32>
    %cst_97 = arith.constant dense<0.000000e+00> : vector<2x256xf32>
    %373 = tpu.matmul %330, %372, %cst_97 {dimension_numbers = #tpu.dot_dimension_numbers<[1], [0], [0], [1], [0, 0, 1, 1], [], []>} : vector<2x64xf32>, vector<64x256xf32>, vector<2x256xf32> -> vector<2x256xf32>
    %374 = arith.addf %371, %373 : vector<2x256xf32>
    %375 = arith.mulf %374, %18 : vector<2x256xf32>
    %376 = math.tanh %375 : vector<2x256xf32>
    %377 = arith.mulf %376, %18 : vector<2x256xf32>
    %378 = arith.addf %377, %23 : vector<2x256xf32>
    %379 = vector.extract_strided_slice %378 {offsets = [0, 0], sizes = [2, 128], strides = [1, 1]} : vector<2x256xf32> to vector<2x128xf32>
    %380 = vector.extract_strided_slice %378 {offsets = [0, 128], sizes = [2, 128], strides = [1, 1]} : vector<2x256xf32> to vector<2x128xf32>
    %381 = arith.mulf %379, %380 : vector<2x128xf32>
    %382 = vector.extract_strided_slice %381 {offsets = [0, 64], sizes = [2, 64], strides = [1, 1]} : vector<2x128xf32> to vector<2x64xf32>
    %383 = vector.extract_strided_slice %379 {offsets = [0, 0], sizes = [2, 64], strides = [1, 1]} : vector<2x128xf32> to vector<2x64xf32>
    %384 = vector.extract_strided_slice %380 {offsets = [0, 0], sizes = [2, 64], strides = [1, 1]} : vector<2x128xf32> to vector<2x64xf32>
    %385 = arith.mulf %383, %328 : vector<2x64xf32>
    %386 = arith.addf %385, %382 : vector<2x64xf32>
    %387 = math.tanh %386 : vector<2x64xf32>
    %388 = arith.mulf %384, %387 : vector<2x64xf32>
    %c72_98 = arith.constant 72 : index
    %c0_99 = arith.constant 0 : index
    %389 = vector.load %arg1[%c72_98, %c0_99] : memref<328x256xf32, #tpu.memory_space<vmem>>, vector<64x256xf32>
    %cst_100 = arith.constant dense<0.000000e+00> : vector<2x256xf32>
    %390 = tpu.matmul %330, %389, %cst_100 {dimension_numbers = #tpu.dot_dimension_numbers<[1], [0], [0], [1], [0, 0, 1, 1], [], []>} : vector<2x64xf32>, vector<64x256xf32>, vector<2x256xf32> -> vector<2x256xf32>
    %c136_101 = arith.constant 136 : index
    %c0_102 = arith.constant 0 : index
    %391 = vector.load %arg1[%c136_101, %c0_102] : memref<328x256xf32, #tpu.memory_space<vmem>>, vector<64x256xf32>
    %cst_103 = arith.constant dense<0.000000e+00> : vector<2x256xf32>
    %392 = tpu.matmul %350, %391, %cst_103 {dimension_numbers = #tpu.dot_dimension_numbers<[1], [0], [0], [1], [0, 0, 1, 1], [], []>} : vector<2x64xf32>, vector<64x256xf32>, vector<2x256xf32> -> vector<2x256xf32>
    %393 = arith.addf %390, %392 : vector<2x256xf32>
    %394 = arith.addf %393, %9 : vector<2x256xf32>
    %395 = arith.mulf %394, %18 : vector<2x256xf32>
    %396 = math.tanh %395 : vector<2x256xf32>
    %397 = arith.mulf %396, %18 : vector<2x256xf32>
    %398 = arith.addf %397, %23 : vector<2x256xf32>
    %399 = vector.extract_strided_slice %398 {offsets = [0, 0], sizes = [2, 128], strides = [1, 1]} : vector<2x256xf32> to vector<2x128xf32>
    %400 = vector.extract_strided_slice %398 {offsets = [0, 128], sizes = [2, 128], strides = [1, 1]} : vector<2x256xf32> to vector<2x128xf32>
    %401 = arith.mulf %399, %400 : vector<2x128xf32>
    %402 = vector.extract_strided_slice %401 {offsets = [0, 64], sizes = [2, 64], strides = [1, 1]} : vector<2x128xf32> to vector<2x64xf32>
    %403 = vector.extract_strided_slice %399 {offsets = [0, 0], sizes = [2, 64], strides = [1, 1]} : vector<2x128xf32> to vector<2x64xf32>
    %404 = vector.extract_strided_slice %400 {offsets = [0, 0], sizes = [2, 64], strides = [1, 1]} : vector<2x128xf32> to vector<2x64xf32>
    %405 = arith.mulf %403, %348 : vector<2x64xf32>
    %406 = arith.addf %405, %402 : vector<2x64xf32>
    %407 = math.tanh %406 : vector<2x64xf32>
    %408 = arith.mulf %404, %407 : vector<2x64xf32>
    %c200_104 = arith.constant 200 : index
    %c0_105 = arith.constant 0 : index
    %409 = vector.load %arg1[%c200_104, %c0_105] : memref<328x256xf32, #tpu.memory_space<vmem>>, vector<64x256xf32>
    %cst_106 = arith.constant dense<0.000000e+00> : vector<2x256xf32>
    %410 = tpu.matmul %350, %409, %cst_106 {dimension_numbers = #tpu.dot_dimension_numbers<[1], [0], [0], [1], [0, 0, 1, 1], [], []>} : vector<2x64xf32>, vector<64x256xf32>, vector<2x256xf32> -> vector<2x256xf32>
    %c264_107 = arith.constant 264 : index
    %c0_108 = arith.constant 0 : index
    %411 = vector.load %arg1[%c264_107, %c0_108] : memref<328x256xf32, #tpu.memory_space<vmem>>, vector<64x256xf32>
    %cst_109 = arith.constant dense<0.000000e+00> : vector<2x256xf32>
    %412 = tpu.matmul %370, %411, %cst_109 {dimension_numbers = #tpu.dot_dimension_numbers<[1], [0], [0], [1], [0, 0, 1, 1], [], []>} : vector<2x64xf32>, vector<64x256xf32>, vector<2x256xf32> -> vector<2x256xf32>
    %413 = arith.addf %410, %412 : vector<2x256xf32>
    %414 = arith.addf %413, %12 : vector<2x256xf32>
    %415 = arith.mulf %414, %18 : vector<2x256xf32>
    %416 = math.tanh %415 : vector<2x256xf32>
    %417 = arith.mulf %416, %18 : vector<2x256xf32>
    %418 = arith.addf %417, %23 : vector<2x256xf32>
    %419 = vector.extract_strided_slice %418 {offsets = [0, 0], sizes = [2, 128], strides = [1, 1]} : vector<2x256xf32> to vector<2x128xf32>
    %420 = vector.extract_strided_slice %418 {offsets = [0, 128], sizes = [2, 128], strides = [1, 1]} : vector<2x256xf32> to vector<2x128xf32>
    %421 = arith.mulf %419, %420 : vector<2x128xf32>
    %422 = vector.extract_strided_slice %421 {offsets = [0, 64], sizes = [2, 64], strides = [1, 1]} : vector<2x128xf32> to vector<2x64xf32>
    %423 = vector.extract_strided_slice %419 {offsets = [0, 0], sizes = [2, 64], strides = [1, 1]} : vector<2x128xf32> to vector<2x64xf32>
    %424 = vector.extract_strided_slice %420 {offsets = [0, 0], sizes = [2, 64], strides = [1, 1]} : vector<2x128xf32> to vector<2x64xf32>
    %425 = arith.mulf %423, %368 : vector<2x64xf32>
    %426 = arith.addf %425, %422 : vector<2x64xf32>
    %427 = math.tanh %426 : vector<2x64xf32>
    %428 = arith.mulf %424, %427 : vector<2x64xf32>
    %c72_110 = arith.constant 72 : index
    %c0_111 = arith.constant 0 : index
    %429 = vector.load %arg1[%c72_110, %c0_111] : memref<328x256xf32, #tpu.memory_space<vmem>>, vector<64x256xf32>
    %cst_112 = arith.constant dense<0.000000e+00> : vector<2x256xf32>
    %430 = tpu.matmul %388, %429, %cst_112 {dimension_numbers = #tpu.dot_dimension_numbers<[1], [0], [0], [1], [0, 0, 1, 1], [], []>} : vector<2x64xf32>, vector<64x256xf32>, vector<2x256xf32> -> vector<2x256xf32>
    %c136_113 = arith.constant 136 : index
    %c0_114 = arith.constant 0 : index
    %431 = vector.load %arg1[%c136_113, %c0_114] : memref<328x256xf32, #tpu.memory_space<vmem>>, vector<64x256xf32>
    %cst_115 = arith.constant dense<0.000000e+00> : vector<2x256xf32>
    %432 = tpu.matmul %408, %431, %cst_115 {dimension_numbers = #tpu.dot_dimension_numbers<[1], [0], [0], [1], [0, 0, 1, 1], [], []>} : vector<2x64xf32>, vector<64x256xf32>, vector<2x256xf32> -> vector<2x256xf32>
    %433 = arith.addf %430, %432 : vector<2x256xf32>
    %434 = arith.addf %433, %9 : vector<2x256xf32>
    %435 = arith.mulf %434, %18 : vector<2x256xf32>
    %436 = math.tanh %435 : vector<2x256xf32>
    %437 = arith.mulf %436, %18 : vector<2x256xf32>
    %438 = arith.addf %437, %23 : vector<2x256xf32>
    %439 = vector.extract_strided_slice %438 {offsets = [0, 0], sizes = [2, 128], strides = [1, 1]} : vector<2x256xf32> to vector<2x128xf32>
    %440 = vector.extract_strided_slice %438 {offsets = [0, 128], sizes = [2, 128], strides = [1, 1]} : vector<2x256xf32> to vector<2x128xf32>
    %441 = arith.mulf %439, %440 : vector<2x128xf32>
    %442 = vector.extract_strided_slice %441 {offsets = [0, 64], sizes = [2, 64], strides = [1, 1]} : vector<2x128xf32> to vector<2x64xf32>
    %443 = vector.extract_strided_slice %439 {offsets = [0, 0], sizes = [2, 64], strides = [1, 1]} : vector<2x128xf32> to vector<2x64xf32>
    %444 = vector.extract_strided_slice %440 {offsets = [0, 0], sizes = [2, 64], strides = [1, 1]} : vector<2x128xf32> to vector<2x64xf32>
    %445 = arith.mulf %443, %406 : vector<2x64xf32>
    %446 = arith.addf %445, %442 : vector<2x64xf32>
    %447 = math.tanh %446 : vector<2x64xf32>
    %448 = arith.mulf %444, %447 : vector<2x64xf32>
    %c200_116 = arith.constant 200 : index
    %c0_117 = arith.constant 0 : index
    %449 = vector.load %arg1[%c200_116, %c0_117] : memref<328x256xf32, #tpu.memory_space<vmem>>, vector<64x256xf32>
    %cst_118 = arith.constant dense<0.000000e+00> : vector<2x256xf32>
    %450 = tpu.matmul %408, %449, %cst_118 {dimension_numbers = #tpu.dot_dimension_numbers<[1], [0], [0], [1], [0, 0, 1, 1], [], []>} : vector<2x64xf32>, vector<64x256xf32>, vector<2x256xf32> -> vector<2x256xf32>
    %c264_119 = arith.constant 264 : index
    %c0_120 = arith.constant 0 : index
    %451 = vector.load %arg1[%c264_119, %c0_120] : memref<328x256xf32, #tpu.memory_space<vmem>>, vector<64x256xf32>
    %cst_121 = arith.constant dense<0.000000e+00> : vector<2x256xf32>
    %452 = tpu.matmul %428, %451, %cst_121 {dimension_numbers = #tpu.dot_dimension_numbers<[1], [0], [0], [1], [0, 0, 1, 1], [], []>} : vector<2x64xf32>, vector<64x256xf32>, vector<2x256xf32> -> vector<2x256xf32>
    %453 = arith.addf %450, %452 : vector<2x256xf32>
    %454 = arith.addf %453, %12 : vector<2x256xf32>
    %455 = arith.mulf %454, %18 : vector<2x256xf32>
    %456 = math.tanh %455 : vector<2x256xf32>
    %457 = arith.mulf %456, %18 : vector<2x256xf32>
    %458 = arith.addf %457, %23 : vector<2x256xf32>
    %459 = vector.extract_strided_slice %458 {offsets = [0, 0], sizes = [2, 128], strides = [1, 1]} : vector<2x256xf32> to vector<2x128xf32>
    %460 = vector.extract_strided_slice %458 {offsets = [0, 128], sizes = [2, 128], strides = [1, 1]} : vector<2x256xf32> to vector<2x128xf32>
    %461 = arith.mulf %459, %460 : vector<2x128xf32>
    %462 = vector.extract_strided_slice %461 {offsets = [0, 64], sizes = [2, 64], strides = [1, 1]} : vector<2x128xf32> to vector<2x64xf32>
    %463 = vector.extract_strided_slice %459 {offsets = [0, 0], sizes = [2, 64], strides = [1, 1]} : vector<2x128xf32> to vector<2x64xf32>
    %464 = vector.extract_strided_slice %460 {offsets = [0, 0], sizes = [2, 64], strides = [1, 1]} : vector<2x128xf32> to vector<2x64xf32>
    %465 = arith.mulf %463, %426 : vector<2x64xf32>
    %466 = arith.addf %465, %462 : vector<2x64xf32>
    %467 = math.tanh %466 : vector<2x64xf32>
    %468 = arith.mulf %464, %467 : vector<2x64xf32>
    %c200_122 = arith.constant 200 : index
    %c0_123 = arith.constant 0 : index
    %469 = vector.load %arg1[%c200_122, %c0_123] : memref<328x256xf32, #tpu.memory_space<vmem>>, vector<64x256xf32>
    %cst_124 = arith.constant dense<0.000000e+00> : vector<2x256xf32>
    %470 = tpu.matmul %448, %469, %cst_124 {dimension_numbers = #tpu.dot_dimension_numbers<[1], [0], [0], [1], [0, 0, 1, 1], [], []>} : vector<2x64xf32>, vector<64x256xf32>, vector<2x256xf32> -> vector<2x256xf32>
    %c264_125 = arith.constant 264 : index
    %c0_126 = arith.constant 0 : index
    %471 = vector.load %arg1[%c264_125, %c0_126] : memref<328x256xf32, #tpu.memory_space<vmem>>, vector<64x256xf32>
    %cst_127 = arith.constant dense<0.000000e+00> : vector<2x256xf32>
    %472 = tpu.matmul %468, %471, %cst_127 {dimension_numbers = #tpu.dot_dimension_numbers<[1], [0], [0], [1], [0, 0, 1, 1], [], []>} : vector<2x64xf32>, vector<64x256xf32>, vector<2x256xf32> -> vector<2x256xf32>
    %473 = arith.addf %470, %472 : vector<2x256xf32>
    %474 = arith.addf %473, %12 : vector<2x256xf32>
    %475 = arith.mulf %474, %18 : vector<2x256xf32>
    %476 = math.tanh %475 : vector<2x256xf32>
    %477 = arith.mulf %476, %18 : vector<2x256xf32>
    %478 = arith.addf %477, %23 : vector<2x256xf32>
    %479 = vector.extract_strided_slice %478 {offsets = [0, 0], sizes = [2, 128], strides = [1, 1]} : vector<2x256xf32> to vector<2x128xf32>
    %480 = vector.extract_strided_slice %478 {offsets = [0, 128], sizes = [2, 128], strides = [1, 1]} : vector<2x256xf32> to vector<2x128xf32>
    %481 = arith.mulf %479, %480 : vector<2x128xf32>
    %482 = vector.extract_strided_slice %481 {offsets = [0, 64], sizes = [2, 64], strides = [1, 1]} : vector<2x128xf32> to vector<2x64xf32>
    %483 = vector.extract_strided_slice %479 {offsets = [0, 0], sizes = [2, 64], strides = [1, 1]} : vector<2x128xf32> to vector<2x64xf32>
    %484 = vector.extract_strided_slice %480 {offsets = [0, 0], sizes = [2, 64], strides = [1, 1]} : vector<2x128xf32> to vector<2x64xf32>
    %485 = arith.mulf %483, %466 : vector<2x64xf32>
    %486 = arith.addf %485, %482 : vector<2x64xf32>
    %487 = math.tanh %486 : vector<2x64xf32>
    %488 = arith.mulf %484, %487 : vector<2x64xf32>
    %cst_128 = arith.constant dense<0.000000e+00> : vector<2xf32>
    %489 = vector.multi_reduction <add>, %488, %cst_128 [1] : vector<2x64xf32> to vector<2xf32>
    %490 = vector.shape_cast %489 : vector<2xf32> to vector<2x1xf32>
    %cst_129 = arith.constant 6.400000e+01 : f32
    %491 = vector.broadcast %cst_129 : f32 to vector<2x1xf32>
    %492 = arith.divf %490, %491 : vector<2x1xf32>
    %493 = vector.broadcast %492 : vector<2x1xf32> to vector<2x64xf32>
    %494 = arith.subf %488, %493 : vector<2x64xf32>
    %495 = arith.mulf %494, %494 : vector<2x64xf32>
    %cst_130 = arith.constant dense<0.000000e+00> : vector<2xf32>
    %496 = vector.multi_reduction <add>, %495, %cst_130 [1] : vector<2x64xf32> to vector<2xf32>
    %497 = vector.shape_cast %496 : vector<2xf32> to vector<2x1xf32>
    %cst_131 = arith.constant 6.400000e+01 : f32
    %498 = vector.broadcast %cst_131 : f32 to vector<2x1xf32>
    %499 = arith.divf %497, %498 : vector<2x1xf32>
    %cst_132 = arith.constant 9.99999974E-6 : f32
    %500 = vector.broadcast %cst_132 : f32 to vector<2x1xf32>
    %501 = arith.addf %499, %500 : vector<2x1xf32>
    %502 = math.rsqrt %501 : vector<2x1xf32>
    %503 = vector.broadcast %502 : vector<2x1xf32> to vector<2x64xf32>
    %504 = arith.mulf %494, %503 : vector<2x64xf32>
    %c3 = arith.constant 3 : index
    %c0_133 = arith.constant 0 : index
    %505 = vector.load %arg2[%c3, %c0_133] : memref<6x256xf32, #tpu.memory_space<vmem>>, vector<1x64xf32>
    %506 = vector.broadcast %505 : vector<1x64xf32> to vector<2x64xf32>
    %507 = arith.mulf %504, %506 : vector<2x64xf32>
    %c4 = arith.constant 4 : index
    %c0_134 = arith.constant 0 : index
    %508 = vector.load %arg2[%c4, %c0_134] : memref<6x256xf32, #tpu.memory_space<vmem>>, vector<1x64xf32>
    %509 = vector.broadcast %508 : vector<1x64xf32> to vector<2x64xf32>
    %510 = arith.addf %507, %509 : vector<2x64xf32>
    %cst_135 = arith.constant 0.000000e+00 : f32
    %511 = vector.broadcast %cst_135 : f32 to vector<2x64xf32>
    %512 = arith.maximumf %510, %511 : vector<2x64xf32>
    %c0_136 = arith.constant 0 : index
    %c0_137 = arith.constant 0 : index
    %513 = vector.load %arg3[%c0_136, %c0_137] : memref<64x128xf32, #tpu.memory_space<vmem>>, vector<64x128xf32>
    %cst_138 = arith.constant dense<0.000000e+00> : vector<2x128xf32>
    %514 = tpu.matmul %512, %513, %cst_138 {dimension_numbers = #tpu.dot_dimension_numbers<[1], [0], [0], [1], [0, 0, 1, 1], [], []>} : vector<2x64xf32>, vector<64x128xf32>, vector<2x128xf32> -> vector<2x128xf32>
    %c5 = arith.constant 5 : index
    %c0_139 = arith.constant 0 : index
    %515 = vector.load %arg2[%c5, %c0_139] : memref<6x256xf32, #tpu.memory_space<vmem>>, vector<1x128xf32>
    %516 = vector.broadcast %515 : vector<1x128xf32> to vector<2x128xf32>
    %517 = arith.addf %514, %516 : vector<2x128xf32>
    %c0_140 = arith.constant 0 : index
    %c0_141 = arith.constant 0 : index
    %518 = vector.load %arg4[%c0_140, %c0_141] : memref<2x128xf32, #tpu.memory_space<vmem>>, vector<2x128xf32>
    tpu.vector_store %arg4[%c0_140, %c0_141], %517 {strides = array<i32>} : memref<2x128xf32, #tpu.memory_space<vmem>>, vector<2x128xf32>,
    return
  }
}

</mosaic_0001>

<bundles_post_ra>
// kernel: tpu_custom_call.1
= control target key start
LH: loop header
LB: loop body
LE: loop exit
PB: predicated region body
PF: predicated region fallthrough
CT: control target
= control target key end

     0   :  { %9 = vsyncpa [#allocation3], 0  ;;  %s5649_s0 = inlined_call_operand.vmem [shape: f32[16,8], index: 0, kind: input, shape index: {}]   ;;  %s5650_s1 = inlined_call_operand.hbm [shape: f32[328,256], index: 1, kind: input, shape index: {}]   ;;  %s5651_s2 = inlined_call_operand.vmem [shape: f32[6,256], index: 2, kind: input, shape index: {}]   ;;  %s5652_s3 = inlined_call_operand.hbm [shape: f32[64,128], index: 3, kind: input, shape index: {}]   ;;  %s5653_s4 = inlined_call_operand.hbm [shape: f32[2,128], index: 4, kind: output, shape index: {}]  }
   0x1   :  { %10 = vsyncpa [#allocation6], 0 }
   0x2   :  { %11 = vsyncpa [#allocation4], 0  ;;  %s4796_s15 = smov [#allocation2]   ;;  %s4724_s19 = scalar_lea.hbm %s5650_s1, 10496 }
   0x3   :  { %s19_s16 = sshll.u32 %s4796_s15, 4  ;;  %p4725_p0 = scmp.ne.s32.totalorder %s5650_s1, %s4724_s19  ;;  %s20_s16 = int_to_ptr.vmem [resolvable:$true] %s19_s16 }
   0x4   :  { %p4728_p1 = scmp.lt.u32.totalorder %s4724_s19, %s5650_s1 }
   0x6   :  { %p4730_p2 = pnand %p4728_p1, %p4725_p0 }
   0x8   :  { %4733 = shalt.err (!%p4730_p2)
}
   0x9   :  { %s4734_s24 = scalar_lea.vmem %s20_s16, 10496  ;;  %p4739_p4 = scmp.lt.s32.totalorder %s20_s16, %s20_s16 }
   0xa   :  { %p4735_p3 = scmp.ne.s32.totalorder %s20_s16, %s4734_s24  ;;  %p4740_p5 = scmp.lt.s32.totalorder %s4734_s24, %s4734_s24 }
   0xc   :  { %p4741_p6 = por %p4740_p5, %p4739_p4 }
   0xe   :  { %p4742_p7 = pnand %p4741_p6, %p4735_p3 }
  0x10   :  { %4745 = shalt.err (!%p4742_p7)
}
  0x11   :  { %s4797_s25 = smov 256   ;;  %s4798_s26 = smov 16  }
  0x12   :  { %25 = dma.hbm_to_vmem [thread:$0]  %s5650_s1, 10496, %s20_s16, [#allocation3], %s4797_s25, %s4797_s25, %s4798_s26  }
  0x13   :  { %s4799_s29 = smov [#allocation5]   ;;  %s4746_s7 = scalar_lea.hbm %s5652_s3, 1024 }
  0x14   :  { %s33_s30 = sshll.u32 %s4799_s29, 4  ;;  %p4747_p8 = scmp.ne.s32.totalorder %s5652_s3, %s4746_s7  ;;  %s34_s30 = int_to_ptr.vmem [resolvable:$true] %s33_s30 }
  0x15   :  { %p4750_p9 = scmp.lt.u32.totalorder %s4746_s7, %s5652_s3 }
  0x17   :  { %p4752_p10 = pnand %p4750_p9, %p4747_p8 }
  0x19   :  { %4755 = shalt.err (!%p4752_p10)
}
  0x1a   :  { %s4756_s12 = scalar_lea.vmem %s34_s30, 1024  ;;  %p4761_p12 = scmp.lt.s32.totalorder %s34_s30, %s34_s30 }
  0x1b   :  { %p4757_p11 = scmp.ne.s32.totalorder %s34_s30, %s4756_s12  ;;  %p4762_p13 = scmp.lt.s32.totalorder %s4756_s12, %s4756_s12 }
  0x1d   :  { %p4763_p0 = por %p4762_p13, %p4761_p12 }
  0x1f   :  { %p4764_p1 = pnand %p4763_p0, %p4757_p11 }
  0x21   :  { %4767 = shalt.err (!%p4764_p1)
}
  0x22   :  { %s4800_s1 = smov 128   ;;  %s4801_s13 = smov 8  }
  0x23   :  { %39 = dma.hbm_to_vmem [thread:$0]  %s5652_s3, 1024, %s34_s30, [#allocation6], %s4800_s1, %s4800_s1, %s4801_s13  }
  0x24   :  { %4790 = dma.done.wait [#allocation3], 10496  }
  0x25   :  { %4791 = vsyncadd [#allocation3], 4294956800 }
  0x26   :  { %4792 = dma.done.wait [#allocation6], 1024  }
  0x27   :  { %4793 = vsyncadd [#allocation6], 4294966272  ;;  %v5654_v0 = vmov 0.0   ;;  %v182_v1 = vld [vmem:[#allocation2 + $0x18] sm:$0xff]  ;;  %v184_v2 = vld [vmem:[#allocation2 + $0x28] sm:$0xff]  ;;  %vm62_vm0 = vcmask 64512   ;;  %v52_v55 = vlaneseq }
  0x28   :  { %133 = vmatprep.mubr.f32.mxu0 %v5654_v0  ;;  %265 = vmatprep.mubr.f32.mxu1 %v5654_v0  ;;  %v181_v3 = vld [vmem:[#allocation2 + $0x10] sm:$0xff]  ;;  %v4859_v4 = vpack.c.bf16 %v184_v2, %v182_v1  ;;  %v183_v5 = vld [vmem:[#allocation2 + $0x20] sm:$0xff]  ;;  %v186_v6 = vld [vmem:[#allocation2 + $0x38] sm:$0xff]  ;;  %s4804_s21 = smov 64   ;;  %vm197_vm2 = vcmask 523264   ;;  %vm3693_vm3 = vcmask 517120  }
  0x29   :  { %v188_v7 = vld [vmem:[#allocation2 + $0x48] sm:$0xff]  ;;  %v4861_v8 = vpack.c.bf16 %v183_v5, %v181_v3  ;;  %v185_v10 = vld [vmem:[#allocation2 + $0x30] sm:$0xff]  ;;  %v187_v11 = vld [vmem:[#allocation2 + $0x40] sm:$0xff]  ;;  %v53_v56 = vshrl.u32 %v52_v55, 7  ;;  %v173_v61 = vand.u32 127, %v52_v55  ;;  %vm4806_vm4 = vmmov 0  }
  0x2a   :  { %v4863_v9 = vpack.c.bf16 %v188_v7, %v186_v6  ;;  %v190_v12 = vld [vmem:[#allocation2 + $0x58] sm:$0xff]  ;;  %3883 = vmatprep.subr.bf16.mxu1 %v4859_v4  ;;  %v192_v13 = vld [vmem:[#allocation2 + $0x68] sm:$0xff]  ;;  %v4867_v14 = vpack.c.bf16 %v187_v11, %v185_v10  ;;  %v48_v16 = vld [vmem:[#allocation2] sm:$0xff]  ;;  %v4803_v7 = vmov 0.5   ;;  %s4807_s5 = smov [#allocation7]  }
  0x2b   :  { %3885 = vmatpush1.bf16.msra.mxu1 %v4861_v8  ;;  %v49_v15 = vld [vmem:[#allocation2 + $0x8] sm:$0xff]  ;;  %v4870_v17 = vpack.c.bf16 %v192_v13, %v190_v12  ;;  %v189_v18 = vld [vmem:[#allocation2 + $0x50] sm:$0xff]  ;;  %v191_v19 = vld [vmem:[#allocation2 + $0x60] sm:$0xff]  ;;  %v4928_v58 = vsub.s32 0, %v53_v56  ;;  %v4933_v62 = vsub.s32 1, %v53_v56  ;;  %v174_v1 = vadd.s32 128, %v173_v61 }
  0x2c   :  { %3887 = vmatprep.subr.bf16.mxu1 %v4863_v9  ;;  %69 = vmatprep.subr.mxu0 %v49_v15  ;;  %v46_v20 = vld [vmem:[%s5649_s0] sm:$0xff]  ;;  %v194_v21 = vld [vmem:[#allocation2 + $0x78] sm:$0xff]  ;;  %v196_v22 = vld [vmem:[#allocation2 + $0x88] sm:$0xff]  ;;  %v4878_v23 = vpack.c.bf16 %v191_v19, %v189_v18  ;;  %s3802_s6 = sshll.u32 %s4807_s5, 4  ;;  %s3803_s6 = int_to_ptr.vmem [resolvable:$true] %s3802_s6 }
  0x2d   :  { %70 = vmatpush1.msra.mxu0 %v48_v16  ;;  %v4882_v24 = vpack.c.bf16 %v196_v22, %v194_v21  ;;  %v193_v25 = vld [vmem:[#allocation2 + $0x70] sm:$0xff]  ;;  %v195_v26 = vld [vmem:[#allocation2 + $0x80] sm:$0xff]  ;;  %v410_v28 = vld [vmem:[#allocation2 + $0x118] sm:$0xff]  ;;  %vm176_vm1 = vcmp.ge.s32.totalorder %v174_v1, 192  ;;  %s4768_s7 = scalar_lea.vmem %s3803_s6, 32  ;;  %p4773_p3 = scmp.lt.s32.totalorder %s3803_s6, %s3803_s6 }
  0x2e   :  { %3812 = vmatmul.mubr.msk.f32.vlgmr.msra.gmra.mrb[0].mxu0 %vm62_vm0, %v46_v20  ;;  %3899 = vmatprep.subr.bf16.mxu0 %v4859_v4  ;;  %v4887_v27 = vpack.c.bf16 %v195_v26, %v193_v25  ;;  %v412_v29 = vld [vmem:[#allocation2 + $0x128] sm:$0xff]  ;;  %v409_v30 = vld [vmem:[#allocation2 + $0x110] sm:$0xff]  ;;  %v411_v32 = vld [vmem:[#allocation2 + $0x120] sm:$0xff]  ;;  %v4948_v10 = vsel %vm176_vm1, 1.0, %v4803_v7  ;;  %p4769_p2 = scmp.ne.s32.totalorder %s3803_s6, %s4768_s7  ;;  %p4774_p4 = scmp.lt.s32.totalorder %s4768_s7, %s4768_s7 }
  0x2f   :  { %3889 = vmatpush1.bf16.msra.mxu1 %v4867_v14  ;;  %3901 = vmatpush1.bf16.msra.mxu0 %v4861_v8  ;;  %v4899_v31 = vpack.c.bf16 %v412_v29, %v410_v28  ;;  %v414_v33 = vld [vmem:[#allocation2 + $0x138] sm:$0xff]  ;;  %v416_v34 = vld [vmem:[#allocation2 + $0x148] sm:$0xff]  ;;  %v4901_v35 = vpack.c.bf16 %v411_v32, %v409_v30  ;;  %v413_v37 = vld [vmem:[#allocation2 + $0x130] sm:$0xff] }
  0x30   :  { %3891 = vmatprep.subr.bf16.mxu1 %v4870_v17  ;;  %3903 = vmatprep.subr.bf16.mxu0 %v4863_v9  ;;  %v4903_v36 = vpack.c.bf16 %v416_v34, %v414_v33  ;;  %v415_v38 = vld [vmem:[#allocation2 + $0x140] sm:$0xff]  ;;  %v418_v39 = vld [vmem:[#allocation2 + $0x158] sm:$0xff]  ;;  %v420_v40 = vld [vmem:[#allocation2 + $0x168] sm:$0xff]  ;;  %p4775_p5 = por %p4774_p4, %p4773_p3 }
  0x31   :  { %139 = vmatprep.mubr.f32.mxu0 %v5654_v0  ;;  %v4907_v41 = vpack.c.bf16 %v415_v38, %v413_v37  ;;  %v4910_v42 = vpack.c.bf16 %v420_v40, %v418_v39  ;;  %v417_v43 = vld [vmem:[#allocation2 + $0x150] sm:$0xff]  ;;  %v419_v44 = vld [vmem:[#allocation2 + $0x160] sm:$0xff]  ;;  %v422_v45 = vld [vmem:[#allocation2 + $0x178] sm:$0xff]  ;;  %v4965_v40 = vsel %vm176_vm1, 0.0, %v4803_v7 }
  0x32   :  { %v424_v46 = vld [vmem:[#allocation2 + $0x188] sm:$0xff]  ;;  %v4913_v47 = vpack.c.bf16 %v419_v44, %v417_v43  ;;  %v421_v49 = vld [vmem:[#allocation2 + $0x170] sm:$0xff]  ;;  %v423_v50 = vld [vmem:[#allocation2 + $0x180] sm:$0xff]  ;;  %p4776_p6 = pnand %p4775_p5, %p4769_p2 }
  0x33   :  { %3893 = vmatpush1.bf16.msra.mxu1 %v4878_v23  ;;  %3905 = vmatpush1.bf16.msra.mxu0 %v4867_v14  ;;  %v4916_v48 = vpack.c.bf16 %v424_v46, %v422_v45  ;;  %v394_v51 = vld [vmem:[#allocation2 + $0x98] sm:$0xff]  ;;  %v396_v52 = vld [vmem:[#allocation2 + $0xa8] sm:$0xff]  ;;  %v4919_v53 = vpack.c.bf16 %v423_v50, %v421_v49  ;;  %v393_v18 = vld [vmem:[#allocation2 + $0x90] sm:$0xff] }
  0x34   :  { %3895 = vmatprep.subr.bf16.mxu1 %v4882_v24  ;;  %3907 = vmatprep.subr.bf16.mxu0 %v4870_v17  ;;  %v4922_v54 = vpack.c.bf16 %v396_v52, %v394_v51  ;;  %v50_v60 = vld [vmem:[%s5651_s2] ss:$8 sm:$0x3]  ;;  %v398_v21 = vld [vmem:[#allocation2 + $0xb8] sm:$0xff]  ;;  %v397_v26 = vld [vmem:[#allocation2 + $0xb0] sm:$0xff] }
  0x35   :  { %v4936_v63 = vrot.slane %v50_v60, %v4928_v58  ;;  %v4939_v2 = vrot.slane %v50_v60, %v4933_v62  ;;  %v395_v19 = vld [vmem:[#allocation2 + $0xa0] sm:$0xff]  ;;  %v400_v22 = vld [vmem:[#allocation2 + $0xc8] sm:$0xff]  ;;  %v402_v30 = vld [vmem:[#allocation2 + $0xd8] sm:$0xff] }
  0x36   :  { %v4953_v20 = vpack.c.bf16 %v395_v19, %v393_v18  ;;  %v4956_v25 = vpack.c.bf16 %v400_v22, %v398_v21  ;;  %v399_v28 = vld [vmem:[#allocation2 + $0xc0] sm:$0xff]  ;;  %v404_v32 = vld [vmem:[#allocation2 + $0xe8] sm:$0xff]  ;;  %v401_v37 = vld [vmem:[#allocation2 + $0xd0] sm:$0xff] }
  0x37   :  { %3897 = vmatpush1.bf16.msra.mxu1 %v4887_v27  ;;  %3909 = vmatpush1.bf16.msra.mxu0 %v4878_v23  ;;  %5672 = vst [vmem:[#allocation11_spill] sm:$0xff] %v4936_v63  ;;  %5673 = vst [vmem:[#allocation12_spill] sm:$0xff] %v4939_v2  ;;  %v4958_v29 = vpack.c.bf16 %v399_v28, %v397_v26  ;;  %v4962_v34 = vpack.c.bf16 %v404_v32, %v402_v30  ;;  %v403_v38 = vld [vmem:[#allocation2 + $0xe0] sm:$0xff]  ;;  %v406_v49 = vld [vmem:[#allocation2 + $0xf8] sm:$0xff] }
  0x38   :  { %3911 = vmatprep.subr.bf16.mxu0 %v4882_v24  ;;  %3915 = vmatprep.subr.bf16.mxu1 %v4899_v31  ;;  %v4967_v44 = vpack.c.bf16 %v403_v38, %v401_v37  ;;  %v408_v50 = vld [vmem:[#allocation2 + $0x108] sm:$0xff]  ;;  %v405_v56 = vld [vmem:[#allocation2 + $0xf0] sm:$0xff]  ;;  %v871_v21 = vld [vmem:[#allocation2 + $0x220] sm:$0xff] }
  0x39   :  { %v47_v52 = vld [vmem:[%s5649_s0 + $0x8] sm:$0xff]  ;;  %v4976_v55 = vpack.c.bf16 %v408_v50, %v406_v49  ;;  %v869_v18 = vld [vmem:[#allocation2 + $0x210] sm:$0xff]  ;;  %v874_v22 = vld [vmem:[#allocation2 + $0x238] sm:$0xff] }
  0x3a   :  { %266 = vmatmul.mubr.f32.vlgmr.msra.gmra.mrb[0].mxu1 %v5654_v0  ;;  %3813 = vmatmul.mubr.msk.f32.gmra.mrb[2].mxu0 %vm62_vm0, %v47_v52  ;;  %v876_v26 = vld [vmem:[#allocation2 + $0x248] sm:$0xff]  ;;  %v5006_v28 = vpack.c.bf16 %v871_v21, %v869_v18  ;;  %v873_v32 = vld [vmem:[#allocation2 + $0x230] sm:$0xff]  ;;  %v878_v37 = vld [vmem:[#allocation2 + $0x258] sm:$0xff] }
  0x3b   :  { %489 = vmatprep.mubr.f32.mxu1 %v5654_v0  ;;  %3913 = vmatpush1.bf16.msra.mxu0 %v4887_v27  ;;  %v5008_v30 = vpack.c.bf16 %v876_v26, %v874_v22  ;;  %v880_v38 = vld [vmem:[#allocation2 + $0x268] sm:$0xff]  ;;  %v882_v49 = vld [vmem:[#allocation2 + $0x278] sm:$0xff] }
  0x3c   :  { %3947 = vmatprep.subr.bf16.mxu0 %v4859_v4  ;;  %3917 = vmatpush1.bf16.msra.mxu1 %v4901_v35  ;;  %v884_v50 = vld [vmem:[#allocation2 + $0x288] sm:$0xff] }
  0x3d   :  { %3919 = vmatprep.subr.bf16.mxu1 %v4903_v36  ;;  %358 = vmatprep.mubr.f32.mxu0 %v5654_v0  ;;  %v5021_v52 = vpack.c.bf16 %v884_v50, %v882_v49 }
  0x40   :  { %3921 = vmatpush1.bf16.msra.mxu1 %v4907_v41 }
  0x41   :  { %3923 = vmatprep.subr.bf16.mxu1 %v4910_v42 }
  0x44   :  { %3925 = vmatpush1.bf16.msra.mxu1 %v4913_v47 }
  0x45   :  { %3927 = vmatprep.subr.bf16.mxu1 %v4916_v48 }
  0x48   :  { %3929 = vmatpush1.bf16.msra.mxu1 %v4919_v53 }
  0x49   :  { %3931 = vmatprep.subr.bf16.mxu1 %v4922_v54 }
  0x4b   :  { %490 = vmatmul.mubr.f32.vlgmr.msra.gmra.mrb[2].mxu1 %v5654_v0 }
  0x4c   :  { %560 = vmatprep.mubr.f32.mxu1 %v5654_v0  ;;  %3933 = vmatpush1.bf16.msra.mxu1 %v4953_v20 }
  0x4d   :  { %3935 = vmatprep.subr.bf16.mxu1 %v4956_v25 }
  0x50   :  { %3937 = vmatpush1.bf16.msra.mxu1 %v4958_v29 }
  0x51   :  { %3939 = vmatprep.subr.bf16.mxu1 %v4962_v34 }
  0x54   :  { %3941 = vmatpush1.bf16.msra.mxu1 %v4967_v44 }
  0x55   :  { %3943 = vmatprep.subr.bf16.mxu1 %v4976_v55 }
 0x101   :  { %v135_v57 = vpop.f32.mrb[0].mxu0 }
 0x102   :  { %v137_v59 = vpop.f32.mrb[1].mxu0  ;;  %v4942_v3 = vadd.f32 %v135_v57, %v4936_v63  ;;  %v407_v57 = vld [vmem:[#allocation2 + $0x100] sm:$0xff] }
 0x103   :  { %v4945_v5 = vadd.f32 %v137_v59, %v4939_v2  ;;  %v4979_v59 = vpack.c.bf16 %v407_v57, %v405_v56  ;;  %v881_v56 = vld [vmem:[#allocation2 + $0x270] sm:$0xff]  ;;  %v883_v57 = vld [vmem:[#allocation2 + $0x280] sm:$0xff] }
 0x105   :  { %3945 = vmatpush1.bf16.msra.mxu1 %v4979_v59 }
 0x10d   :  { %v267_v6 = vpop.f32.mrb[0].mxu1 }
 0x10e   :  { %v272_v11 = vadd.f32 %v267_v6, %v4942_v3  ;;  %v269_v12 = vpop.f32.mrb[1].mxu1 }
 0x10f   :  { %v273_v13 = vadd.f32 %v269_v12, %v4945_v5  ;;  %v5000_v12 = vpop.f32.mrb[2].mxu0 }
 0x110   :  { %v274_v15 = vmul.f32 0.5, %v272_v11  ;;  %5674 = vst [vmem:[#allocation13_spill] sm:$0xff] %v5000_v12 }
 0x111   :  { %v275_v16 = vmul.f32 %v273_v13, %v4948_v10  ;;  %v5002_v13 = vpop.f32.mrb[3].mxu0 }
 0x112   :  { %4578 = vtanh.f32 %v274_v15  ;;  %5675 = vst [vmem:[#allocation14_spill] sm:$0xff] %v5002_v13  ;;  %v870_v15 = vld [vmem:[#allocation2 + $0x218] sm:$0xff] }
 0x113   :  { %4580 = vtanh.f32 %v275_v16  ;;  %v872_v16 = vld [vmem:[#allocation2 + $0x228] sm:$0xff] }
 0x114   :  { %v5004_v19 = vpack.c.bf16 %v872_v16, %v870_v15 }
 0x116   :  { %5676 = vst [vmem:[#allocation15_spill] sm:$0xff] %v5004_v19  ;;  %3995 = vmatprep.subr.bf16.mxu1 %v5004_v19 }
 0x11c   :  { %v4579_v33 = vpop.eup %4578 }
 0x11d   :  { %v4581_v39 = vpop.eup %4580  ;;  %v278_v43 = vmul.f32 0.5, %v4579_v33  ;;  %v875_v33 = vld [vmem:[#allocation2 + $0x240] sm:$0xff] }
 0x11e   :  { %v279_v45 = vmul.f32 %v4581_v39, %v4948_v10  ;;  %v5012_v39 = vpack.c.bf16 %v875_v33, %v873_v32 }
 0x11f   :  { %v280_v46 = vadd.f32 0.5, %v278_v43  ;;  %v5015_v43 = vpack.c.bf16 %v880_v38, %v878_v37 }
 0x120   :  { %v281_v51 = vadd.f32 %v279_v45, %v4965_v40  ;;  %v877_v45 = vld [vmem:[#allocation2 + $0x250] sm:$0xff] }
 0x121   :  { %v283_v61 = vmul.f32 0.0, %v280_v46 }
 0x122   :  { %v282_v60 = vmul.f32 %v281_v51, %v280_v46  ;;  %v879_v46 = vld [vmem:[#allocation2 + $0x260] sm:$0xff] }
 0x124   :  { %285 = vrot.lane.b32.xlu0 %v282_v60, %s4804_s21  ;;  %v854_v60 = vld [vmem:[#allocation2 + $0x198] sm:$0xff] }
 0x196   :  { %v286_v1 = vpop.permute.xlu0 %285 }
 0x197   :  { %v4985_v6 = vadd.f32 %v286_v1, %v283_v61  ;;  %v856_v61 = vld [vmem:[#allocation2 + $0x1a8] sm:$0xff]  ;;  %v5024_v1 = vpack.c.bf16 %v883_v57, %v881_v56 }
 0x199   :  { %4582 = vtanh.f32 %v4985_v6 }
 0x1a3   :  { %v4583_v7 = vpop.eup %4582 }
 0x1a4   :  { %v290_v11 = vmul.f32 %v4583_v7, %v281_v51  ;;  %v5018_v51 = vpack.c.bf16 %v879_v46, %v877_v45  ;;  %v5027_v7 = vpack.c.bf16 %v856_v61, %v854_v60  ;;  %v853_v60 = vld [vmem:[#allocation2 + $0x190] sm:$0xff]  ;;  %v855_v61 = vld [vmem:[#allocation2 + $0x1a0] sm:$0xff] }
 0x1a6   :  { %3816 = vmatmul.mubr.msk.f32.vlgmr.msra.gmra.mrb[4].mxu0 %vm197_vm2, %v290_v11  ;;  %3817 = vmatmul.mubr.msk.f32.vlgmr.msra.gmra.mrb[2].mxu1 %vm197_vm2, %v290_v11  ;;  %v3814_v11 = vld [vmem:[%s5651_s2 + $0x1] ss:$8 sm:$0x3] }
 0x1a7   :  { %949 = vmatprep.mubr.f32.mxu1 %v5654_v0  ;;  %3949 = vmatpush1.bf16.msra.mxu0 %v4861_v8  ;;  %v5037_v15 = vrot.slane %v3814_v11, %v4928_v58  ;;  %v5040_v16 = vrot.slane %v3814_v11, %v4933_v62  ;;  %v5048_v11 = vpack.c.bf16 %v855_v61, %v853_v60 }
 0x1a8   :  { %3951 = vmatprep.subr.bf16.mxu0 %v4863_v9  ;;  %654 = vmatprep.mubr.f32.mxu0 %v5654_v0 }
 0x1a9   :  { %3997 = vmatpush1.bf16.msra.mxu1 %v5006_v28  ;;  %5677 = vst [vmem:[#allocation16_spill] sm:$0xff] %v5037_v15  ;;  %5678 = vst [vmem:[#allocation17_spill] sm:$0xff] %v5040_v16 }
 0x1aa   :  { %3999 = vmatprep.subr.bf16.mxu1 %v5008_v30 }
 0x1ab   :  { %3953 = vmatpush1.bf16.msra.mxu0 %v4867_v14 }
 0x1ac   :  { %3955 = vmatprep.subr.bf16.mxu0 %v4870_v17 }
 0x1ad   :  { %4001 = vmatpush1.bf16.msra.mxu1 %v5012_v39 }
 0x1ae   :  { %4003 = vmatprep.subr.bf16.mxu1 %v5015_v43 }
 0x1af   :  { %3957 = vmatpush1.bf16.msra.mxu0 %v4878_v23 }
 0x1b0   :  { %3959 = vmatprep.subr.bf16.mxu0 %v4882_v24 }
 0x1b1   :  { %4005 = vmatpush1.bf16.msra.mxu1 %v5018_v51 }
 0x1b2   :  { %4007 = vmatprep.subr.bf16.mxu1 %v5021_v52 }
 0x1b3   :  { %3961 = vmatpush1.bf16.msra.mxu0 %v4887_v27 }
 0x1b4   :  { %3963 = vmatprep.subr.bf16.mxu0 %v4899_v31 }
 0x1b5   :  { %4009 = vmatpush1.bf16.msra.mxu1 %v5024_v1 }
 0x1b6   :  { %4011 = vmatprep.subr.bf16.mxu1 %v5027_v7 }
 0x1b8   :  { %950 = vmatmul.mubr.f32.vlgmr.msra.gmra.mrb[4].mxu1 %v5654_v0 }
 0x1b9   :  { %1020 = vmatprep.mubr.f32.mxu1 %v5654_v0  ;;  %4013 = vmatpush1.bf16.msra.mxu1 %v5048_v11 }
 0x279   :  { %v360_v18 = vpop.f32.mrb[4].mxu0  ;;  %v562_v21 = vpop.f32.mrb[2].mxu1 }
 0x27a   :  { %v367_v22 = vrot.slane %v360_v18, 6  ;;  %v567_v26 = vadd.f32 %v562_v21, %v5037_v15  ;;  %v362_v32 = vpop.f32.mrb[5].mxu0  ;;  %v564_v33 = vpop.f32.mrb[3].mxu1  ;;  %v858_v18 = vld [vmem:[#allocation2 + $0x1b8] sm:$0xff]  ;;  %v860_v21 = vld [vmem:[#allocation2 + $0x1c8] sm:$0xff] }
 0x27b   :  { %v368_v37 = vrot.slane %v362_v32, 6  ;;  %v568_v38 = vadd.f32 %v564_v33, %v5040_v16  ;;  %v859_v32 = vld [vmem:[#allocation2 + $0x1c0] sm:$0xff] }
 0x27c   :  { %v371_v45 = vadd.f32 %v367_v22, %v4942_v3  ;;  %v569_v46 = vmul.f32 0.5, %v567_v26  ;;  %v5051_v22 = vpack.c.bf16 %v860_v21, %v858_v18  ;;  %v857_v26 = vld [vmem:[#allocation2 + $0x1b0] sm:$0xff] }
 0x27d   :  { %v372_v49 = vadd.f32 %v368_v37, %v4945_v5  ;;  %v570_v50 = vmul.f32 %v568_v38, %v4948_v10  ;;  %v5053_v33 = vpack.c.bf16 %v859_v32, %v857_v26  ;;  %v862_v37 = vld [vmem:[#allocation2 + $0x1d8] sm:$0xff]  ;;  %v864_v38 = vld [vmem:[#allocation2 + $0x1e8] sm:$0xff]  ;;  %v865_v26 = vld [vmem:[#allocation2 + $0x1f0] sm:$0xff] }
 0x27e   :  { %v373_v56 = vmul.f32 0.5, %v371_v45  ;;  %4584 = vtanh.f32 %v569_v46  ;;  %4015 = vmatprep.subr.bf16.mxu1 %v5051_v22  ;;  %v861_v45 = vld [vmem:[#allocation2 + $0x1d0] sm:$0xff]  ;;  %v867_v32 = vld [vmem:[#allocation2 + $0x200] sm:$0xff] }
 0x27f   :  { %v374_v57 = vmul.f32 %v372_v49, %v4948_v10  ;;  %4586 = vtanh.f32 %v570_v50  ;;  %4017 = vmatpush1.bf16.msra.mxu1 %v5053_v33  ;;  %v5057_v49 = vpack.c.bf16 %v864_v38, %v862_v37  ;;  %v863_v50 = vld [vmem:[#allocation2 + $0x1e0] sm:$0xff]  ;;  %v5066_v38 = vpack.c.bf16 %v867_v32, %v865_v26 }
 0x280   :  { %4588 = vtanh.f32 %v373_v56  ;;  %v866_v56 = vld [vmem:[#allocation2 + $0x1f8] sm:$0xff]  ;;  %v5059_v18 = vpack.c.bf16 %v863_v50, %v861_v45  ;;  %v383_v50 = vrot.slane %v4985_v6, 6 }
 0x281   :  { %4590 = vtanh.f32 %v374_v57  ;;  %v868_v57 = vld [vmem:[#allocation2 + $0x208] sm:$0xff]  ;;  %4019 = vmatprep.subr.bf16.mxu1 %v5057_v49 }
 0x282   :  { %v5061_v21 = vpack.c.bf16 %v868_v57, %v866_v56 }
 0x283   :  { %4021 = vmatpush1.bf16.msra.mxu1 %v5059_v18 }
 0x284   :  { %4023 = vmatprep.subr.bf16.mxu1 %v5061_v21 }
 0x287   :  { %4025 = vmatpush1.bf16.msra.mxu1 %v5066_v38 }
 0x288   :  { %v4585_v46 = vpop.eup %4584  ;;  %4043 = vmatprep.subr.bf16.mxu1 %v4899_v31 }
 0x289   :  { %v4587_v60 = vpop.eup %4586  ;;  %v573_v61 = vmul.f32 0.5, %v4585_v46 }
 0x28a   :  { %v4589_v0 = vpop.eup %4588  ;;  %v574_v13 = vmul.f32 %v4587_v60, %v4948_v10 }
 0x28b   :  { %v4591_v2 = vpop.eup %4590  ;;  %v377_v12 = vmul.f32 0.5, %v4589_v0  ;;  %v575_v37 = vadd.f32 0.5, %v573_v61 }
 0x28c   :  { %v576_v46 = vadd.f32 %v574_v13, %v4965_v40  ;;  %v378_v45 = vmul.f32 %v4591_v2, %v4948_v10 }
 0x28d   :  { %v379_v56 = vadd.f32 0.5, %v377_v12  ;;  %v578_v13 = vmul.f32 0.0, %v575_v37 }
 0x28e   :  { %v577_v57 = vmul.f32 %v576_v46, %v575_v37  ;;  %v380_v60 = vadd.f32 %v378_v45, %v4965_v40 }
 0x28f   :  { %v385_v63 = vmul.f32 %v383_v50, %v379_v56 }
 0x290   :  { %580 = vrot.lane.b32.xlu1 %v577_v57, %s4804_s21  ;;  %v381_v0 = vmul.f32 %v380_v60, %v379_v56  ;;  %v5679_v56 = vmov 0.0  }
 0x292   :  { %387 = vrot.lane.b32.xlu0 %v381_v0, %s4804_s21 }
 0x302   :  { %v581_v2 = vpop.permute.xlu1 %580 }
 0x303   :  { %v5077_v61 = vadd.f32 %v581_v2, %v578_v13 }
 0x304   :  { %v388_v26 = vpop.permute.xlu0 %387 }
 0x305   :  { %4592 = vtanh.f32 %v5077_v61  ;;  %v5080_v6 = vadd.f32 %v388_v26, %v385_v63  ;;  %v3815_v63 = vld [vmem:[%s5651_s2 + $0x2] ss:$8 sm:$0x3] }
 0x306   :  { %v5130_v57 = vrot.slane %v3815_v63, %v4933_v62 }
 0x307   :  { %4594 = vtanh.f32 %v5080_v6 }
 0x308   :  { %5681 = vst [vmem:[#allocation19_spill] sm:$0xff] %v5130_v57 }
 0x30f   :  { %v4593_v12 = vpop.eup %4592 }
 0x310   :  { %v585_v32 = vmul.f32 %v4593_v12, %v576_v46  ;;  %v5127_v46 = vrot.slane %v3815_v63, %v4928_v58 }
 0x311   :  { %v4595_v45 = vpop.eup %4594 }
 0x312   :  { %3821 = vmatmul.mubr.msk.f32.vlgmr.msra.gmra.mrb[4].mxu1 %vm197_vm2, %v585_v32  ;;  %v392_v50 = vmul.f32 %v4595_v45, %v380_v60  ;;  %5680 = vst [vmem:[#allocation18_spill] sm:$0xff] %v5127_v46 }
 0x313   :  { %4045 = vmatpush1.bf16.msra.mxu1 %v4901_v35  ;;  %1216 = vmatprep.mubr.f32.mxu1 %v5679_v56 }
 0x314   :  { %v587_v37 = vrot.slane %v392_v50, 2  ;;  %4047 = vmatprep.subr.bf16.mxu1 %v4903_v36 }
 0x316   :  { %3818 = vmatmul.mubr.msk.f32.vlgmr.msra.gmra.mrb[6].mxu0 %vm197_vm2, %v587_v37 }
 0x317   :  { %3965 = vmatpush1.bf16.msra.mxu0 %v4901_v35  ;;  %756 = vmatprep.mubr.f32.mxu0 %v5679_v56 }
 0x318   :  { %3967 = vmatprep.subr.bf16.mxu0 %v4903_v36  ;;  %4049 = vmatpush1.bf16.msra.mxu1 %v4907_v41 }
 0x319   :  { %4051 = vmatprep.subr.bf16.mxu1 %v4910_v42 }
 0x31b   :  { %3969 = vmatpush1.bf16.msra.mxu0 %v4907_v41 }
 0x31c   :  { %3971 = vmatprep.subr.bf16.mxu0 %v4910_v42  ;;  %4053 = vmatpush1.bf16.msra.mxu1 %v4913_v47 }
 0x31d   :  { %4055 = vmatprep.subr.bf16.mxu1 %v4916_v48 }
 0x31f   :  { %3973 = vmatpush1.bf16.msra.mxu0 %v4913_v47 }
 0x320   :  { %3975 = vmatprep.subr.bf16.mxu0 %v4916_v48  ;;  %4057 = vmatpush1.bf16.msra.mxu1 %v4919_v53 }
 0x321   :  { %4059 = vmatprep.subr.bf16.mxu1 %v4922_v54 }
 0x323   :  { %3977 = vmatpush1.bf16.msra.mxu0 %v4919_v53 }
 0x324   :  { %3979 = vmatprep.subr.bf16.mxu0 %v4922_v54 }
 0x326   :  { %3819 = vmatmul.mubr.msk.f32.vlgmr.msra.gmra.mrb[8].mxu0 %vm197_vm2, %v585_v32 }
 0x327   :  { %3981 = vmatpush1.bf16.msra.mxu0 %v4953_v20  ;;  %827 = vmatprep.mubr.f32.mxu0 %v5679_v56 }
 0x328   :  { %3983 = vmatprep.subr.bf16.mxu0 %v4956_v25 }
 0x32b   :  { %3985 = vmatpush1.bf16.msra.mxu0 %v4958_v29 }
 0x32c   :  { %3987 = vmatprep.subr.bf16.mxu0 %v4962_v34 }
 0x32f   :  { %3989 = vmatpush1.bf16.msra.mxu0 %v4967_v44 }
 0x330   :  { %3991 = vmatprep.subr.bf16.mxu0 %v4976_v55 }
 0x333   :  { %3993 = vmatpush1.bf16.msra.mxu0 %v4979_v59 }
 0x334   :  { %4027 = vmatprep.subr.bf16.mxu0 %v4859_v4 }
 0x336   :  { %3820 = vmatmul.mubr.msk.f32.vlgmr.msra.gmra.mrb[8].mxu0 %vm197_vm2, %v587_v37 }
 0x337   :  { %4029 = vmatpush1.bf16.msra.mxu0 %v4861_v8  ;;  %1114 = vmatprep.mubr.f32.mxu0 %v5679_v56 }
 0x338   :  { %4031 = vmatprep.subr.bf16.mxu0 %v4863_v9 }
 0x33b   :  { %4033 = vmatpush1.bf16.msra.mxu0 %v4867_v14 }
 0x33c   :  { %4035 = vmatprep.subr.bf16.mxu0 %v4870_v17 }
 0x33f   :  { %4037 = vmatpush1.bf16.msra.mxu0 %v4878_v23 }
 0x340   :  { %4039 = vmatprep.subr.bf16.mxu0 %v4882_v24 }
 0x343   :  { %4041 = vmatpush1.bf16.msra.mxu0 %v4887_v27 }
 0x344   :  { %4075 = vmatprep.subr.bf16.mxu0 %v5004_v19 }
 0x3e5   :  { %v1022_v60 = vpop.f32.mrb[4].mxu1 }
 0x3e6   :  { %v1027_v0 = vadd.f32 %v1022_v60, %v5127_v46  ;;  %v1024_v13 = vpop.f32.mrb[5].mxu1 }
 0x3e7   :  { %v1028_v2 = vadd.f32 %v1024_v13, %v5130_v57 }
 0x3e8   :  { %v1029_v26 = vmul.f32 0.5, %v1027_v0 }
 0x3e9   :  { %v1030_v12 = vmul.f32 %v1028_v2, %v4948_v10  ;;  %v656_v32 = vpop.f32.mrb[6].mxu0 }
 0x3ea   :  { %4596 = vtanh.f32 %v1029_v26  ;;  %v663_v45 = vrot.slane %v656_v32, 4  ;;  %v658_v50 = vpop.f32.mrb[7].mxu0 }
 0x3eb   :  { %4598 = vtanh.f32 %v1030_v12  ;;  %v664_v37 = vrot.slane %v658_v50, 4 }
 0x3ec   :  { %v667_v58 = vadd.f32 %v663_v45, %v4942_v3 }
 0x3ed   :  { %v668_v62 = vadd.f32 %v664_v37, %v4945_v5  ;;  %v679_v37 = vrot.slane %v5080_v6, 6 }
 0x3ee   :  { %v669_v63 = vmul.f32 0.5, %v667_v58 }
 0x3ef   :  { %v670_v19 = vmul.f32 %v668_v62, %v4948_v10 }
 0x3f0   :  { %4600 = vtanh.f32 %v669_v63 }
 0x3f1   :  { %4602 = vtanh.f32 %v670_v19 }
 0x3f4   :  { %v4597_v60 = vpop.eup %4596 }
 0x3f5   :  { %v4599_v13 = vpop.eup %4598  ;;  %v1033_v0 = vmul.f32 0.5, %v4597_v60 }
 0x3f6   :  { %v1034_v2 = vmul.f32 %v4599_v13, %v4948_v10 }
 0x3f7   :  { %v1035_v57 = vadd.f32 0.5, %v1033_v0 }
 0x3f8   :  { %v1036_v26 = vadd.f32 %v1034_v2, %v4965_v40 }
 0x3fa   :  { %v4601_v32 = vpop.eup %4600  ;;  %v1037_v12 = vmul.f32 %v1036_v26, %v1035_v57 }
 0x3fb   :  { %v4603_v50 = vpop.eup %4602  ;;  %v673_v46 = vmul.f32 0.5, %v4601_v32 }
 0x3fc   :  { %1040 = vrot.lane.b32.xlu0 %v1037_v12, %s4804_s21  ;;  %v674_v45 = vmul.f32 %v4603_v50, %v4948_v10 }
 0x3fd   :  { %v675_v58 = vadd.f32 0.5, %v673_v46 }
 0x3fe   :  { %v676_v19 = vadd.f32 %v674_v45, %v4965_v40 }
 0x3ff   :  { %v681_v62 = vmul.f32 %v679_v37, %v675_v58 }
 0x400   :  { %v677_v63 = vmul.f32 %v676_v19, %v675_v58 }
 0x402   :  { %683 = vrot.lane.b32.xlu1 %v677_v63, %s4804_s21 }
 0x409   :  { %v829_v60 = vpop.f32.mrb[8].mxu0 }
 0x40a   :  { %v834_v13 = vadd.f32 %v829_v60, %v5037_v15  ;;  %v831_v0 = vpop.f32.mrb[9].mxu0 }
 0x40b   :  { %v835_v2 = vadd.f32 %v831_v0, %v5040_v16 }
 0x40c   :  { %v836_v32 = vmul.f32 0.5, %v834_v13 }
 0x40d   :  { %v837_v12 = vmul.f32 %v835_v2, %v4948_v10  ;;  %v1038_v2 = vmul.f32 0.0, %v1035_v57 }
 0x40e   :  { %4604 = vtanh.f32 %v836_v32 }
 0x40f   :  { %4606 = vtanh.f32 %v837_v12 }
 0x418   :  { %v4605_v50 = vpop.eup %4604 }
 0x419   :  { %v4607_v6 = vpop.eup %4606  ;;  %v840_v46 = vmul.f32 0.5, %v4605_v50 }
 0x41a   :  { %v841_v45 = vmul.f32 %v4607_v6, %v4948_v10 }
 0x41b   :  { %v842_v37 = vadd.f32 0.5, %v840_v46 }
 0x41c   :  { %v843_v58 = vadd.f32 %v841_v45, %v4965_v40  ;;  %v5682_v45 = vld [vmem:[#allocation15_spill] sm:$0xff] }
 0x41e   :  { %v844_v63 = vmul.f32 %v843_v58, %v842_v37 }
 0x420   :  { %847 = vrot.lane.b32.xlu1 %v844_v63, %s4804_s21 }
 0x46e   :  { %v1041_v13 = vpop.permute.xlu0 %1040 }
 0x46f   :  { %v5154_v12 = vadd.f32 %v1041_v13, %v1038_v2 }
 0x474   :  { %v684_v60 = vpop.permute.xlu1 %683 }
 0x475   :  { %v5151_v15 = vadd.f32 %v684_v60, %v681_v62 }
 0x477   :  { %4608 = vtanh.f32 %v5151_v15 }
 0x478   :  { %4610 = vtanh.f32 %v5154_v12 }
 0x481   :  { %v4609_v0 = vpop.eup %4608 }
 0x482   :  { %v688_v32 = vmul.f32 %v4609_v0, %v676_v19  ;;  %v4611_v57 = vpop.eup %4610  ;;  %v845_v19 = vmul.f32 %v842_v37, %v5077_v61 }
 0x483   :  { %v1045_v46 = vmul.f32 %v4611_v57, %v1036_v26 }
 0x484   :  { %v1047_v50 = vrot.slane %v688_v32, 4 }
 0x486   :  { %3822 = vmatmul.mubr.msk.f32.vlgmr.msra.gmra.mrb[10].mxu0 %vm197_vm2, %v1047_v50 }
 0x487   :  { %4077 = vmatpush1.bf16.msra.mxu0 %v5006_v28  ;;  %1380 = vmatprep.mubr.f32.mxu0 %v5679_v56 }
 0x488   :  { %4079 = vmatprep.subr.bf16.mxu0 %v5008_v30 }
 0x48b   :  { %4081 = vmatpush1.bf16.msra.mxu0 %v5012_v39 }
 0x48c   :  { %4083 = vmatprep.subr.bf16.mxu0 %v5015_v43 }
 0x48f   :  { %4085 = vmatpush1.bf16.msra.mxu0 %v5018_v51 }
 0x490   :  { %4087 = vmatprep.subr.bf16.mxu0 %v5021_v52 }
 0x492   :  { %v848_v62 = vpop.permute.xlu1 %847 }
 0x493   :  { %v5166_v6 = vadd.f32 %v848_v62, %v845_v19  ;;  %4089 = vmatpush1.bf16.msra.mxu0 %v5024_v1 }
 0x494   :  { %4091 = vmatprep.subr.bf16.mxu0 %v5027_v7 }
 0x495   :  { %4612 = vtanh.f32 %v5166_v6 }
 0x496   :  { %3825 = vmatmul.mubr.msk.f32.vlgmr.msra.gmra.mrb[12].mxu0 %vm197_vm2, %v1045_v46  ;;  %v1139_v46 = vrot.slane %v5151_v15, 6  ;;  %v5685_v15 = vld [vmem:[#allocation16_spill] sm:$0xff] }
 0x497   :  { %4093 = vmatpush1.bf16.msra.mxu0 %v5048_v11  ;;  %1451 = vmatprep.mubr.f32.mxu0 %v5679_v56 }
 0x498   :  { %4095 = vmatprep.subr.bf16.mxu0 %v5051_v22 }
 0x49b   :  { %4097 = vmatpush1.bf16.msra.mxu0 %v5053_v33 }
 0x49c   :  { %4099 = vmatprep.subr.bf16.mxu0 %v5057_v49 }
 0x49f   :  { %v4613_v61 = vpop.eup %4612  ;;  %4101 = vmatpush1.bf16.msra.mxu0 %v5059_v18 }
 0x4a0   :  { %v852_v26 = vmul.f32 %v4613_v61, %v843_v58  ;;  %4103 = vmatprep.subr.bf16.mxu0 %v5061_v21 }
 0x4a2   :  { %3823 = vmatmul.mubr.msk.f32.vlgmr.msra.gmra.mrb[6].mxu1 %vm197_vm2, %v852_v26 }
 0x4a3   :  { %4061 = vmatpush1.bf16.msra.mxu1 %v4953_v20  ;;  %4105 = vmatpush1.bf16.msra.mxu0 %v5066_v38 }
 0x4a4   :  { %4063 = vmatprep.subr.bf16.mxu1 %v4956_v25  ;;  %1287 = vmatprep.mubr.f32.mxu1 %v5679_v56 }
 0x4a5   :  { %4123 = vmatprep.subr.bf16.mxu0 %v4899_v31 }
 0x4a6   :  { %3826 = vmatmul.mubr.msk.f32.vlgmr.msra.gmra.mrb[12].mxu0 %vm197_vm2, %v852_v26 }
 0x4a7   :  { %4065 = vmatpush1.bf16.msra.mxu1 %v4958_v29  ;;  %4125 = vmatpush1.bf16.msra.mxu0 %v4901_v35 }
 0x4a8   :  { %4067 = vmatprep.subr.bf16.mxu1 %v4962_v34  ;;  %4127 = vmatprep.subr.bf16.mxu0 %v4903_v36 }
 0x4a9   :  { %1641 = vmatprep.mubr.f32.mxu0 %v5679_v56 }
 0x4ab   :  { %4069 = vmatpush1.bf16.msra.mxu1 %v4967_v44  ;;  %4129 = vmatpush1.bf16.msra.mxu0 %v4907_v41 }
 0x4ac   :  { %4071 = vmatprep.subr.bf16.mxu1 %v4976_v55  ;;  %4131 = vmatprep.subr.bf16.mxu0 %v4910_v42 }
 0x4af   :  { %4073 = vmatpush1.bf16.msra.mxu1 %v4979_v59  ;;  %4133 = vmatpush1.bf16.msra.mxu0 %v4913_v47 }
 0x4b0   :  { %4107 = vmatprep.subr.bf16.mxu1 %v4859_v4  ;;  %4135 = vmatprep.subr.bf16.mxu0 %v4916_v48 }
 0x4b2   :  { %3824 = vmatmul.mubr.msk.f32.vlgmr.msra.gmra.mrb[6].mxu1 %vm197_vm2, %v1047_v50 }
 0x4b3   :  { %4109 = vmatpush1.bf16.msra.mxu1 %v4861_v8  ;;  %1545 = vmatprep.mubr.f32.mxu1 %v5679_v56 }
 0x4b4   :  { %4111 = vmatprep.subr.bf16.mxu1 %v4863_v9  ;;  %4137 = vmatpush1.bf16.msra.mxu0 %v4919_v53 }
 0x4b5   :  { %4139 = vmatprep.subr.bf16.mxu0 %v4922_v54 }
 0x4b7   :  { %4113 = vmatpush1.bf16.msra.mxu1 %v4867_v14 }
 0x4b8   :  { %4115 = vmatprep.subr.bf16.mxu1 %v4870_v17 }
 0x4bb   :  { %4117 = vmatpush1.bf16.msra.mxu1 %v4878_v23 }
 0x4bc   :  { %4119 = vmatprep.subr.bf16.mxu1 %v4882_v24 }
 0x4bf   :  { %4121 = vmatpush1.bf16.msra.mxu1 %v4887_v27 }
 0x4c0   :  { %4155 = vmatprep.subr.bf16.mxu1 %v5682_v45 }
 0x559   :  { %v1116_v37 = vpop.f32.mrb[10].mxu0 }
 0x55a   :  { %v1123_v58 = vrot.slane %v1116_v37, 2  ;;  %v1118_v63 = vpop.f32.mrb[11].mxu0 }
 0x55b   :  { %v1124_v60 = vrot.slane %v1118_v63, 2 }
 0x55c   :  { %v1127_v13 = vadd.f32 %v1123_v58, %v4942_v3 }
 0x55d   :  { %v1128_v0 = vadd.f32 %v1124_v60, %v4945_v5  ;;  %v5683_v5 = vld [vmem:[#allocation18_spill] sm:$0xff] }
 0x55e   :  { %v1129_v2 = vmul.f32 0.5, %v1127_v13  ;;  %v5684_v13 = vld [vmem:[#allocation19_spill] sm:$0xff] }
 0x55f   :  { %v1130_v32 = vmul.f32 %v1128_v0, %v4948_v10 }
 0x560   :  { %4614 = vtanh.f32 %v1129_v2 }
 0x561   :  { %4616 = vtanh.f32 %v1130_v32 }
 0x56a   :  { %v4615_v50 = vpop.eup %4614 }
 0x56b   :  { %v4617_v57 = vpop.eup %4616  ;;  %v1133_v19 = vmul.f32 0.5, %v4615_v50 }
 0x56c   :  { %v1134_v62 = vmul.f32 %v4617_v57, %v4948_v10 }
 0x56d   :  { %v1135_v61 = vadd.f32 0.5, %v1133_v19 }
 0x56e   :  { %v1136_v26 = vadd.f32 %v1134_v62, %v4965_v40 }
 0x56f   :  { %v1141_v37 = vmul.f32 %v1139_v46, %v1135_v61 }
 0x570   :  { %v1137_v63 = vmul.f32 %v1136_v26, %v1135_v61 }
 0x572   :  { %1143 = vrot.lane.b32.xlu0 %v1137_v63, %s4804_s21 }
 0x579   :  { %v1453_v3 = vpop.f32.mrb[12].mxu0 }
 0x57a   :  { %v1458_v58 = vadd.f32 %v1453_v3, %v5683_v5  ;;  %v1455_v60 = vpop.f32.mrb[13].mxu0 }
 0x57b   :  { %v1459_v0 = vadd.f32 %v1455_v60, %v5684_v13 }
 0x57c   :  { %v1460_v2 = vmul.f32 0.5, %v1458_v58 }
 0x57d   :  { %v1461_v32 = vmul.f32 %v1459_v0, %v4948_v10 }
 0x57e   :  { %4618 = vtanh.f32 %v1460_v2 }
 0x57f   :  { %4620 = vtanh.f32 %v1461_v32 }
 0x585   :  { %v1289_v50 = vpop.f32.mrb[6].mxu1 }
 0x586   :  { %v1294_v57 = vadd.f32 %v1289_v50, %v5685_v15  ;;  %v1291_v19 = vpop.f32.mrb[7].mxu1 }
 0x587   :  { %v1295_v62 = vadd.f32 %v1291_v19, %v5040_v16 }
 0x588   :  { %v4619_v46 = vpop.eup %4618  ;;  %v1296_v61 = vmul.f32 0.5, %v1294_v57 }
 0x589   :  { %v4621_v63 = vpop.eup %4620  ;;  %v1464_v45 = vmul.f32 0.5, %v4619_v46  ;;  %v1297_v3 = vmul.f32 %v1295_v62, %v4948_v10 }
 0x58a   :  { %4622 = vtanh.f32 %v1296_v61  ;;  %v1465_v60 = vmul.f32 %v4621_v63, %v4948_v10 }
 0x58b   :  { %v1466_v58 = vadd.f32 0.5, %v1464_v45  ;;  %4624 = vtanh.f32 %v1297_v3 }
 0x58c   :  { %v1467_v0 = vadd.f32 %v1465_v60, %v4965_v40 }
 0x58e   :  { %v1468_v2 = vmul.f32 %v1467_v0, %v1466_v58 }
 0x590   :  { %1471 = vrot.lane.b32.xlu1 %v1468_v2, %s4804_s21 }
 0x594   :  { %v4623_v32 = vpop.eup %4622 }
 0x595   :  { %v4625_v50 = vpop.eup %4624  ;;  %v1300_v15 = vmul.f32 0.5, %v4623_v32 }
 0x596   :  { %v1301_v19 = vmul.f32 %v4625_v50, %v4948_v10 }
 0x597   :  { %v1302_v57 = vadd.f32 0.5, %v1300_v15 }
 0x598   :  { %v1303_v46 = vadd.f32 %v1301_v19, %v4965_v40  ;;  %v5688_v19 = vld [vmem:[#allocation13_spill] sm:$0xff] }
 0x599   :  { %v1305_v15 = vmul.f32 %v1302_v57, %v5166_v6 }
 0x59a   :  { %v1304_v16 = vmul.f32 %v1303_v46, %v1302_v57 }
 0x59c   :  { %1307 = vrot.lane.b32.xlu0 %v1304_v16, %s4804_s21  ;;  %v1469_v16 = vmul.f32 %v1466_v58, %v5154_v12  ;;  %v5686_v58 = vld [vmem:[#allocation15_spill] sm:$0xff] }
 0x5e4   :  { %v1144_v62 = vpop.permute.xlu0 %1143 }
 0x5e5   :  { %v5230_v61 = vadd.f32 %v1144_v62, %v1141_v37  ;;  %v5691_v62 = vld [vmem:[#allocation14_spill] sm:$0xff] }
 0x5e7   :  { %4626 = vtanh.f32 %v5230_v61 }
 0x5f1   :  { %v4627_v45 = vpop.eup %4626 }
 0x5f2   :  { %v1148_v63 = vmul.f32 %v4627_v45, %v1136_v26 }
 0x5f4   :  { %v1478_v3 = vrot.slane %v1148_v63, 6 }
 0x5f6   :  { %3827 = vmatmul.mubr.msk.f32.vlgmr.msra.gmra.mrb[8].mxu1 %vm197_vm2, %v1478_v3 }
 0x5f7   :  { %4157 = vmatpush1.bf16.msra.mxu1 %v5006_v28  ;;  %1805 = vmatprep.mubr.f32.mxu1 %v5679_v56 }
 0x5f8   :  { %4159 = vmatprep.subr.bf16.mxu1 %v5008_v30 }
 0x5fb   :  { %4161 = vmatpush1.bf16.msra.mxu1 %v5012_v39 }
 0x5fc   :  { %4163 = vmatprep.subr.bf16.mxu1 %v5015_v43 }
 0x5ff   :  { %4165 = vmatpush1.bf16.msra.mxu1 %v5018_v51 }
 0x600   :  { %4167 = vmatprep.subr.bf16.mxu1 %v5021_v52 }
 0x602   :  { %v1472_v26 = vpop.permute.xlu1 %1471 }
 0x603   :  { %v5242_v37 = vadd.f32 %v1472_v26, %v1469_v16  ;;  %4169 = vmatpush1.bf16.msra.mxu1 %v5024_v1 }
 0x604   :  { %4171 = vmatprep.subr.bf16.mxu1 %v5027_v7 }
 0x605   :  { %4628 = vtanh.f32 %v5242_v37 }
 0x60e   :  { %v1308_v60 = vpop.permute.xlu0 %1307 }
 0x60f   :  { %v4629_v2 = vpop.eup %4628  ;;  %v5248_v32 = vadd.f32 %v1308_v60, %v1305_v15 }
 0x610   :  { %v1476_v50 = vmul.f32 %v4629_v2, %v1467_v0  ;;  %v5687_v0 = vld [vmem:[#allocation11_spill] sm:$0xff] }
 0x611   :  { %4630 = vtanh.f32 %v5248_v32  ;;  %v5293_v57 = vadd.f32 %v5688_v19, %v5687_v0  ;;  %v1564_v0 = vrot.slane %v5230_v61, 6  ;;  %v5693_v61 = vld [vmem:[#allocation16_spill] sm:$0xff] }
 0x612   :  { %3830 = vmatmul.mubr.msk.f32.vlgmr.msra.gmra.mrb[10].mxu1 %vm197_vm2, %v1476_v50 }
 0x613   :  { %4173 = vmatpush1.bf16.msra.mxu1 %v5048_v11  ;;  %1876 = vmatprep.mubr.f32.mxu1 %v5679_v56  ;;  %5689 = vst [vmem:[#allocation18_spill] sm:$0xff] %v5293_v57 }
 0x614   :  { %4175 = vmatprep.subr.bf16.mxu1 %v5051_v22 }
 0x617   :  { %4177 = vmatpush1.bf16.msra.mxu1 %v5053_v33 }
 0x618   :  { %4179 = vmatprep.subr.bf16.mxu1 %v5057_v49 }
 0x61b   :  { %v4631_v12 = vpop.eup %4630  ;;  %4181 = vmatpush1.bf16.msra.mxu1 %v5059_v18 }
 0x61c   :  { %v1312_v6 = vmul.f32 %v4631_v12, %v1303_v46  ;;  %4183 = vmatprep.subr.bf16.mxu1 %v5061_v21  ;;  %v5690_v46 = vld [vmem:[#allocation12_spill] sm:$0xff] }
 0x61d   :  { %v5297_v45 = vadd.f32 %v5691_v62, %v5690_v46 }
 0x61e   :  { %3828 = vmatmul.mubr.msk.f32.vlgmr.msra.gmra.mrb[14].mxu0 %vm197_vm2, %v1312_v6 }
 0x61f   :  { %4141 = vmatpush1.bf16.msra.mxu0 %v4953_v20  ;;  %4185 = vmatpush1.bf16.msra.mxu1 %v5066_v38  ;;  %5692 = vst [vmem:[#allocation19_spill] sm:$0xff] %v5297_v45 }
 0x620   :  { %4143 = vmatprep.subr.bf16.mxu0 %v4956_v25  ;;  %1712 = vmatprep.mubr.f32.mxu0 %v5679_v56 }
 0x621   :  { %4203 = vmatprep.subr.bf16.mxu1 %v4899_v31 }
 0x622   :  { %3831 = vmatmul.mubr.msk.f32.vlgmr.msra.gmra.mrb[10].mxu1 %vm197_vm2, %v1312_v6 }
 0x623   :  { %4145 = vmatpush1.bf16.msra.mxu0 %v4958_v29  ;;  %4205 = vmatpush1.bf16.msra.mxu1 %v4901_v35 }
 0x624   :  { %4147 = vmatprep.subr.bf16.mxu0 %v4962_v34  ;;  %4207 = vmatprep.subr.bf16.mxu1 %v4903_v36 }
 0x625   :  { %2071 = vmatprep.mubr.f32.mxu1 %v5679_v56 }
 0x627   :  { %4149 = vmatpush1.bf16.msra.mxu0 %v4967_v44  ;;  %4209 = vmatpush1.bf16.msra.mxu1 %v4907_v41 }
 0x628   :  { %4151 = vmatprep.subr.bf16.mxu0 %v4976_v55  ;;  %4211 = vmatprep.subr.bf16.mxu1 %v4910_v42 }
 0x62b   :  { %4153 = vmatpush1.bf16.msra.mxu0 %v4979_v59  ;;  %4213 = vmatpush1.bf16.msra.mxu1 %v4913_v47 }
 0x62c   :  { %4187 = vmatprep.subr.bf16.mxu0 %v4859_v4  ;;  %4215 = vmatprep.subr.bf16.mxu1 %v4916_v48 }
 0x62e   :  { %3829 = vmatmul.mubr.msk.f32.vlgmr.msra.gmra.mrb[14].mxu0 %vm197_vm2, %v1478_v3 }
 0x62f   :  { %4189 = vmatpush1.bf16.msra.mxu0 %v4861_v8  ;;  %1969 = vmatprep.mubr.f32.mxu0 %v5679_v56 }
 0x630   :  { %4191 = vmatprep.subr.bf16.mxu0 %v4863_v9  ;;  %4217 = vmatpush1.bf16.msra.mxu1 %v4919_v53 }
 0x631   :  { %4219 = vmatprep.subr.bf16.mxu1 %v4922_v54 }
 0x633   :  { %4193 = vmatpush1.bf16.msra.mxu0 %v4867_v14 }
 0x634   :  { %4195 = vmatprep.subr.bf16.mxu0 %v4870_v17 }
 0x637   :  { %4197 = vmatpush1.bf16.msra.mxu0 %v4878_v23 }
 0x638   :  { %4199 = vmatprep.subr.bf16.mxu0 %v4882_v24 }
 0x63b   :  { %4201 = vmatpush1.bf16.msra.mxu0 %v4887_v27 }
 0x63c   :  { %4235 = vmatprep.subr.bf16.mxu0 %v5686_v58 }
 0x6c9   :  { %v1547_v63 = vpop.f32.mrb[8].mxu1 }
 0x6ca   :  { %v1552_v3 = vadd.f32 %v1547_v63, %v5293_v57  ;;  %v1549_v16 = vpop.f32.mrb[9].mxu1 }
 0x6cb   :  { %v1553_v26 = vadd.f32 %v1549_v16, %v5297_v45 }
 0x6cc   :  { %v1554_v15 = vmul.f32 0.5, %v1552_v3 }
 0x6cd   :  { %v1555_v60 = vmul.f32 %v1553_v26, %v4948_v10 }
 0x6ce   :  { %4632 = vtanh.f32 %v1554_v15 }
 0x6cf   :  { %4634 = vtanh.f32 %v1555_v60 }
 0x6d8   :  { %v4633_v2 = vpop.eup %4632 }
 0x6d9   :  { %v4635_v50 = vpop.eup %4634  ;;  %v1558_v12 = vmul.f32 0.5, %v4633_v2 }
 0x6da   :  { %v1559_v6 = vmul.f32 %v4635_v50, %v4948_v10 }
 0x6db   :  { %v1560_v19 = vadd.f32 0.5, %v1558_v12 }
 0x6dc   :  { %v1561_v46 = vadd.f32 %v1559_v6, %v4965_v40  ;;  %v5694_v6 = vld [vmem:[#allocation17_spill] sm:$0xff] }
 0x6dd   :  { %v1566_v62 = vmul.f32 %v1564_v0, %v1560_v19 }
 0x6de   :  { %v1562_v63 = vmul.f32 %v1561_v46, %v1560_v19 }
 0x6e0   :  { %1568 = vrot.lane.b32.xlu1 %v1562_v63, %s4804_s21 }
 0x6f5   :  { %v1878_v16 = vpop.f32.mrb[10].mxu1 }
 0x6f6   :  { %v1883_v3 = vadd.f32 %v1878_v16, %v5683_v5  ;;  %v1880_v26 = vpop.f32.mrb[11].mxu1 }
 0x6f7   :  { %v1884_v15 = vadd.f32 %v1880_v26, %v5684_v13 }
 0x6f8   :  { %v1885_v60 = vmul.f32 0.5, %v1883_v3 }
 0x6f9   :  { %v1886_v2 = vmul.f32 %v1884_v15, %v4948_v10 }
 0x6fa   :  { %4636 = vtanh.f32 %v1885_v60 }
 0x6fb   :  { %4638 = vtanh.f32 %v1886_v2 }
 0x701   :  { %v1714_v50 = vpop.f32.mrb[14].mxu0 }
 0x702   :  { %v1719_v12 = vadd.f32 %v1714_v50, %v5693_v61  ;;  %v1716_v45 = vpop.f32.mrb[15].mxu0 }
 0x703   :  { %v1720_v0 = vadd.f32 %v1716_v45, %v5694_v6 }
 0x704   :  { %v4637_v19 = vpop.eup %4636  ;;  %v1721_v57 = vmul.f32 0.5, %v1719_v12 }
 0x705   :  { %v4639_v63 = vpop.eup %4638  ;;  %v1889_v58 = vmul.f32 0.5, %v4637_v19  ;;  %v1722_v16 = vmul.f32 %v1720_v0, %v4948_v10 }
 0x706   :  { %4640 = vtanh.f32 %v1721_v57  ;;  %v1890_v26 = vmul.f32 %v4639_v63, %v4948_v10 }
 0x707   :  { %v1891_v3 = vadd.f32 0.5, %v1889_v58  ;;  %4642 = vtanh.f32 %v1722_v16 }
 0x708   :  { %v1892_v15 = vadd.f32 %v1890_v26, %v4965_v40 }
 0x70a   :  { %v1893_v60 = vmul.f32 %v1892_v15, %v1891_v3 }
 0x70c   :  { %1896 = vrot.lane.b32.xlu0 %v1893_v60, %s4804_s21 }
 0x710   :  { %v4641_v2 = vpop.eup %4640 }
 0x711   :  { %v4643_v50 = vpop.eup %4642  ;;  %v1725_v61 = vmul.f32 0.5, %v4641_v2 }
 0x712   :  { %v1726_v45 = vmul.f32 %v4643_v50, %v4948_v10 }
 0x713   :  { %v1727_v12 = vadd.f32 0.5, %v1725_v61 }
 0x714   :  { %v1728_v19 = vadd.f32 %v1726_v45, %v4965_v40 }
 0x716   :  { %v1729_v6 = vmul.f32 %v1728_v19, %v1727_v12 }
 0x718   :  { %1732 = vrot.lane.b32.xlu1 %v1729_v6, %s4804_s21  ;;  %v1730_v6 = vmul.f32 %v1727_v12, %v5248_v32 }
 0x752   :  { %v1569_v57 = vpop.permute.xlu1 %1568 }
 0x753   :  { %v5318_v0 = vadd.f32 %v1569_v57, %v1566_v62 }
 0x755   :  { %4644 = vtanh.f32 %v5318_v0 }
 0x75f   :  { %v4645_v58 = vpop.eup %4644 }
 0x760   :  { %v1573_v63 = vmul.f32 %v4645_v58, %v1561_v46  ;;  %v1894_v46 = vmul.f32 %v1891_v3, %v5242_v37  ;;  %v5695_v3 = vld [vmem:[#allocation15_spill] sm:$0xff] }
 0x761   :  { %v5697_v58 = vld [vmem:[#allocation19_spill] sm:$0xff] }
 0x762   :  { %3832 = vmatmul.mubr.msk.f32.vlgmr.msra.gmra.mrb[16].mxu0 %vm197_vm2, %v1573_v63 }
 0x763   :  { %4237 = vmatpush1.bf16.msra.mxu0 %v5006_v28  ;;  %2235 = vmatprep.mubr.f32.mxu0 %v5679_v56 }
 0x764   :  { %4239 = vmatprep.subr.bf16.mxu0 %v5008_v30 }
 0x767   :  { %4241 = vmatpush1.bf16.msra.mxu0 %v5012_v39 }
 0x768   :  { %4243 = vmatprep.subr.bf16.mxu0 %v5015_v43 }
 0x76b   :  { %4245 = vmatpush1.bf16.msra.mxu0 %v5018_v51 }
 0x76c   :  { %4247 = vmatprep.subr.bf16.mxu0 %v5021_v52 }
 0x76f   :  { %4249 = vmatpush1.bf16.msra.mxu0 %v5024_v1 }
 0x770   :  { %4251 = vmatprep.subr.bf16.mxu0 %v5027_v7 }
 0x77e   :  { %v1897_v62 = vpop.permute.xlu0 %1896 }
 0x77f   :  { %v5332_v61 = vadd.f32 %v1897_v62, %v1894_v46 }
 0x781   :  { %4646 = vtanh.f32 %v5332_v61 }
 0x78a   :  { %v1733_v16 = vpop.permute.xlu1 %1732 }
 0x78b   :  { %v4647_v26 = vpop.eup %4646  ;;  %v5336_v60 = vadd.f32 %v1733_v16, %v1730_v6 }
 0x78c   :  { %v1901_v2 = vmul.f32 %v4647_v26, %v1892_v15 }
 0x78d   :  { %4648 = vtanh.f32 %v5336_v60 }
 0x78e   :  { %3835 = vmatmul.mubr.msk.f32.vlgmr.msra.gmra.mrb[18].mxu0 %vm197_vm2, %v1901_v2 }
 0x78f   :  { %4253 = vmatpush1.bf16.msra.mxu0 %v5048_v11  ;;  %2306 = vmatprep.mubr.f32.mxu0 %v5679_v56 }
 0x790   :  { %4255 = vmatprep.subr.bf16.mxu0 %v5051_v22 }
 0x793   :  { %4257 = vmatpush1.bf16.msra.mxu0 %v5053_v33 }
 0x794   :  { %4259 = vmatprep.subr.bf16.mxu0 %v5057_v49 }
 0x797   :  { %v4649_v37 = vpop.eup %4648  ;;  %4261 = vmatpush1.bf16.msra.mxu0 %v5059_v18 }
 0x798   :  { %v1737_v32 = vmul.f32 %v4649_v37, %v1728_v19  ;;  %4263 = vmatprep.subr.bf16.mxu0 %v5061_v21  ;;  %v5696_v19 = vld [vmem:[#allocation18_spill] sm:$0xff]  ;;  %v1994_v37 = vrot.slane %v5318_v0, 6  ;;  %v5698_v0 = vld [vmem:[#allocation16_spill] sm:$0xff] }
 0x79a   :  { %3833 = vmatmul.mubr.msk.f32.vlgmr.msra.gmra.mrb[12].mxu1 %vm197_vm2, %v1737_v32 }
 0x79b   :  { %4221 = vmatpush1.bf16.msra.mxu1 %v4953_v20  ;;  %4265 = vmatpush1.bf16.msra.mxu0 %v5066_v38 }
 0x79c   :  { %4223 = vmatprep.subr.bf16.mxu1 %v4956_v25  ;;  %2142 = vmatprep.mubr.f32.mxu1 %v5679_v56 }
 0x79d   :  { %4283 = vmatprep.subr.bf16.mxu0 %v4899_v31 }
 0x79e   :  { %3836 = vmatmul.mubr.msk.f32.vlgmr.msra.gmra.mrb[18].mxu0 %vm197_vm2, %v1737_v32 }
 0x79f   :  { %4225 = vmatpush1.bf16.msra.mxu1 %v4958_v29  ;;  %4285 = vmatpush1.bf16.msra.mxu0 %v4901_v35 }
 0x7a0   :  { %4227 = vmatprep.subr.bf16.mxu1 %v4962_v34  ;;  %4287 = vmatprep.subr.bf16.mxu0 %v4903_v36 }
 0x7a1   :  { %2502 = vmatprep.mubr.f32.mxu0 %v5679_v56 }
 0x7a3   :  { %4229 = vmatpush1.bf16.msra.mxu1 %v4967_v44  ;;  %4289 = vmatpush1.bf16.msra.mxu0 %v4907_v41 }
 0x7a4   :  { %4231 = vmatprep.subr.bf16.mxu1 %v4976_v55  ;;  %4291 = vmatprep.subr.bf16.mxu0 %v4910_v42 }
 0x7a7   :  { %4233 = vmatpush1.bf16.msra.mxu1 %v4979_v59  ;;  %4293 = vmatpush1.bf16.msra.mxu0 %v4913_v47 }
 0x7a8   :  { %4267 = vmatprep.subr.bf16.mxu1 %v4859_v4  ;;  %4295 = vmatprep.subr.bf16.mxu0 %v4916_v48 }
 0x7aa   :  { %3834 = vmatmul.mubr.msk.f32.vlgmr.msra.gmra.mrb[12].mxu1 %vm197_vm2, %v1573_v63 }
 0x7ab   :  { %4269 = vmatpush1.bf16.msra.mxu1 %v4861_v8  ;;  %2400 = vmatprep.mubr.f32.mxu1 %v5679_v56 }
 0x7ac   :  { %4271 = vmatprep.subr.bf16.mxu1 %v4863_v9  ;;  %4297 = vmatpush1.bf16.msra.mxu0 %v4919_v53 }
 0x7ad   :  { %4299 = vmatprep.subr.bf16.mxu0 %v4922_v54 }
 0x7af   :  { %4273 = vmatpush1.bf16.msra.mxu1 %v4867_v14 }
 0x7b0   :  { %4275 = vmatprep.subr.bf16.mxu1 %v4870_v17 }
 0x7b3   :  { %4277 = vmatpush1.bf16.msra.mxu1 %v4878_v23 }
 0x7b4   :  { %4279 = vmatprep.subr.bf16.mxu1 %v4882_v24 }
 0x7b7   :  { %4281 = vmatpush1.bf16.msra.mxu1 %v4887_v27 }
 0x7b8   :  { %4315 = vmatprep.subr.bf16.mxu1 %v5695_v3 }
 0x835   :  { %v1971_v15 = vpop.f32.mrb[16].mxu0 }
 0x836   :  { %v1978_v50 = vrot.slane %v1971_v15, 6  ;;  %v1973_v45 = vpop.f32.mrb[17].mxu0 }
 0x837   :  { %v1979_v12 = vrot.slane %v1973_v45, 6 }
 0x838   :  { %v1982_v57 = vadd.f32 %v1978_v50, %v5696_v19 }
 0x839   :  { %v1983_v63 = vadd.f32 %v1979_v12, %v5697_v58 }
 0x83a   :  { %v1984_v46 = vmul.f32 0.5, %v1982_v57 }
 0x83b   :  { %v1985_v62 = vmul.f32 %v1983_v63, %v4948_v10 }
 0x83c   :  { %4650 = vtanh.f32 %v1984_v46 }
 0x83d   :  { %4652 = vtanh.f32 %v1985_v62 }
 0x846   :  { %v4651_v6 = vpop.eup %4650 }
 0x847   :  { %v4653_v16 = vpop.eup %4652  ;;  %v1988_v26 = vmul.f32 0.5, %v4651_v6 }
 0x848   :  { %v1989_v2 = vmul.f32 %v4653_v16, %v4948_v10 }
 0x849   :  { %v1990_v32 = vadd.f32 0.5, %v1988_v26 }
 0x84a   :  { %v1991_v15 = vadd.f32 %v1989_v2, %v4965_v40  ;;  %v5699_v2 = vld [vmem:[#allocation17_spill] sm:$0xff] }
 0x84b   :  { %v1996_v45 = vmul.f32 %v1994_v37, %v1990_v32 }
 0x84c   :  { %v1992_v3 = vmul.f32 %v1991_v15, %v1990_v32 }
 0x84e   :  { %1998 = vrot.lane.b32.xlu0 %v1992_v3, %s4804_s21 }
 0x871   :  { %v2308_v50 = vpop.f32.mrb[18].mxu0 }
 0x872   :  { %v2313_v12 = vadd.f32 %v2308_v50, %v5683_v5  ;;  %v2310_v57 = vpop.f32.mrb[19].mxu0 }
 0x873   :  { %v2314_v63 = vadd.f32 %v2310_v57, %v5684_v13 }
 0x874   :  { %v2315_v46 = vmul.f32 0.5, %v2313_v12 }
 0x875   :  { %v2316_v62 = vmul.f32 %v2314_v63, %v4948_v10 }
 0x876   :  { %4654 = vtanh.f32 %v2315_v46 }
 0x877   :  { %4656 = vtanh.f32 %v2316_v62 }
 0x87d   :  { %v2144_v6 = vpop.f32.mrb[12].mxu1 }
 0x87e   :  { %v2149_v16 = vadd.f32 %v2144_v6, %v5698_v0  ;;  %v2146_v26 = vpop.f32.mrb[13].mxu1 }
 0x87f   :  { %v2150_v37 = vadd.f32 %v2146_v26, %v5699_v2 }
 0x880   :  { %v4655_v32 = vpop.eup %4654  ;;  %v2151_v58 = vmul.f32 0.5, %v2149_v16 }
 0x881   :  { %v4657_v3 = vpop.eup %4656  ;;  %v2319_v19 = vmul.f32 0.5, %v4655_v32  ;;  %v2152_v50 = vmul.f32 %v2150_v37, %v4948_v10 }
 0x882   :  { %4658 = vtanh.f32 %v2151_v58  ;;  %v2320_v57 = vmul.f32 %v4657_v3, %v4948_v10 }
 0x883   :  { %v2321_v12 = vadd.f32 0.5, %v2319_v19  ;;  %4660 = vtanh.f32 %v2152_v50 }
 0x884   :  { %v2322_v63 = vadd.f32 %v2320_v57, %v4965_v40 }
 0x886   :  { %v2323_v46 = vmul.f32 %v2322_v63, %v2321_v12 }
 0x888   :  { %2326 = vrot.lane.b32.xlu1 %v2323_v46, %s4804_s21 }
 0x88c   :  { %v4659_v62 = vpop.eup %4658 }
 0x88d   :  { %v4661_v6 = vpop.eup %4660  ;;  %v2155_v0 = vmul.f32 0.5, %v4659_v62 }
 0x88e   :  { %v2156_v26 = vmul.f32 %v4661_v6, %v4948_v10 }
 0x88f   :  { %v2157_v16 = vadd.f32 0.5, %v2155_v0 }
 0x890   :  { %v2158_v32 = vadd.f32 %v2156_v26, %v4965_v40  ;;  %v5701_v26 = vld [vmem:[#allocation18_spill] sm:$0xff] }
 0x892   :  { %v2159_v2 = vmul.f32 %v2158_v32, %v2157_v16 }
 0x894   :  { %2162 = vrot.lane.b32.xlu0 %v2159_v2, %s4804_s21  ;;  %v2160_v2 = vmul.f32 %v2157_v16, %v5336_v60 }
 0x8c0   :  { %v1999_v58 = vpop.permute.xlu0 %1998 }
 0x8c1   :  { %v5398_v37 = vadd.f32 %v1999_v58, %v1996_v45 }
 0x8c3   :  { %4662 = vtanh.f32 %v5398_v37 }
 0x8cd   :  { %v4663_v19 = vpop.eup %4662 }
 0x8ce   :  { %v2003_v3 = vmul.f32 %v4663_v19, %v1991_v15  ;;  %v2324_v15 = vmul.f32 %v2321_v12, %v5332_v61 }
 0x8d0   :  { %v2333_v50 = vrot.slane %v2003_v3, 2  ;;  %v2425_v3 = vrot.slane %v5398_v37, 6  ;;  %v5703_v37 = vld [vmem:[#allocation16_spill] sm:$0xff] }
 0x8d2   :  { %3837 = vmatmul.mubr.msk.f32.vlgmr.msra.gmra.mrb[14].mxu1 %vm197_vm2, %v2333_v50 }
 0x8d3   :  { %4317 = vmatpush1.bf16.msra.mxu1 %v5006_v28  ;;  %2666 = vmatprep.mubr.f32.mxu1 %v5679_v56 }
 0x8d4   :  { %4319 = vmatprep.subr.bf16.mxu1 %v5008_v30 }
 0x8d7   :  { %4321 = vmatpush1.bf16.msra.mxu1 %v5012_v39 }
 0x8d8   :  { %4323 = vmatprep.subr.bf16.mxu1 %v5015_v43 }
 0x8db   :  { %4325 = vmatpush1.bf16.msra.mxu1 %v5018_v51 }
 0x8dc   :  { %4327 = vmatprep.subr.bf16.mxu1 %v5021_v52 }
 0x8df   :  { %4329 = vmatpush1.bf16.msra.mxu1 %v5024_v1 }
 0x8e0   :  { %4331 = vmatprep.subr.bf16.mxu1 %v5027_v7 }
 0x8fa   :  { %v2327_v45 = vpop.permute.xlu1 %2326 }
 0x8fb   :  { %v5412_v0 = vadd.f32 %v2327_v45, %v2324_v15 }
 0x8fd   :  { %4664 = vtanh.f32 %v5412_v0 }
 0x906   :  { %v2163_v57 = vpop.permute.xlu0 %2162 }
 0x907   :  { %v4665_v46 = vpop.eup %4664  ;;  %v5416_v62 = vadd.f32 %v2163_v57, %v2160_v2 }
 0x908   :  { %v2331_v6 = vmul.f32 %v4665_v46, %v2322_v63 }
 0x909   :  { %4666 = vtanh.f32 %v5416_v62 }
 0x90a   :  { %3840 = vmatmul.mubr.msk.f32.vlgmr.msra.gmra.mrb[16].mxu1 %vm197_vm2, %v2331_v6 }
 0x90b   :  { %4333 = vmatpush1.bf16.msra.mxu1 %v5048_v11  ;;  %2737 = vmatprep.mubr.f32.mxu1 %v5679_v56 }
 0x90c   :  { %4335 = vmatprep.subr.bf16.mxu1 %v5051_v22 }
 0x90f   :  { %4337 = vmatpush1.bf16.msra.mxu1 %v5053_v33 }
 0x910   :  { %4339 = vmatprep.subr.bf16.mxu1 %v5057_v49 }
 0x913   :  { %v4667_v61 = vpop.eup %4666  ;;  %4341 = vmatpush1.bf16.msra.mxu1 %v5059_v18 }
 0x914   :  { %v2167_v60 = vmul.f32 %v4667_v61, %v2158_v32  ;;  %4343 = vmatprep.subr.bf16.mxu1 %v5061_v21  ;;  %v5702_v32 = vld [vmem:[#allocation19_spill] sm:$0xff] }
 0x916   :  { %3838 = vmatmul.mubr.msk.f32.vlgmr.msra.gmra.mrb[20].mxu0 %vm197_vm2, %v2167_v60 }
 0x917   :  { %4301 = vmatpush1.bf16.msra.mxu0 %v4953_v20  ;;  %4345 = vmatpush1.bf16.msra.mxu1 %v5066_v38 }
 0x918   :  { %4303 = vmatprep.subr.bf16.mxu0 %v4956_v25  ;;  %2573 = vmatprep.mubr.f32.mxu0 %v5679_v56 }
 0x919   :  { %4363 = vmatprep.subr.bf16.mxu1 %v4899_v31 }
 0x91a   :  { %3841 = vmatmul.mubr.msk.f32.vlgmr.msra.gmra.mrb[16].mxu1 %vm197_vm2, %v2167_v60 }
 0x91b   :  { %4305 = vmatpush1.bf16.msra.mxu0 %v4958_v29  ;;  %4365 = vmatpush1.bf16.msra.mxu1 %v4901_v35 }
 0x91c   :  { %4307 = vmatprep.subr.bf16.mxu0 %v4962_v34  ;;  %4367 = vmatprep.subr.bf16.mxu1 %v4903_v36 }
 0x91d   :  { %2933 = vmatprep.mubr.f32.mxu1 %v5679_v56 }
 0x91f   :  { %4309 = vmatpush1.bf16.msra.mxu0 %v4967_v44  ;;  %4369 = vmatpush1.bf16.msra.mxu1 %v4907_v41 }
 0x920   :  { %4311 = vmatprep.subr.bf16.mxu0 %v4976_v55  ;;  %4371 = vmatprep.subr.bf16.mxu1 %v4910_v42 }
 0x923   :  { %4313 = vmatpush1.bf16.msra.mxu0 %v4979_v59  ;;  %4373 = vmatpush1.bf16.msra.mxu1 %v4913_v47 }
 0x924   :  { %4347 = vmatprep.subr.bf16.mxu0 %v4859_v4  ;;  %4375 = vmatprep.subr.bf16.mxu1 %v4916_v48  ;;  %v5700_v4 = vld [vmem:[#allocation15_spill] sm:$0xff] }
 0x926   :  { %3839 = vmatmul.mubr.msk.f32.vlgmr.msra.gmra.mrb[20].mxu0 %vm197_vm2, %v2333_v50 }
 0x927   :  { %4349 = vmatpush1.bf16.msra.mxu0 %v4861_v8  ;;  %2831 = vmatprep.mubr.f32.mxu0 %v5679_v56 }
 0x928   :  { %4351 = vmatprep.subr.bf16.mxu0 %v4863_v9  ;;  %4377 = vmatpush1.bf16.msra.mxu1 %v4919_v53 }
 0x929   :  { %4379 = vmatprep.subr.bf16.mxu1 %v4922_v54 }
 0x92b   :  { %4353 = vmatpush1.bf16.msra.mxu0 %v4867_v14 }
 0x92c   :  { %4355 = vmatprep.subr.bf16.mxu0 %v4870_v17 }
 0x92f   :  { %4357 = vmatpush1.bf16.msra.mxu0 %v4878_v23 }
 0x930   :  { %4359 = vmatprep.subr.bf16.mxu0 %v4882_v24 }
 0x933   :  { %4361 = vmatpush1.bf16.msra.mxu0 %v4887_v27 }
 0x934   :  { %4395 = vmatprep.subr.bf16.mxu0 %v5700_v4 }
 0x9a5   :  { %v2402_v8 = vpop.f32.mrb[14].mxu1 }
 0x9a6   :  { %v2409_v12 = vrot.slane %v2402_v8, 4  ;;  %v2404_v63 = vpop.f32.mrb[15].mxu1 }
 0x9a7   :  { %v2410_v9 = vrot.slane %v2404_v63, 4 }
 0x9a8   :  { %v2413_v16 = vadd.f32 %v2409_v12, %v5701_v26 }
 0x9a9   :  { %v2414_v58 = vadd.f32 %v2410_v9, %v5702_v32 }
 0x9aa   :  { %v2415_v19 = vmul.f32 0.5, %v2413_v16  ;;  %v5704_v16 = vld [vmem:[#allocation17_spill] sm:$0xff] }
 0x9ab   :  { %v2416_v14 = vmul.f32 %v2414_v58, %v4948_v10 }
 0x9ac   :  { %4668 = vtanh.f32 %v2415_v19 }
 0x9ad   :  { %4670 = vtanh.f32 %v2416_v14 }
 0x9b6   :  { %v4669_v17 = vpop.eup %4668 }
 0x9b7   :  { %v4671_v23 = vpop.eup %4670  ;;  %v2419_v24 = vmul.f32 0.5, %v4669_v17 }
 0x9b8   :  { %v2420_v27 = vmul.f32 %v4671_v23, %v4948_v10 }
 0x9b9   :  { %v2421_v50 = vadd.f32 0.5, %v2419_v24 }
 0x9ba   :  { %v2422_v15 = vadd.f32 %v2420_v27, %v4965_v40 }
 0x9bb   :  { %v2427_v45 = vmul.f32 %v2425_v3, %v2421_v50 }
 0x9bc   :  { %v2423_v2 = vmul.f32 %v2422_v15, %v2421_v50 }
 0x9be   :  { %2429 = vrot.lane.b32.xlu1 %v2423_v2, %s4804_s21 }
 0x9ed   :  { %v2739_v57 = vpop.f32.mrb[16].mxu1 }
 0x9ee   :  { %v2744_v46 = vadd.f32 %v2739_v57, %v5683_v5  ;;  %v2741_v6 = vpop.f32.mrb[17].mxu1 }
 0x9ef   :  { %v2745_v61 = vadd.f32 %v2741_v6, %v5684_v13 }
 0x9f0   :  { %v2746_v60 = vmul.f32 0.5, %v2744_v46 }
 0x9f1   :  { %v2747_v8 = vmul.f32 %v2745_v61, %v4948_v10 }
 0x9f2   :  { %4672 = vtanh.f32 %v2746_v60 }
 0x9f3   :  { %4674 = vtanh.f32 %v2747_v8 }
 0x9f9   :  { %v2575_v12 = vpop.f32.mrb[20].mxu0 }
 0x9fa   :  { %v2580_v63 = vadd.f32 %v2575_v12, %v5703_v37  ;;  %v2577_v9 = vpop.f32.mrb[21].mxu0 }
 0x9fb   :  { %v2581_v58 = vadd.f32 %v2577_v9, %v5704_v16 }
 0x9fc   :  { %v4673_v19 = vpop.eup %4672  ;;  %v2582_v14 = vmul.f32 0.5, %v2580_v63 }
 0x9fd   :  { %v4675_v17 = vpop.eup %4674  ;;  %v2750_v23 = vmul.f32 0.5, %v4673_v19  ;;  %v2583_v24 = vmul.f32 %v2581_v58, %v4948_v10 }
 0x9fe   :  { %4676 = vtanh.f32 %v2582_v14  ;;  %v2751_v27 = vmul.f32 %v4675_v17, %v4948_v10 }
 0x9ff   :  { %v2752_v3 = vadd.f32 0.5, %v2750_v23  ;;  %4678 = vtanh.f32 %v2583_v24 }
 0xa00   :  { %v2753_v50 = vadd.f32 %v2751_v27, %v4965_v40 }
 0xa02   :  { %v2754_v2 = vmul.f32 %v2753_v50, %v2752_v3 }
 0xa04   :  { %2757 = vrot.lane.b32.xlu0 %v2754_v2, %s4804_s21 }
 0xa08   :  { %v4677_v57 = vpop.eup %4676 }
 0xa09   :  { %v4679_v46 = vpop.eup %4678  ;;  %v2586_v6 = vmul.f32 0.5, %v4677_v57 }
 0xa0a   :  { %v2587_v61 = vmul.f32 %v4679_v46, %v4948_v10 }
 0xa0b   :  { %v2588_v60 = vadd.f32 0.5, %v2586_v6 }
 0xa0c   :  { %v2589_v8 = vadd.f32 %v2587_v61, %v4965_v40 }
 0xa0d   :  { %v2591_v23 = vmul.f32 %v2588_v60, %v5416_v62 }
 0xa0e   :  { %v2590_v12 = vmul.f32 %v2589_v8, %v2588_v60 }
 0xa10   :  { %2593 = vrot.lane.b32.xlu1 %v2590_v12, %s4804_s21 }
 0xa30   :  { %v2430_v63 = vpop.permute.xlu1 %2429 }
 0xa31   :  { %v5478_v9 = vadd.f32 %v2430_v63, %v2427_v45 }
 0xa33   :  { %4680 = vtanh.f32 %v5478_v9 }
 0xa3d   :  { %v4681_v58 = vpop.eup %4680 }
 0xa3e   :  { %v2434_v19 = vmul.f32 %v4681_v58, %v2422_v15  ;;  %v2755_v15 = vmul.f32 %v2752_v3, %v5412_v0 }
 0xa40   :  { %v2764_v14 = vrot.slane %v2434_v19, 4 }
 0xa42   :  { %3842 = vmatmul.mubr.msk.f32.vlgmr.msra.gmra.mrb[22].mxu0 %vm197_vm2, %v2764_v14 }
 0xa43   :  { %4397 = vmatpush1.bf16.msra.mxu0 %v5006_v28  ;;  %3097 = vmatprep.mubr.f32.mxu0 %v5679_v56 }
 0xa44   :  { %4399 = vmatprep.subr.bf16.mxu0 %v5008_v30 }
 0xa47   :  { %4401 = vmatpush1.bf16.msra.mxu0 %v5012_v39 }
 0xa48   :  { %4403 = vmatprep.subr.bf16.mxu0 %v5015_v43 }
 0xa4b   :  { %4405 = vmatpush1.bf16.msra.mxu0 %v5018_v51 }
 0xa4c   :  { %4407 = vmatprep.subr.bf16.mxu0 %v5021_v52 }
 0xa4f   :  { %4409 = vmatpush1.bf16.msra.mxu0 %v5024_v1 }
 0xa50   :  { %4411 = vmatprep.subr.bf16.mxu0 %v5027_v7 }
 0xa76   :  { %v2758_v45 = vpop.permute.xlu0 %2757 }
 0xa77   :  { %v5492_v17 = vadd.f32 %v2758_v45, %v2755_v15 }
 0xa79   :  { %4682 = vtanh.f32 %v5492_v17 }
 0xa82   :  { %v2594_v24 = vpop.permute.xlu1 %2593 }
 0xa83   :  { %v4683_v27 = vpop.eup %4682  ;;  %v5496_v2 = vadd.f32 %v2594_v24, %v2591_v23 }
 0xa84   :  { %v2762_v57 = vmul.f32 %v4683_v27, %v2753_v50 }
 0xa85   :  { %4684 = vtanh.f32 %v5496_v2 }
 0xa86   :  { %3845 = vmatmul.mubr.msk.f32.vlgmr.msra.gmra.mrb[24].mxu0 %vm197_vm2, %v2762_v57 }
 0xa87   :  { %4413 = vmatpush1.bf16.msra.mxu0 %v5048_v11  ;;  %3168 = vmatprep.mubr.f32.mxu0 %v5679_v56 }
 0xa88   :  { %4415 = vmatprep.subr.bf16.mxu0 %v5051_v22 }
 0xa8b   :  { %4417 = vmatpush1.bf16.msra.mxu0 %v5053_v33 }
 0xa8c   :  { %4419 = vmatprep.subr.bf16.mxu0 %v5057_v49 }
 0xa8f   :  { %v4685_v0 = vpop.eup %4684  ;;  %4421 = vmatpush1.bf16.msra.mxu0 %v5059_v18 }
 0xa90   :  { %v2598_v62 = vmul.f32 %v4685_v0, %v2589_v8  ;;  %4423 = vmatprep.subr.bf16.mxu0 %v5061_v21 }
 0xa92   :  { %3843 = vmatmul.mubr.msk.f32.vlgmr.msra.gmra.mrb[18].mxu1 %vm197_vm2, %v2598_v62 }
 0xa93   :  { %4381 = vmatpush1.bf16.msra.mxu1 %v4953_v20  ;;  %4425 = vmatpush1.bf16.msra.mxu0 %v5066_v38 }
 0xa94   :  { %4383 = vmatprep.subr.bf16.mxu1 %v4956_v25  ;;  %3004 = vmatprep.mubr.f32.mxu1 %v5679_v56 }
 0xa95   :  { %4459 = vmatprep.subr.bf16.mxu0 %v5700_v4 }
 0xa96   :  { %3846 = vmatmul.mubr.msk.f32.vlgmr.msra.gmra.mrb[24].mxu0 %vm197_vm2, %v2598_v62 }
 0xa97   :  { %4385 = vmatpush1.bf16.msra.mxu1 %v4958_v29  ;;  %4461 = vmatpush1.bf16.msra.mxu0 %v5006_v28 }
 0xa98   :  { %4387 = vmatprep.subr.bf16.mxu1 %v4962_v34  ;;  %4463 = vmatprep.subr.bf16.mxu0 %v5008_v30 }
 0xa99   :  { %3429 = vmatprep.mubr.f32.mxu0 %v5679_v56 }
 0xa9b   :  { %4389 = vmatpush1.bf16.msra.mxu1 %v4967_v44  ;;  %4465 = vmatpush1.bf16.msra.mxu0 %v5012_v39 }
 0xa9c   :  { %4391 = vmatprep.subr.bf16.mxu1 %v4976_v55  ;;  %4467 = vmatprep.subr.bf16.mxu0 %v5015_v43 }
 0xa9f   :  { %4393 = vmatpush1.bf16.msra.mxu1 %v4979_v59  ;;  %4469 = vmatpush1.bf16.msra.mxu0 %v5018_v51 }
 0xaa0   :  { %4427 = vmatprep.subr.bf16.mxu1 %v4899_v31  ;;  %4471 = vmatprep.subr.bf16.mxu0 %v5021_v52 }
 0xaa2   :  { %3844 = vmatmul.mubr.msk.f32.vlgmr.msra.gmra.mrb[18].mxu1 %vm197_vm2, %v2764_v14 }
 0xaa3   :  { %4429 = vmatpush1.bf16.msra.mxu1 %v4901_v35  ;;  %4473 = vmatpush1.bf16.msra.mxu0 %v5024_v1 }
 0xaa4   :  { %4431 = vmatprep.subr.bf16.mxu1 %v4903_v36  ;;  %4475 = vmatprep.subr.bf16.mxu0 %v5027_v7 }
 0xaa5   :  { %3261 = vmatprep.mubr.f32.mxu1 %v5679_v56 }
 0xaa7   :  { %4433 = vmatpush1.bf16.msra.mxu1 %v4907_v41  ;;  %v2856_v41 = vrot.slane %v5478_v9, 6 }
 0xaa8   :  { %4435 = vmatprep.subr.bf16.mxu1 %v4910_v42 }
 0xaab   :  { %4437 = vmatpush1.bf16.msra.mxu1 %v4913_v47 }
 0xaac   :  { %4439 = vmatprep.subr.bf16.mxu1 %v4916_v48 }
 0xaaf   :  { %4441 = vmatpush1.bf16.msra.mxu1 %v4919_v53 }
 0xab0   :  { %4443 = vmatprep.subr.bf16.mxu1 %v4922_v54 }
 0xb15   :  { %v2833_v31 = vpop.f32.mrb[22].mxu0 }
 0xb16   :  { %v2840_v35 = vrot.slane %v2833_v31, 2  ;;  %v2835_v3 = vpop.f32.mrb[23].mxu0 }
 0xb17   :  { %v2841_v47 = vrot.slane %v2835_v3, 2 }
 0xb18   :  { %v2844_v36 = vadd.f32 %v2840_v35, %v5701_v26 }
 0xb19   :  { %v2845_v48 = vadd.f32 %v2841_v47, %v5702_v32 }
 0xb1a   :  { %v2846_v50 = vmul.f32 0.5, %v2844_v36 }
 0xb1b   :  { %v2847_v53 = vmul.f32 %v2845_v48, %v4948_v10 }
 0xb1c   :  { %4686 = vtanh.f32 %v2846_v50 }
 0xb1d   :  { %4688 = vtanh.f32 %v2847_v53 }
 0xb26   :  { %v4687_v46 = vpop.eup %4686 }
 0xb27   :  { %v2850_v6 = vmul.f32 0.5, %v4687_v46  ;;  %v4689_v14 = vpop.eup %4688 }
 0xb28   :  { %v2851_v0 = vmul.f32 %v4689_v14, %v4948_v10 }
 0xb29   :  { %v2852_v42 = vadd.f32 0.5, %v2850_v6 }
 0xb2a   :  { %v2853_v3 = vadd.f32 %v2851_v0, %v4965_v40 }
 0xb2b   :  { %v2858_v61 = vmul.f32 %v2856_v41, %v2852_v42 }
 0xb2c   :  { %v2854_v36 = vmul.f32 %v2853_v3, %v2852_v42 }
 0xb69   :  { %v3170_v60 = vpop.f32.mrb[24].mxu0 }
 0xb6a   :  { %v3175_v54 = vadd.f32 %v3170_v60, %v5683_v5  ;;  %v3172_v8 = vpop.f32.mrb[25].mxu0 }
 0xb6b   :  { %v3176_v12 = vadd.f32 %v3172_v8, %v5684_v13 }
 0xb6c   :  { %v3177_v26 = vmul.f32 0.5, %v3175_v54 }
 0xb6d   :  { %v3178_v63 = vmul.f32 %v3176_v12, %v4948_v10 }
 0xb6e   :  { %4690 = vtanh.f32 %v3177_v26 }
 0xb6f   :  { %4692 = vtanh.f32 %v3178_v63 }
 0xb75   :  { %v3006_v9 = vpop.f32.mrb[18].mxu1 }
 0xb76   :  { %v3011_v58 = vadd.f32 %v3006_v9, %v5703_v37  ;;  %v3008_v19 = vpop.f32.mrb[19].mxu1 }
 0xb77   :  { %v3012_v32 = vadd.f32 %v3008_v19, %v5704_v16 }
 0xb78   :  { %v4691_v15 = vpop.eup %4690  ;;  %v3013_v45 = vmul.f32 0.5, %v3011_v58 }
 0xb79   :  { %v4693_v23 = vpop.eup %4692  ;;  %v3181_v24 = vmul.f32 0.5, %v4691_v15  ;;  %v3014_v27 = vmul.f32 %v3012_v32, %v4948_v10 }
 0xb7a   :  { %4694 = vtanh.f32 %v3013_v45  ;;  %v3182_v57 = vmul.f32 %v4693_v23, %v4948_v10 }
 0xb7b   :  { %v3183_v62 = vadd.f32 0.5, %v3181_v24  ;;  %4696 = vtanh.f32 %v3014_v27 }
 0xb7c   :  { %v3184_v31 = vadd.f32 %v3182_v57, %v4965_v40 }
 0xb7d   :  { %v3186_v60 = vmul.f32 %v3183_v62, %v5492_v17 }
 0xb7e   :  { %v3185_v35 = vmul.f32 %v3184_v31, %v3183_v62 }
 0xb80   :  { %3188 = vrot.lane.b32.xlu0 %v3185_v35, %s4804_s21 }
 0xb84   :  { %v4695_v50 = vpop.eup %4694  ;;  %2860 = vrot.lane.b32.xlu0 %v2854_v36, %s4804_s21 }
 0xb85   :  { %v4697_v46 = vpop.eup %4696  ;;  %v3017_v6 = vmul.f32 0.5, %v4695_v50 }
 0xb86   :  { %v3018_v41 = vmul.f32 %v4697_v46, %v4948_v10 }
 0xb87   :  { %v3019_v47 = vadd.f32 0.5, %v3017_v6 }
 0xb88   :  { %v3020_v48 = vadd.f32 %v3018_v41, %v4965_v40 }
 0xb89   :  { %v3022_v42 = vmul.f32 %v3019_v47, %v5496_v2 }
 0xb8a   :  { %v3021_v53 = vmul.f32 %v3020_v48, %v3019_v47 }
 0xb8c   :  { %3024 = vrot.lane.b32.xlu1 %v3021_v53, %s4804_s21 }
 0xbf2   :  { %v3189_v54 = vpop.permute.xlu0 %3188 }
 0xbf3   :  { %v5559_v8 = vadd.f32 %v3189_v54, %v3186_v60 }
 0xbf5   :  { %4698 = vtanh.f32 %v5559_v8 }
 0xbf6   :  { %v2861_v17 = vpop.permute.xlu0 %2860 }
 0xbf7   :  { %v2863_v58 = vadd.f32 %v2861_v17, %v2858_v61 }
 0xbfe   :  { %v3025_v12 = vpop.permute.xlu1 %3024 }
 0xbff   :  { %v4699_v26 = vpop.eup %4698  ;;  %v5563_v63 = vadd.f32 %v3025_v12, %v3022_v42 }
 0xc00   :  { %v3193_v9 = vmul.f32 %v4699_v26, %v3184_v31 }
 0xc01   :  { %4700 = vtanh.f32 %v5563_v63 }
 0xc02   :  { %3849 = vmatmul.mubr.msk.f32.vlgmr.msra.gmra.mrb[26].mxu0 %vm197_vm2, %v3193_v9  ;;  %4702 = vtanh.f32 %v2863_v58 }
 0xc03   :  { %4477 = vmatpush1.bf16.msra.mxu0 %v5048_v11  ;;  %3500 = vmatprep.mubr.f32.mxu0 %v5679_v56 }
 0xc04   :  { %4479 = vmatprep.subr.bf16.mxu0 %v5051_v22 }
 0xc07   :  { %4481 = vmatpush1.bf16.msra.mxu0 %v5053_v33 }
 0xc08   :  { %4483 = vmatprep.subr.bf16.mxu0 %v5057_v49 }
 0xc0b   :  { %v4701_v2 = vpop.eup %4700  ;;  %4485 = vmatpush1.bf16.msra.mxu0 %v5059_v18 }
 0xc0c   :  { %v3029_v19 = vmul.f32 %v4701_v2, %v3020_v48  ;;  %4487 = vmatprep.subr.bf16.mxu0 %v5061_v21  ;;  %v4703_v61 = vpop.eup %4702 }
 0xc0d   :  { %v2865_v14 = vmul.f32 %v4703_v61, %v2853_v3 }
 0xc0e   :  { %3847 = vmatmul.mubr.msk.f32.vlgmr.msra.gmra.mrb[20].mxu1 %vm197_vm2, %v3029_v19 }
 0xc0f   :  { %4445 = vmatpush1.bf16.msra.mxu1 %v4953_v20  ;;  %4489 = vmatpush1.bf16.msra.mxu0 %v5066_v38  ;;  %v3269_v20 = vrot.slane %v2865_v14, 6  ;;  %v3713_v14 = vld [vmem:[#allocation5] sm:$0xff] }
 0xc10   :  { %4447 = vmatprep.subr.bf16.mxu1 %v4956_v25  ;;  %3336 = vmatprep.mubr.f32.mxu1 %v5679_v56 }
 0xc12   :  { %3850 = vmatmul.mubr.msk.f32.vlgmr.msra.gmra.mrb[26].mxu0 %vm197_vm2, %v3029_v19 }
 0xc13   :  { %4449 = vmatpush1.bf16.msra.mxu1 %v4958_v29  ;;  %3879 = vmatprep.mubr.msk.f32.mxu0 %vm4806_vm4, %v5679_v56 }
 0xc14   :  { %4451 = vmatprep.subr.bf16.mxu1 %v4962_v34 }
 0xc17   :  { %4453 = vmatpush1.bf16.msra.mxu1 %v4967_v44 }
 0xc18   :  { %4455 = vmatprep.subr.bf16.mxu1 %v4976_v55 }
 0xc1b   :  { %4457 = vmatpush1.bf16.msra.mxu1 %v4979_v59 }
 0xc1c   :  { %4491 = vmatprep.subr.bf16.mxu1 %v5700_v4 }
 0xc1e   :  { %3848 = vmatmul.mubr.msk.f32.vlgmr.msra.gmra.mrb[20].mxu1 %vm197_vm2, %v3269_v20 }
 0xc1f   :  { %4493 = vmatpush1.bf16.msra.mxu1 %v5006_v28  ;;  %3593 = vmatprep.mubr.f32.mxu1 %v5679_v56 }
 0xc20   :  { %4495 = vmatprep.subr.bf16.mxu1 %v5008_v30 }
 0xc23   :  { %4497 = vmatpush1.bf16.msra.mxu1 %v5012_v39 }
 0xc24   :  { %4499 = vmatprep.subr.bf16.mxu1 %v5015_v43 }
 0xc27   :  { %4501 = vmatpush1.bf16.msra.mxu1 %v5018_v51 }
 0xc28   :  { %4503 = vmatprep.subr.bf16.mxu1 %v5021_v52 }
 0xc2b   :  { %4505 = vmatpush1.bf16.msra.mxu1 %v5024_v1 }
 0xc2c   :  { %4507 = vmatprep.subr.bf16.mxu1 %v5027_v7 }
 0xce5   :  { %v3502_v25 = vpop.f32.mrb[26].mxu0 }
 0xce6   :  { %v3507_v29 = vadd.f32 %v3502_v25, %v5683_v5  ;;  %v3504_v34 = vpop.f32.mrb[27].mxu0  ;;  %v4805_v25 = vmov 0.0|0.0  }
 0xce7   :  { %v3508_v44 = vadd.f32 %v3504_v34, %v5684_v13  ;;  %4522 = vmatprep.subr.bf16.mxu0 %v4805_v25  ;;  %v3716_v34 = vld [vmem:[#allocation5 + $0x18] sm:$0xff] }
 0xce8   :  { %v3509_v55 = vmul.f32 0.5, %v3507_v29  ;;  %v3715_v29 = vld [vmem:[#allocation5 + $0x10] sm:$0xff] }
 0xce9   :  { %v3510_v59 = vmul.f32 %v3508_v44, %v4948_v10  ;;  %v4526_v44 = vpack.c.bf16 %v3716_v34, %v3715_v29 }
 0xcea   :  { %4704 = vtanh.f32 %v3509_v55  ;;  %v3717_v55 = vld [vmem:[#allocation5 + $0x20] sm:$0xff] }
 0xceb   :  { %4706 = vtanh.f32 %v3510_v59  ;;  %v3718_v59 = vld [vmem:[#allocation5 + $0x28] sm:$0xff] }
 0xcf1   :  { %v3338_v28 = vpop.f32.mrb[20].mxu1 }
 0xcf2   :  { %v3343_v30 = vadd.f32 %v3338_v28, %v5703_v37  ;;  %v3340_v39 = vpop.f32.mrb[21].mxu1  ;;  %v4529_v28 = vpack.c.bf16 %v3718_v59, %v3717_v55 }
 0xcf3   :  { %v3344_v43 = vadd.f32 %v3340_v39, %v5704_v16  ;;  %v3720_v39 = vld [vmem:[#allocation5 + $0x38] sm:$0xff] }
 0xcf4   :  { %v4705_v51 = vpop.eup %4704  ;;  %v3345_v52 = vmul.f32 0.5, %v3343_v30  ;;  %v3719_v30 = vld [vmem:[#allocation5 + $0x30] sm:$0xff] }
 0xcf5   :  { %v4707_v1 = vpop.eup %4706  ;;  %v3513_v7 = vmul.f32 0.5, %v4705_v51  ;;  %v3346_v4 = vmul.f32 %v3344_v43, %v4948_v10  ;;  %v4532_v43 = vpack.c.bf16 %v3720_v39, %v3719_v30 }
 0xcf6   :  { %4708 = vtanh.f32 %v3345_v52  ;;  %v3514_v32 = vmul.f32 %v4707_v1, %v4948_v10 }
 0xcf7   :  { %v3515_v15 = vadd.f32 0.5, %v3513_v7  ;;  %4710 = vtanh.f32 %v3346_v4  ;;  %v3708_v4 = vld [vmem:[%s5651_s2 + $0x3] ss:$0 sm:$0xff] }
 0xcf8   :  { %v3516_v45 = vadd.f32 %v3514_v32, %v4965_v40 }
 0xcf9   :  { %v3518_v31 = vmul.f32 %v3515_v15, %v5559_v8 }
 0xcfa   :  { %v3517_v23 = vmul.f32 %v3516_v45, %v3515_v15  ;;  %v3710_v15 = vld [vmem:[%s5651_s2 + $0x4] ss:$0 sm:$0xff] }
 0xcfc   :  { %3520 = vrot.lane.b32.xlu1 %v3517_v23, %s4804_s21 }
 0xd00   :  { %v4709_v37 = vpop.eup %4708 }
 0xd01   :  { %v4711_v24 = vpop.eup %4710  ;;  %v3349_v27 = vmul.f32 0.5, %v4709_v37 }
 0xd02   :  { %v3350_v16 = vmul.f32 %v4711_v24, %v4948_v10 }
 0xd03   :  { %v3351_v57 = vadd.f32 0.5, %v3349_v27 }
 0xd04   :  { %v3352_v0 = vadd.f32 %v3350_v16, %v4965_v40 }
 0xd05   :  { %v3354_v36 = vmul.f32 %v3351_v57, %v5563_v63 }
 0xd06   :  { %v3353_v62 = vmul.f32 %v3352_v0, %v3351_v57 }
 0xd08   :  { %3356 = vrot.lane.b32.xlu0 %v3353_v62, %s4804_s21 }
 0xd6e   :  { %v3521_v35 = vpop.permute.xlu1 %3520 }
 0xd6f   :  { %v3523_v3 = vadd.f32 %v3521_v35, %v3518_v31 }
 0xd71   :  { %4712 = vtanh.f32 %v3523_v3 }
 0xd7a   :  { %v3357_v50 = vpop.permute.xlu0 %3356 }
 0xd7b   :  { %v4713_v46 = vpop.eup %4712  ;;  %v3359_v6 = vadd.f32 %v3357_v50, %v3354_v36 }
 0xd7c   :  { %v3525_v41 = vmul.f32 %v4713_v46, %v3516_v45 }
 0xd7d   :  { %4714 = vtanh.f32 %v3359_v6 }
 0xd7e   :  { %3851 = vmatmul.mubr.msk.f32.vlgmr.msra.gmra.mrb[22].mxu1 %vm197_vm2, %v3525_v41 }
 0xd7f   :  { %4509 = vmatpush1.bf16.msra.mxu1 %v5048_v11  ;;  %3667 = vmatprep.mubr.f32.mxu1 %v5679_v56  ;;  %v3721_v56 = vld [vmem:[%s5651_s2 + $0x5] ss:$0 sm:$0xff] }
 0xd80   :  { %4511 = vmatprep.subr.bf16.mxu1 %v5051_v22 }
 0xd83   :  { %4513 = vmatpush1.bf16.msra.mxu1 %v5053_v33 }
 0xd84   :  { %4515 = vmatprep.subr.bf16.mxu1 %v5057_v49 }
 0xd87   :  { %4517 = vmatpush1.bf16.msra.mxu1 %v5059_v18  ;;  %v4715_v47 = vpop.eup %4714 }
 0xd88   :  { %4519 = vmatprep.subr.bf16.mxu1 %v5061_v21  ;;  %v3361_v48 = vmul.f32 %v4715_v47, %v3352_v0 }
 0xd8b   :  { %4521 = vmatpush1.bf16.msra.mxu1 %v5066_v38 }
 0xd8e   :  { %3852 = vmatmul.mubr.msk.f32.vlgmr.msra.gmra.mrb[22].mxu1 %vm197_vm2, %v3361_v48 }
 0xe61   :  { %v3669_v53 = vpop.f32.mrb[22].mxu1 }
 0xe62   :  { %v3674_v11 = vadd.f32 %v3669_v53, %v5683_v5  ;;  %v3671_v60 = vpop.f32.mrb[23].mxu1 }
 0xe63   :  { %v3675_v22 = vadd.f32 %v3671_v60, %v5684_v13 }
 0xe64   :  { %v3676_v54 = vmul.f32 0.5, %v3674_v11 }
 0xe65   :  { %v3677_v33 = vmul.f32 %v3675_v22, %v4948_v10 }
 0xe66   :  { %4716 = vtanh.f32 %v3676_v54 }
 0xe67   :  { %4718 = vtanh.f32 %v3677_v33 }
 0xe70   :  { %v4717_v49 = vpop.eup %4716 }
 0xe71   :  { %v4719_v18 = vpop.eup %4718  ;;  %v3680_v21 = vmul.f32 0.5, %v4717_v49 }
 0xe72   :  { %v3681_v8 = vmul.f32 %v4719_v18, %v4948_v10 }
 0xe73   :  { %v3682_v38 = vadd.f32 0.5, %v3680_v21 }
 0xe74   :  { %v3683_v42 = vadd.f32 %v3681_v8, %v4965_v40  ;;  %v3714_v40 = vld [vmem:[#allocation5 + $0x8] sm:$0xff] }
 0xe75   :  { %v3685_v5 = vmul.f32 %v3682_v38, %v3523_v3  ;;  %v4523_v20 = vpack.c.bf16 %v3714_v40, %v3713_v14 }
 0xe76   :  { %v3684_v12 = vmul.f32 %v3683_v42, %v3682_v38 }
 0xe77   :  { %4524 = vmatpush3.bf16.msra.mxu0 %v4523_v20 }
 0xe78   :  { %3687 = vrot.lane.b32.xlu1 %v3684_v12, %s4804_s21  ;;  %4525 = vmatprep.subr.bf16.mxu0 %v4805_v25 }
 0xe7b   :  { %4527 = vmatpush3.bf16.msra.mxu0 %v4526_v44 }
 0xe7c   :  { %4528 = vmatprep.subr.bf16.mxu0 %v4805_v25 }
 0xe7f   :  { %4530 = vmatpush3.bf16.msra.mxu0 %v4529_v28 }
 0xe80   :  { %4531 = vmatprep.subr.bf16.mxu0 %v4805_v25 }
 0xe83   :  { %4533 = vmatpush3.bf16.msra.mxu0 %v4532_v43 }
 0xeea   :  { %v3688_v26 = vpop.permute.xlu1 %3687 }
 0xeeb   :  { %v3690_v63 = vadd.f32 %v3688_v26, %v3685_v5 }
 0xeed   :  { %4720 = vtanh.f32 %v3690_v63 }
 0xef7   :  { %v4721_v13 = vpop.eup %4720 }
 0xef8   :  { %v3692_v9 = vmul.f32 %v4721_v13, %v3683_v42 }
 0xefa   :  { %v3694_v17 = vsel %vm3693_vm3, %v3692_v9, 0.0 }
 0xefb   :  { %3695 = vadd.xlane.f32.xlu0 %v3694_v17 }
 0xf88   :  { %v3696_v58 = vpop.xlane.xlu0 %3695 }
 0xf89   :  { %v3698_v2 = vmul.f32 0.015625, %v3696_v58 }
 0xf8b   :  { %v3699_v19 = vsub.f32 %v3692_v9, %v3698_v2 }
 0xf8d   :  { %v3700_v61 = vmul.f32 %v3699_v19, %v3699_v19 }
 0xf8f   :  { %v3701_v10 = vsel %vm3693_vm3, %v3700_v61, 0.0 }
 0xf90   :  { %3702 = vadd.xlane.f32.xlu1 %v3701_v10 }
0x101d   :  { %v3703_v51 = vpop.xlane.xlu1 %3702 }
0x101e   :  { %v3704_v52 = vmul.f32 0.015625, %v3703_v51 }
0x1020   :  { %v3705_v1 = vadd.f32 1e-05, %v3704_v52 }
0x1022   :  { %4722 = vrsqrt.f32 %v3705_v1 }
0x102c   :  { %v4723_v7 = vpop.eup %4722 }
0x102d   :  { %v3707_v32 = vmul.f32 %v4723_v7, %v3699_v19 }
0x102f   :  { %v3709_v45 = vmul.f32 %v3708_v4, %v3707_v32 }
0x1031   :  { %v3711_v23 = vadd.f32 %v3710_v15, %v3709_v45 }
0x1033   :  { %v3712_v37 = vmax.f32 %v3711_v23, 0.0 }
0x1035   :  { %3880 = vmatmul.mubr.msk.f32.vlgmr.msra.gmra.mrb[28].mxu0 %vm197_vm2, %v3712_v37 }
0x1108   :  { %v3791_v24 = vpop.f32.mrb[28].mxu0 }
0x1109   :  { %v3792_v27 = vadd.f32 %v3791_v24, %v3721_v56  ;;  %v3881_v16 = vpop.f32.mrb[29].mxu0 }
0x110b   :  { %3795 = vst [vmem:[#allocation7] sm:$0x3] %v3792_v27 }
0x110c   :  { %4779 = shalt.err (!%p4776_p6)
}
0x110d   :  { %s4780_s10 = scalar_lea.hbm %s5653_s4, 32 }
0x110e   :  { %p4781_p7 = scmp.ne.s32.totalorder %s5653_s4, %s4780_s10  ;;  %p4784_p8 = scmp.lt.u32.totalorder %s4780_s10, %s5653_s4 }
0x1110   :  { %p4786_p9 = pnand %p4784_p8, %p4781_p7 }
0x1112   :  { %4789 = shalt.err (!%p4786_p9)
}
0x1113   :  { %3805 = dma.vmem_to_hbm [thread:$0]  %s3803_s6, 32, %s5653_s4, [#allocation4]  }
0x1114   :  { %4794 = dma.done.wait [#allocation4], 32  }
0x1115   :  { %4795 = vsyncadd [#allocation4], 4294967264 }
0x1116   :  { %3809 = vsyncpa [#allocation3], 1 }
0x1117   :  { %3810 = vsyncpa [#allocation6], 1 }
0x1118   :  { %3811 = vsyncpa [#allocation4], 1 }

</bundles_post_ra>
